<compile_context>
chip_gen: v5e
topology: v5e:2x2
jax: 0.10.0
libtpu: 0.0.40
codegen_flags: <defaults>
</compile_context>

<pallas_src>
import functools

import jax
import jax.numpy as jnp
from jax.experimental import pallas as pl
from jax.experimental.pallas import tpu as pltpu

BN_EPS = 1e-5
LANE = 128
HIDDEN = 1024  # fixed by the module: fc1_1 = nn.Linear(inc, 1024)


def _round_up(x, m):
    return (x + m - 1) // m * m


def _vmem_limit(block_bytes):
    # Double-buffered worst case + headroom, clamped to a range that is safe on
    # every generation (v7x has only 64 MiB physical VMEM; v5e/v6e default 16/32).
    est = 2 * block_bytes + (4 << 20)
    return int(min(max(est, 32 << 20), 48 << 20))


# ---------------------------------------------------------------------------
# Pass 1: fc1 (bf16 MXU matmul, f32 accumulate) + per-tile partial batch stats
# ---------------------------------------------------------------------------
def _fc1_stats_kernel(x_ref, w1_ref, b1_ref, h_ref, psum_ref, psq_ref, *,
                      tile_rows, n_rows, needs_mask):
    # fc1_1: (TN, inc) @ (inc, 1024) + b1
    h = jnp.dot(x_ref[...], w1_ref[...],
                preferred_element_type=jnp.float32) + b1_ref[...]
    # Store the activation in bf16: pass 2 re-casts it to bf16 for fc2 anyway,
    # and this halves the HBM round trip of the largest intermediate.
    h_ref[...] = h.astype(h_ref.dtype)

    if needs_mask:
        # Exclude zero-padded batch rows from the BatchNorm statistics.
        # (Padded rows still hold h = b1 in the stored activation; they are
        #  sliced off by the wrapper after pass 2.)
        row = pl.program_id(0) * tile_rows + jax.lax.broadcasted_iota(
            jnp.int32, h.shape, 0)
        h = jnp.where(row < n_rows, h, 0.0)

    # Per-tile partial statistics (f32, from the un-cast MXU accumulator).
    psum_ref[...] = jnp.sum(h, axis=0, keepdims=True).reshape(psum_ref.shape)
    psq_ref[...] = jnp.sum(h * h, axis=0, keepdims=True).reshape(psq_ref.shape)


# ---------------------------------------------------------------------------
# Pass 2: folded BN (scale/shift FMA) + ReLU + fc2 (lane-dense) + log_softmax
# ---------------------------------------------------------------------------
def _bn_fc2_lsm_kernel(h_ref, scale_ref, shift_ref, w2_ref, b2_ref, out_ref, *,
                       ndomains):
    # BatchNorm folded into one FMA (scale/shift precomputed in the wrapper).
    h = jnp.maximum(h_ref[...].astype(jnp.float32) * scale_ref[...]
                    + shift_ref[...], 0.0)

    # fc2_1: (TN, 1024) @ (1024, 128-padded) + b2 -- bf16 inputs, f32 accumulate.
    logits = jnp.dot(h.astype(jnp.bfloat16), w2_ref[...],
                     preferred_element_type=jnp.float32) + b2_ref[...]

    # Mask zero-padded lanes so they do not contribute to the softmax.
    lane = jax.lax.broadcasted_iota(jnp.int32, logits.shape, 1)
    logits = jnp.where(lane < ndomains, logits, -1e30)

    # log_softmax(dim=1)
    m = jnp.max(logits, axis=1, keepdims=True)
    z = logits - m
    lse = jnp.log(jnp.sum(jnp.exp(z), axis=1, keepdims=True))
    out_ref[...] = (z - lse).astype(out_ref.dtype)


# ---------------------------------------------------------------------------
# One-time operand prep (hoisted out of the per-call path)
# ---------------------------------------------------------------------------
def prepare_params(params):
    hidden = params["w1t"].shape[1]
    ndomains = params["b2"].shape[1]
    out_pad = _round_up(max(ndomains, 1), LANE)
    w2 = jnp.zeros((hidden, out_pad), jnp.bfloat16).at[:, :ndomains].set(
        params["w2t"].astype(jnp.bfloat16))
    b2 = jnp.zeros((1, out_pad), jnp.float32).at[:, :ndomains].set(
        params["b2"].astype(jnp.float32))
    return dict(
        w1=params["w1t"].astype(jnp.bfloat16),
        b1=params["b1"].astype(jnp.float32),
        gamma=params["gamma"].astype(jnp.float32),
        beta=params["beta"].astype(jnp.float32),
        w2=w2,
        b2=b2,
        ndomains=ndomains,
        out_pad=out_pad,
    )


# ---------------------------------------------------------------------------
# Forward wrapper
# ---------------------------------------------------------------------------
def discriminator_forward(x, prep, *, tile_rows=256):
    """x: [N, inc] float32.  prep: output of prepare_params()."""
    n, inc = x.shape
    hidden = prep["w1"].shape[1]
    ndomains, out_pad = prep["ndomains"], prep["out_pad"]

    # bf16 native tile is (16, 128): keep row tiles 16-aligned.
    tn = tile_rows if n >= tile_rows else _round_up(n, 16)
    n_pad = _round_up(n, tn)
    num_tiles = n_pad // tn
    needs_mask = n_pad != n

    xb = x.astype(jnp.bfloat16)
    if needs_mask:
        xb = jnp.pad(xb, ((0, n_pad - n), (0, 0)))

    # ---- pass 1: fc1 + per-tile partial batch statistics (batch "parallel") ----
    kern1 = functools.partial(_fc1_stats_kernel, tile_rows=tn, n_rows=n,
                              needs_mask=needs_mask)
    blk1_bytes = (tn * inc * 2 + inc * hidden * 2 + hidden * 4
                  + tn * hidden * 2 + 2 * hidden * 4)
    h, psum, psq = pl.pallas_call(
        kern1,
        grid=(num_tiles,),
        out_shape=(jax.ShapeDtypeStruct((n_pad, hidden), jnp.bfloat16),
                   jax.ShapeDtypeStruct((num_tiles, 1, hidden), jnp.float32),
                   jax.ShapeDtypeStruct((num_tiles, 1, hidden), jnp.float32)),
        in_specs=[pl.BlockSpec((tn, inc), lambda i: (i, 0)),
                  pl.BlockSpec((inc, hidden), lambda i: (0, 0)),
                  pl.BlockSpec((1, hidden), lambda i: (0, 0))],
        out_specs=(pl.BlockSpec((tn, hidden), lambda i: (i, 0)),
                   pl.BlockSpec((1, 1, hidden), lambda i: (i, 0, 0)),
                   pl.BlockSpec((1, 1, hidden), lambda i: (i, 0, 0))),
        compiler_params=pltpu.CompilerParams(
            dimension_semantics=("parallel",),
            vmem_limit_bytes=_vmem_limit(blk1_bytes)),
        cost_estimate=pl.CostEstimate(
            flops=int(2 * n_pad * inc * hidden + 3 * n_pad * hidden),
            transcendentals=0,
            bytes_accessed=int(2 * n_pad * inc + 2 * inc * hidden
                               + 2 * n_pad * hidden
                               + 4 * hidden * (2 * num_tiles + 1))),
    )(xb, prep["w1"], prep["b1"])

    # ---- tiny XLA reduction + BN scale/shift fold (once per forward) ----------
    ssum = jnp.sum(psum, axis=0)                       # (1, hidden)
    ssq = jnp.sum(psq, axis=0)                         # (1, hidden)
    inv_n = 1.0 / float(n)
    mean = ssum * inv_n
    var = jnp.maximum(ssq * inv_n - mean * mean, 0.0)  # biased var, clamped >= 0
    scale = prep["gamma"] * jax.lax.rsqrt(var + BN_EPS)
    shift = prep["beta"] - mean * scale

    # ---- pass 2: BN + ReLU + fc2 + log_softmax (batch "parallel") -------------
    kern2 = functools.partial(_bn_fc2_lsm_kernel, ndomains=ndomains)
    blk2_bytes = (tn * hidden * 2 + 2 * hidden * 4 + hidden * out_pad * 2
                  + out_pad * 4 + tn * out_pad * 4)
    out = pl.pallas_call(
        kern2,
        grid=(num_tiles,),
        out_shape=jax.ShapeDtypeStruct((n_pad, out_pad), jnp.float32),
        in_specs=[pl.BlockSpec((tn, hidden), lambda i: (i, 0)),
                  pl.BlockSpec((1, hidden), lambda i: (0, 0)),
                  pl.BlockSpec((1, hidden), lambda i: (0, 0)),
                  pl.BlockSpec((hidden, out_pad), lambda i: (0, 0)),
                  pl.BlockSpec((1, out_pad), lambda i: (0, 0))],
        out_specs=pl.BlockSpec((tn, out_pad), lambda i: (i, 0)),
        compiler_params=pltpu.CompilerParams(
            dimension_semantics=("parallel",),
            vmem_limit_bytes=_vmem_limit(blk2_bytes)),
        cost_estimate=pl.CostEstimate(
            flops=int(2 * n_pad * hidden * out_pad + 4 * n_pad * hidden),
            transcendentals=int(n_pad * out_pad),
            bytes_accessed=int(2 * n_pad * hidden + 2 * hidden * out_pad
                               + 4 * (2 * hidden + out_pad)
                               + 4 * n_pad * out_pad)),
    )(h, scale, shift, prep["w2"], prep["b2"])

    return out[:n, :ndomains]


# ---------------------------------------------------------------------------
# Parameters / reference
# ---------------------------------------------------------------------------
def init_params(key, inc, hidden, ndomains):
    """Deterministic synthetic parameters (PyTorch Linear-like uniform init)."""
    k1, k2, k3, k4 = jax.random.split(key, 4)
    bound1 = 1.0 / (inc ** 0.5)
    bound2 = 1.0 / (hidden ** 0.5)
    # Stored pre-transposed: [in, out]
    w1t = jax.random.uniform(k1, (inc, hidden), jnp.float32, -bound1, bound1)
    b1 = jax.random.uniform(k2, (1, hidden), jnp.float32, -bound1, bound1)
    w2t = jax.random.uniform(k3, (hidden, ndomains), jnp.float32, -bound2, bound2)
    b2 = jax.random.uniform(k4, (1, ndomains), jnp.float32, -bound2, bound2)
    # BatchNorm1d default affine params
    gamma = jnp.ones((1, hidden), jnp.float32)
    beta = jnp.zeros((1, hidden), jnp.float32)
    return dict(w1t=w1t, b1=b1, gamma=gamma, beta=beta, w2t=w2t, b2=b2)


def reference_forward(x, p):
    """Pure-JAX reference with the same bf16-matmul / f32-accumulate numerics."""
    n = x.shape[0]
    h = jnp.dot(x.astype(jnp.bfloat16), p["w1t"].astype(jnp.bfloat16),
                preferred_element_type=jnp.float32) + p["b1"]
    mean = jnp.sum(h, axis=0, keepdims=True) / n
    var = jnp.maximum(jnp.sum(h * h, axis=0, keepdims=True) / n - mean * mean, 0.0)
    scale = p["gamma"] * jax.lax.rsqrt(var + BN_EPS)
    shift = p["beta"] - mean * scale
    h = jnp.maximum(h * scale + shift, 0.0)
    logits = jnp.dot(h.astype(jnp.bfloat16), p["w2t"].astype(jnp.bfloat16),
                     preferred_element_type=jnp.float32) + p["b2"]
    return jax.nn.log_softmax(logits, axis=1)


if __name__ == "__main__":
    # fc1 output width is fixed at 1024 by the module; N=512 exercises a 2-tile
    # "parallel" batch grid with 256-row tiles.
    N, INC, NDOMAINS = 512, 256, 4

    key = jax.random.PRNGKey(0)
    kx, kp = jax.random.split(key)
    x = jax.random.normal(kx, (N, INC), jnp.float32)
    params = init_params(kp, INC, HIDDEN, NDOMAINS)
    prep = prepare_params(params)   # one-time operand prep (bf16 casts, padding)

    out = jax.block_until_ready(discriminator_forward(x, prep))
    ref = reference_forward(x, params)
    assert out.shape == (N, NDOMAINS)
    assert jnp.allclose(out, ref, atol=2e-2, rtol=2e-2), "mismatch vs reference"

    # Ragged batch: exercises the row-mask path and 16-aligned tile rounding.
    x2 = jax.random.normal(jax.random.PRNGKey(1), (100, INC), jnp.float32)
    out2 = jax.block_until_ready(discriminator_forward(x2, prep))
    ref2 = reference_forward(x2, params)
    assert out2.shape == (100, NDOMAINS)
    assert jnp.allclose(out2, ref2, atol=2e-2, rtol=2e-2), "mismatch (ragged batch)"

    print("KERNEL_OK")
</pallas_src>

<mosaic_0001>
module attributes {stable_mosaic.version = 11 : i64} {
  func.func @_fc1_stats_kernel(%arg0: i32, %arg1: memref<256x256xbf16, #tpu.memory_space<vmem>>, %arg2: memref<256x1024xbf16, #tpu.memory_space<vmem>>, %arg3: memref<1x1024xf32, #tpu.memory_space<vmem>>, %arg4: memref<256x1024xbf16, #tpu.memory_space<vmem>>, %arg5: memref<1x1x1024xf32, #tpu.memory_space<vmem>>, %arg6: memref<1x1x1024xf32, #tpu.memory_space<vmem>>) attributes {dimension_semantics = [#tpu.dimension_semantics<parallel>], iteration_bounds = array<i64: 2>, scalar_prefetch = 0 : i64, scratch_operands = 0 : i64, tpu.core_type = #tpu.core_type<tc>, window_params = [{transform_indices = @transform_0, window_bounds = array<i64: 256, 256>}, {pipeline_mode = #tpu.pipeline_mode<synchronous>, transform_indices = @transform_1, window_bounds = array<i64: 256, 1024>}, {pipeline_mode = #tpu.pipeline_mode<synchronous>, transform_indices = @transform_2, window_bounds = array<i64: 1, 1024>}, {transform_indices = @transform_3, window_bounds = array<i64: 256, 1024>}, {transform_indices = @transform_4, window_bounds = array<i64: 1, 1, 1024>}, {transform_indices = @transform_5, window_bounds = array<i64: 1, 1, 1024>}]} {
    %c0 = arith.constant 0 : index
    %c0_0 = arith.constant 0 : index
    %0 = vector.load %arg1[%c0, %c0_0] : memref<256x256xbf16, #tpu.memory_space<vmem>>, vector<256x256xbf16>
    %c0_1 = arith.constant 0 : index
    %c0_2 = arith.constant 0 : index
    %1 = vector.load %arg2[%c0_1, %c0_2] : memref<256x1024xbf16, #tpu.memory_space<vmem>>, vector<256x1024xbf16>
    %cst = arith.constant dense<0.000000e+00> : vector<256x1024xf32>
    %2 = tpu.matmul %0, %1, %cst {dimension_numbers = #tpu.dot_dimension_numbers<[1], [0], [0], [1], [0, 0, 1, 1], [], []>} : vector<256x256xbf16>, vector<256x1024xbf16>, vector<256x1024xf32> -> vector<256x1024xf32>
    %c0_3 = arith.constant 0 : index
    %c0_4 = arith.constant 0 : index
    %3 = vector.load %arg3[%c0_3, %c0_4] : memref<1x1024xf32, #tpu.memory_space<vmem>>, vector<1x1024xf32>
    %4 = vector.broadcast %3 : vector<1x1024xf32> to vector<256x1024xf32>
    %5 = arith.addf %2, %4 : vector<256x1024xf32>
    %6 = arith.truncf %5 : vector<256x1024xf32> to vector<256x1024xbf16>
    %c0_5 = arith.constant 0 : index
    %c0_6 = arith.constant 0 : index
    %7 = vector.load %arg4[%c0_5, %c0_6] : memref<256x1024xbf16, #tpu.memory_space<vmem>>, vector<256x1024xbf16>
    tpu.vector_store %arg4[%c0_5, %c0_6], %6 {strides = array<i32>} : memref<256x1024xbf16, #tpu.memory_space<vmem>>, vector<256x1024xbf16>,
    %cst_7 = arith.constant dense<0.000000e+00> : vector<1024xf32>
    %8 = vector.multi_reduction <add>, %5, %cst_7 [0] : vector<256x1024xf32> to vector<1024xf32>
    %9 = vector.shape_cast %8 : vector<1024xf32> to vector<1x1024xf32>
    %10 = vector.shape_cast %9 : vector<1x1024xf32> to vector<1x1x1024xf32>
    %c0_8 = arith.constant 0 : index
    %c0_9 = arith.constant 0 : index
    %c0_10 = arith.constant 0 : index
    %11 = vector.load %arg5[%c0_8, %c0_9, %c0_10] : memref<1x1x1024xf32, #tpu.memory_space<vmem>>, vector<1x1x1024xf32>
    tpu.vector_store %arg5[%c0_8, %c0_9, %c0_10], %10 {strides = array<i32>} : memref<1x1x1024xf32, #tpu.memory_space<vmem>>, vector<1x1x1024xf32>,
    %12 = arith.mulf %5, %5 : vector<256x1024xf32>
    %cst_11 = arith.constant dense<0.000000e+00> : vector<1024xf32>
    %13 = vector.multi_reduction <add>, %12, %cst_11 [0] : vector<256x1024xf32> to vector<1024xf32>
    %14 = vector.shape_cast %13 : vector<1024xf32> to vector<1x1024xf32>
    %15 = vector.shape_cast %14 : vector<1x1024xf32> to vector<1x1x1024xf32>
    %c0_12 = arith.constant 0 : index
    %c0_13 = arith.constant 0 : index
    %c0_14 = arith.constant 0 : index
    %16 = vector.load %arg6[%c0_12, %c0_13, %c0_14] : memref<1x1x1024xf32, #tpu.memory_space<vmem>>, vector<1x1x1024xf32>
    tpu.vector_store %arg6[%c0_12, %c0_13, %c0_14], %15 {strides = array<i32>} : memref<1x1x1024xf32, #tpu.memory_space<vmem>>, vector<1x1x1024xf32>,
    return
  }
  func.func @transform_0(%arg0: i32) -> (i32, i32) {
    %c0_i32 = arith.constant 0 : i32
    %c0_i32_0 = arith.constant 0 : i32
    return %arg0, %c0_i32 : i32, i32
  }
  func.func @transform_1(%arg0: i32) -> (i32, i32) {
    %c0_i32 = arith.constant 0 : i32
    %c0_i32_0 = arith.constant 0 : i32
    %c0_i32_1 = arith.constant 0 : i32
    return %c0_i32, %c0_i32_0 : i32, i32
  }
  func.func @transform_2(%arg0: i32) -> (i32, i32) {
    %c0_i32 = arith.constant 0 : i32
    %c0_i32_0 = arith.constant 0 : i32
    %c0_i32_1 = arith.constant 0 : i32
    return %c0_i32, %c0_i32_0 : i32, i32
  }
  func.func @transform_3(%arg0: i32) -> (i32, i32) {
    %c0_i32 = arith.constant 0 : i32
    %c0_i32_0 = arith.constant 0 : i32
    return %arg0, %c0_i32 : i32, i32
  }
  func.func @transform_4(%arg0: i32) -> (i32, i32, i32) {
    %c0_i32 = arith.constant 0 : i32
    %c0_i32_0 = arith.constant 0 : i32
    %c0_i32_1 = arith.constant 0 : i32
    return %arg0, %c0_i32, %c0_i32_0 : i32, i32, i32
  }
  func.func @transform_5(%arg0: i32) -> (i32, i32, i32) {
    %c0_i32 = arith.constant 0 : i32
    %c0_i32_0 = arith.constant 0 : i32
    %c0_i32_1 = arith.constant 0 : i32
    return %arg0, %c0_i32, %c0_i32_0 : i32, i32, i32
  }
}

</mosaic_0001>

<bundles_post_ra>
// kernel: tpu_custom_call.1
= control target key start
LH: loop header
LB: loop body
LE: loop exit
PB: predicated region body
PF: predicated region fallthrough
CT: control target
= control target key end

     0   :  { %11 = vsyncpa [#allocation3], 0  ;;  %s6326_s0 = inlined_call_operand.hbm [shape: bf16[512,256], index: 0, kind: input, shape index: {}]   ;;  %s6327_s1 = inlined_call_operand.hbm [shape: bf16[256,1024], index: 1, kind: input, shape index: {}]   ;;  %s6328_s2 = inlined_call_operand.hbm [shape: f32[1,1024], index: 2, kind: input, shape index: {}]   ;;  %s6329_s3 = inlined_call_operand.hbm [shape: bf16[512,1024], index: 3, kind: output, shape index: {0}]   ;;  %s6330_s4 = inlined_call_operand.hbm [shape: f32[2,1,1024], index: 4, kind: output, shape index: {1}]   ;;  %s6331_s5 = inlined_call_operand.hbm [shape: f32[2,1,1024], index: 5, kind: output, shape index: {2}]  }
   0x1   :  { %13 = vsyncpa [#allocation3 + $0x1], 0 }
   0x2   :  { %14 = vsyncpa [#allocation6], 0 }
   0x3   :  { %15 = vsyncpa [#allocation4], 0 }
   0x4   :  { %17 = vsyncpa [#allocation4 + $0x1], 0 }
   0x5   :  { %18 = vsyncpa [#allocation10], 0 }
   0x6   :  { %20 = vsyncpa [#allocation10 + $0x1], 0  ;;  %s5244_s18 = smov 0   ;;  %s5246_s19 = smov 0  }
   0x7   :  { %s5248_s20 = smov 0   ;;  %s5250_s21 = smov 0  }
   0x8 LB: > { %s5265_s22 = sadd.s32 4294967295, %s5204_s21   ;;  %s4068_s23 = sadd.s32 4294967294, %s5204_s21   ;;  %s5204_s21 = sphi %s5250_s21, %s6355_s21   ;;  %s5200_s20 = sphi %s5248_s20, %s6354_s20   ;;  %s5196_s19 = sphi %s5246_s19, %s6353_s19   ;;  %s5192_s18 = sphi %s5244_s18, %s6352_s18  }
   0x9   : > { %p46_p0 = scmp.ne.s32.totalorder %s5196_s19, %s5192_s18  ;;  %p47_p1 = scmp.eq.s32.totalorder %s5265_s22, 0 }
   0xa   : > { %p112_p2 = scmp.eq.s32.totalorder %s5265_s22, 1  ;;  %p118_p3 = scmp.eq.s32.totalorder %s4068_s23, 1 }
   0xb   : > { %p5276_p4 = por %p47_p1, %p46_p0  ;;  %p4069_p5 = scmp.ge.s32.totalorder %s5204_s21, 1 }
   0xc   : > { %p5281_p6 = por %p118_p3, %p46_p0  ;;  %p177_p7 = scmp.lt.s32.totalorder %s5204_s21, 3 }
   0xd   : > { %s188_s28 = sshll.u32 %s6327_s1, 4  ;;  %s5206_s30 = smov [#allocation5]   ;;  %s189_s28 = int_to_ptr.hbm [resolvable:$true] %s188_s28 }
   0xe   : > { %p5289_p8 = pnand %p4069_p5, %p177_p7  ;;  %s190_s6 = sshll.u32 %s5206_s30, 4  ;;  %s191_s6 = int_to_ptr.vmem [resolvable:$true] %s190_s6 }
   0xf   : > { %s203_s9 = sshll.u32 %s6328_s2, 4  ;;  %s5207_s10 = smov 512   ;;  %s204_s9 = int_to_ptr.hbm [resolvable:$true] %s203_s9 }
  0x10   : > { %p4914_p9 = pneg %p5289_p8  ;;  %s5208_s11 = smov 32  }
  0x11   : > { %s5209_s12 = smov [#allocation7]   ;;  %s5302_s14 = sadd.s32 1, %s5204_s21  }
  0x12   : > { %p4915_p10 = pnand %p4914_p9, %p47_p1  ;;  %s205_s13 = sshll.u32 %s5209_s12, 4  ;;  %s206_s13 = int_to_ptr.vmem [resolvable:$true] %s205_s13 }
  0x13   : > { %s33_s15 = sadd.s32 1, %s5200_s20  ;;  %s30_s16 = ssub.s32 %s5204_s21, %s5302_s14 }
  0x14   : > { %4917 = dma.hbm_to_vmem [thread:$0]  (!%p4915_p10), %s189_s28, 16384, %s191_s6, [#allocation6], %s5207_s10, %s5207_s10, %s5208_s11  }
  0x15   : > { %4920 = dma.hbm_to_vmem [thread:$0]  (!%p4915_p10), %s204_s9, 128, %s206_s13, [#allocation6]  }
  0x16   : > { %p40_p12 = scmp.ne.s32.totalorder %s5200_s20, %s5196_s19  ;;  %p31_p13 = scmp.eq.s32.totalorder %s30_s16, 0 }
  0x17   : > { %p41_p0 = scmp.eq.s32.totalorder %s5204_s21, 0  ;;  %p4937_p5 = scmp.lt.s32.totalorder %s5204_s21, 2 }
  0x18   : > { %p5312_p3 = por %p112_p2, %p40_p12  ;;  %s216_s27 = sand.u32 1, %s5200_s20  }
  0x19   : > { %s5318_s26 = scalar_select %p31_p13, %s5200_s20, %s33_s15  }
  0x1a   : > { %p42_p7 = por %p41_p0, %p40_p12  ;;  %s4073_s28 = sshll.u32 %s216_s27, 8 }
  0x1b   : > { %s4735_s30 = sshll.u32 %s5204_s21, 8  ;;  %s220_s9 = scalar_lea.vmem [#allocation2], %s4073_s28 }
  0x1c   : > { %s226_s8 = scalar_lea.hbm %s6326_s0, %s4735_s30  ;;  %s229_s10 = sshll.u32 %s220_s9, 4  ;;  %s230_s10 = int_to_ptr.vmem [resolvable:$true] %s229_s10 }
  0x1d   : > { %s227_s11 = sshll.u32 %s226_s8, 4  ;;  %p5325_p2 = pnand %p4937_p5, %p42_p7  ;;  %s228_s11 = int_to_ptr.hbm [resolvable:$true] %s227_s11 }
  0x1e   : > { %s217_s13 = scalar_lea.sflag [#allocation3], %s216_s27  ;;  %s5044_s15 = sshra.s32 %s228_s11, 4  ;;  %s5045_s15 = int_to_ptr.hbm [resolvable:$true] %s5044_s15 }
  0x1f   : > { %s5046_s16 = scalar_lea.hbm %s5045_s15, 256  ;;  %p5048_p10 = pneg %p5325_p2 }
  0x20   : > { %p5047_p9 = scmp.ne.s32.totalorder %s5045_s15, %s5046_s16  ;;  %s5051_s6 = scalar_lea.hbm %s6326_s0, 512 }
  0x21   : > { %p5052_p0 = scmp.lt.s32.totalorder %s5045_s15, %s6326_s0  ;;  %p5053_p5 = scmp.lt.s32.totalorder %s5051_s6, %s5046_s16 }
  0x22   : > { %p5049_p12 = pnand %p5048_p10, %p5047_p9 }
  0x23   : > { %p5054_p7 = por %p5053_p5, %p5052_p0 }
  0x24   : > { %p5050_p13 = pneg %p5049_p12 }
  0x26   : > { %p5055_p11 = pnand %p5054_p7, %p5050_p13 }
  0x28   : > { %5058 = shalt.err (!%p5055_p11)
}
  0x29   : > { %s5210_s27 = smov 128   ;;  %s5211_s9 = smov 8  }
  0x2a   : > { %4924 = dma.hbm_to_vmem [thread:$0]  (!%p5325_p2), %s228_s11, 4096, %s230_s10, %s217_s13, %s5210_s27, %s5210_s27, %s5211_s9  }
  0x2b   : > { %241 = sbr.rel (%p5289_p8) target bundleno = 1278 (0x4fe), region = 32 }
  0x30   : > { %s5342_s30 = sand.u32 1, %s5196_s19  }
  0x31   : > { %s4078_s28 = sshll.u32 %s5342_s30, 8  ;;  %s244_s15 = scalar_lea.sflag [#allocation3], %s5342_s30 }
  0x32   : > { %s5346_s16 = scalar_lea.vmem [#allocation2], %s4078_s28 }
  0x33   : > { %5175 = dma.done.wait (%p5276_p4), %s244_s15, 4096  }
  0x34   : > { %5177 = vsyncadd (%p5276_p4), %s244_s15, 4294963200 }
  0x35   : > { %5179 = dma.done.wait (%p47_p1), [#allocation6], 16512  }
  0x36   : > { %5181 = vsyncadd (%p47_p1), [#allocation6], 4294950784  ;;  %v4438_v0 = vld [vmem:[#allocation5 + $0x1c0] sm:$0xf]  ;;  %v4824_v5 = vld [vmem:[#allocation5 + $0x1c4] sm:$0xf] }
  0x37   : > { %v4828_v1 = vld [vmem:[#allocation5 + $0x1dc] sm:$0xf0]  ;;  %v4440_v6 = vld [vmem:[#allocation5 + $0x1e0] sm:$0xf0]  ;;  %s4081_s24 = sshll.u32 %s5342_s30, 10  ;;  %vm3266_vm0 = vcmask 1040384  }
  0x38   : > { %v4694_v2 = vld [vmem:[#allocation5 + $0x3c0] sm:$0xf]  ;;  %v4439_v3 = vor.u32 %v4828_v1, %v4438_v0  ;;  %v4443_v8 = vor.u32 %v4824_v5, %v4440_v6  ;;  %v4888_v9 = vld [vmem:[#allocation5 + $0x3c4] sm:$0xf]  ;;  %s5476_s29 = scalar_lea.vmem [#allocation8], %s4081_s24  ;;  %vm3268_vm1 = vcmask 1042434  }
  0x39   : > { %v4892_v4 = vld [vmem:[#allocation5 + $0x3dc] sm:$0xf0]  ;;  %v4696_v10 = vld [vmem:[#allocation5 + $0x3e0] sm:$0xf0]  ;;  %vm3270_vm2 = vcmask 1041408   ;;  %vm3272_vm3 = vcmask 1044484  }
  0x3a   : > { %v4695_v7 = vor.u32 %v4892_v4, %v4694_v2  ;;  %v4406_v11 = vld [vmem:[#allocation5 + $0x180] sm:$0xf]  ;;  %1275 = vmatpush.bf16.msra.mxu0 %v4439_v3  ;;  %v4699_v12 = vor.u32 %v4888_v9, %v4696_v10  ;;  %1453 = vmatpush.bf16.msra.mxu2 %v4443_v8  ;;  %v4816_v18 = vld [vmem:[#allocation5 + $0x184] sm:$0xf]  ;;  %s4897_s10 = sshll.u32 %s5265_s22, 10  ;;  %s3882_s6 = sshll.u32 %s5476_s29, 4  ;;  %s6241_s6 = int_to_ptr.vmem [resolvable:$true] %s3882_s6 }
  0x3b   : > { %v4820_v13 = vld [vmem:[#allocation5 + $0x19c] sm:$0xf0]  ;;  %v4408_v19 = vld [vmem:[#allocation5 + $0x1a0] sm:$0xf0]  ;;  %s3881_s13 = scalar_lea.hbm %s6329_s3, %s4897_s10  ;;  %s3859_s8 = scalar_lea.sflag [#allocation4], %s5342_s30 }
  0x3c   : > { %v4662_v14 = vld [vmem:[#allocation5 + $0x380] sm:$0xf]  ;;  %1364 = vmatpush.bf16.msra.mxu1 %v4695_v7  ;;  %v4407_v16 = vor.u32 %v4820_v13, %v4406_v11  ;;  %v4880_v20 = vld [vmem:[#allocation5 + $0x384] sm:$0xf]  ;;  %1542 = vmatpush.bf16.msra.mxu3 %v4699_v12  ;;  %v4411_v21 = vor.u32 %v4816_v18, %v4408_v19  ;;  %s3884_s7 = sshll.u32 %s3881_s13, 4  ;;  %s3885_s7 = int_to_ptr.hbm [resolvable:$true] %s3884_s7 }
  0x3d   : > { %v4884_v15 = vld [vmem:[#allocation5 + $0x39c] sm:$0xf0]  ;;  %v4664_v22 = vld [vmem:[#allocation5 + $0x3a0] sm:$0xf0]  ;;  %s5088_s27 = sshra.s32 %s3885_s7, 4  ;;  %s5089_s27 = int_to_ptr.hbm [resolvable:$true] %s5088_s27 }
  0x3e   : > { %v4663_v17 = vor.u32 %v4884_v15, %v4662_v14  ;;  %v4374_v23 = vld [vmem:[#allocation5 + $0x140] sm:$0xf]  ;;  %v4667_v25 = vor.u32 %v4880_v20, %v4664_v22  ;;  %v4808_v28 = vld [vmem:[#allocation5 + $0x144] sm:$0xf]  ;;  %1276 = vmatpush.bf16.msra.mxu0 %v4407_v16  ;;  %1454 = vmatpush.bf16.msra.mxu2 %v4411_v21  ;;  %s5090_s9 = scalar_lea.hbm %s5089_s27, 1024  ;;  %p5095_p11 = scmp.lt.s32.totalorder %s5089_s27, %s6329_s3 }
  0x3f   : > { %v4812_v24 = vld [vmem:[#allocation5 + $0x15c] sm:$0xf0]  ;;  %v4376_v30 = vld [vmem:[#allocation5 + $0x160] sm:$0xf0]  ;;  %p5091_p1 = scmp.ne.s32.totalorder %s5089_s27, %s5090_s9 }
  0x40   : > { %v4630_v26 = vld [vmem:[#allocation5 + $0x340] sm:$0xf]  ;;  %v4375_v29 = vor.u32 %v4812_v24, %v4374_v23  ;;  %v4872_v31 = vld [vmem:[#allocation5 + $0x344] sm:$0xf]  ;;  %1365 = vmatpush.bf16.msra.mxu1 %v4663_v17  ;;  %v4379_v34 = vor.u32 %v4808_v28, %v4376_v30  ;;  %1543 = vmatpush.bf16.msra.mxu3 %v4667_v25  ;;  %v4448_v30 = vld [vmem:[#allocation5 + $0x1e8] sm:$0xf0] }
  0x41   : > { %v4876_v27 = vld [vmem:[#allocation5 + $0x35c] sm:$0xf0]  ;;  %v4632_v32 = vld [vmem:[#allocation5 + $0x360] sm:$0xf0]  ;;  %p5092_p4 = pnand %p5091_p1, %p5312_p3 }
  0x42   : > { %v4631_v33 = vor.u32 %v4876_v27, %v4630_v26  ;;  %v4342_v35 = vld [vmem:[#allocation5 + $0x100] sm:$0xf]  ;;  %v4635_v38 = vor.u32 %v4872_v31, %v4632_v32  ;;  %v4800_v40 = vld [vmem:[#allocation5 + $0x104] sm:$0xf]  ;;  %1277 = vmatpush.bf16.msra.mxu0 %v4375_v29  ;;  %1455 = vmatpush.bf16.msra.mxu2 %v4379_v34  ;;  %v4825_v29 = vld [vmem:[#allocation5 + $0x1cc] sm:$0xf] }
  0x43   : > { %v4804_v36 = vld [vmem:[#allocation5 + $0x11c] sm:$0xf0]  ;;  %v4344_v41 = vld [vmem:[#allocation5 + $0x120] sm:$0xf0]  ;;  %v4737_v32 = vld [vmem:[%s5346_s16 + $0x4] sm:$0xf0]  ;;  %p5093_p8 = pneg %p5092_p4 }
  0x44   : > { %v4598_v37 = vld [vmem:[#allocation5 + $0x300] sm:$0xf]  ;;  %v4864_v42 = vld [vmem:[#allocation5 + $0x304] sm:$0xf]  ;;  %v4343_v44 = vor.u32 %v4804_v36, %v4342_v35  ;;  %1366 = vmatpush.bf16.msra.mxu1 %v4631_v33  ;;  %v4347_v46 = vor.u32 %v4800_v40, %v4344_v41  ;;  %1544 = vmatpush.bf16.msra.mxu3 %v4635_v38  ;;  %v4889_v33 = vld [vmem:[#allocation5 + $0x3cc] sm:$0xf]  ;;  %v4451_v40 = vor.u32 %v4825_v29, %v4448_v30 }
  0x45   : > { %v4868_v39 = vld [vmem:[#allocation5 + $0x31c] sm:$0xf0]  ;;  %v4600_v43 = vld [vmem:[#allocation5 + $0x320] sm:$0xf0]  ;;  %v4704_v34 = vld [vmem:[#allocation5 + $0x3e8] sm:$0xf0] }
  0x46   : > { %v4599_v45 = vor.u32 %v4868_v39, %v4598_v37  ;;  %v4310_v47 = vld [vmem:[#allocation5 + $0xc0] sm:$0xf]  ;;  %v4603_v50 = vor.u32 %v4864_v42, %v4600_v43  ;;  %v4792_v52 = vld [vmem:[#allocation5 + $0xc4] sm:$0xf]  ;;  %1278 = vmatpush.bf16.msra.mxu0 %v4343_v44  ;;  %1456 = vmatpush.bf16.msra.mxu2 %v4347_v46  ;;  %v4088_v38 = vld [vmem:[%s5346_s16 + $0x8] sm:$0xf0]  ;;  %v4707_v44 = vor.u32 %v4889_v33, %v4704_v34 }
  0x47   : > { %v4796_v48 = vld [vmem:[#allocation5 + $0xdc] sm:$0xf0]  ;;  %v4312_v53 = vld [vmem:[#allocation5 + $0xe0] sm:$0xf0]  ;;  %v4446_v41 = vld [vmem:[#allocation5 + $0x1c8] sm:$0xf] }
  0x48   : > { %v4566_v49 = vld [vmem:[#allocation5 + $0x2c0] sm:$0xf]  ;;  %v4856_v54 = vld [vmem:[#allocation5 + $0x2c4] sm:$0xf]  ;;  %v4311_v56 = vor.u32 %v4796_v48, %v4310_v47  ;;  %1367 = vmatpush.bf16.msra.mxu1 %v4599_v45  ;;  %v4315_v58 = vor.u32 %v4792_v52, %v4312_v53  ;;  %1545 = vmatpush.bf16.msra.mxu3 %v4603_v50  ;;  %v4829_v42 = vld [vmem:[#allocation5 + $0x1e4] sm:$0xf0] }
  0x49   : > { %v4860_v51 = vld [vmem:[#allocation5 + $0x2dc] sm:$0xf0]  ;;  %v4568_v55 = vld [vmem:[#allocation5 + $0x2e0] sm:$0xf0]  ;;  %v4702_v45 = vld [vmem:[#allocation5 + $0x3c8] sm:$0xf]  ;;  %v4447_v48 = vor.u32 %v4829_v42, %v4446_v41 }
  0x4a   : > { %v4567_v57 = vor.u32 %v4860_v51, %v4566_v49  ;;  %v4278_v59 = vld [vmem:[#allocation5 + $0x80] sm:$0xf]  ;;  %v4571_v62 = vor.u32 %v4856_v54, %v4568_v55  ;;  %v4784_v0 = vld [vmem:[#allocation5 + $0x84] sm:$0xf]  ;;  %1279 = vmatpush.bf16.msra.mxu0 %v4311_v56  ;;  %1457 = vmatpush.bf16.msra.mxu2 %v4315_v58  ;;  %v4893_v46 = vld [vmem:[#allocation5 + $0x3e4] sm:$0xf0] }
  0x4b   : > { %v4788_v60 = vld [vmem:[#allocation5 + $0x9c] sm:$0xf0]  ;;  %v4280_v1 = vld [vmem:[#allocation5 + $0xa0] sm:$0xf0]  ;;  %v4703_v49 = vor.u32 %v4893_v46, %v4702_v45  ;;  %v4817_v50 = vld [vmem:[#allocation5 + $0x18c] sm:$0xf] }
  0x4c   : > { %v4534_v61 = vld [vmem:[#allocation5 + $0x280] sm:$0xf]  ;;  %v4848_v2 = vld [vmem:[#allocation5 + $0x284] sm:$0xf]  ;;  %v4279_v4 = vor.u32 %v4788_v60, %v4278_v59  ;;  %1368 = vmatpush.bf16.msra.mxu1 %v4567_v57  ;;  %v4283_v6 = vor.u32 %v4784_v0, %v4280_v1  ;;  %1546 = vmatpush.bf16.msra.mxu3 %v4571_v62  ;;  %v4416_v51 = vld [vmem:[#allocation5 + $0x1a8] sm:$0xf0] }
  0x4d   : > { %v4852_v63 = vld [vmem:[#allocation5 + $0x29c] sm:$0xf0]  ;;  %v4536_v3 = vld [vmem:[#allocation5 + $0x2a0] sm:$0xf0]  ;;  %v4881_v52 = vld [vmem:[#allocation5 + $0x38c] sm:$0xf]  ;;  %v4419_v53 = vor.u32 %v4817_v50, %v4416_v51 }
  0x4e   : > { %v4535_v5 = vor.u32 %v4852_v63, %v4534_v61  ;;  %v4246_v7 = vld [vmem:[#allocation5 + $0x40] sm:$0xf]  ;;  %v4539_v10 = vor.u32 %v4848_v2, %v4536_v3  ;;  %v4776_v12 = vld [vmem:[#allocation5 + $0x44] sm:$0xf]  ;;  %1280 = vmatpush.bf16.msra.mxu0 %v4279_v4  ;;  %1458 = vmatpush.bf16.msra.mxu2 %v4283_v6  ;;  %v4672_v54 = vld [vmem:[#allocation5 + $0x3a8] sm:$0xf0] }
  0x4f   : > { %v4780_v8 = vld [vmem:[#allocation5 + $0x5c] sm:$0xf0]  ;;  %v4248_v13 = vld [vmem:[#allocation5 + $0x60] sm:$0xf0]  ;;  %v4414_v55 = vld [vmem:[#allocation5 + $0x188] sm:$0xf]  ;;  %v4675_v57 = vor.u32 %v4881_v52, %v4672_v54 }
  0x50   : > { %v4502_v9 = vld [vmem:[#allocation5 + $0x240] sm:$0xf]  ;;  %v4840_v14 = vld [vmem:[#allocation5 + $0x244] sm:$0xf]  ;;  %v4247_v16 = vor.u32 %v4780_v8, %v4246_v7  ;;  %1369 = vmatpush.bf16.msra.mxu1 %v4535_v5  ;;  %v4251_v20 = vor.u32 %v4776_v12, %v4248_v13  ;;  %1547 = vmatpush.bf16.msra.mxu3 %v4539_v10  ;;  %v4821_v56 = vld [vmem:[#allocation5 + $0x1a4] sm:$0xf0] }
  0x51   : > { %v4844_v11 = vld [vmem:[#allocation5 + $0x25c] sm:$0xf0]  ;;  %v4504_v15 = vld [vmem:[#allocation5 + $0x260] sm:$0xf0]  ;;  %v4415_v58 = vor.u32 %v4821_v56, %v4414_v55  ;;  %v4670_v59 = vld [vmem:[#allocation5 + $0x388] sm:$0xf] }
  0x52   : > { %v4214_v17 = vld [vmem:[#allocation5] sm:$0xf]  ;;  %v4503_v19 = vor.u32 %v4844_v11, %v4502_v9  ;;  %v4768_v23 = vld [vmem:[#allocation5 + $0x4] sm:$0xf]  ;;  %v4507_v24 = vor.u32 %v4840_v14, %v4504_v15  ;;  %1281 = vmatpush.bf16.msra.mxu0 %v4247_v16  ;;  %1459 = vmatpush.bf16.msra.mxu2 %v4251_v20  ;;  %v4885_v60 = vld [vmem:[#allocation5 + $0x3a4] sm:$0xf0] }
  0x53   : > { %v4772_v18 = vld [vmem:[#allocation5 + $0x1c] sm:$0xf0]  ;;  %v4216_v25 = vld [vmem:[#allocation5 + $0x20] sm:$0xf0]  ;;  %v4671_v61 = vor.u32 %v4885_v60, %v4670_v59  ;;  %v4094_v62 = vld [vmem:[%s5346_s16 + $0x10] sm:$0xf] }
  0x54   : > { %v4470_v21 = vld [vmem:[#allocation5 + $0x200] sm:$0xf]  ;;  %v4832_v26 = vld [vmem:[#allocation5 + $0x204] sm:$0xf]  ;;  %v4215_v31 = vor.u32 %v4772_v18, %v4214_v17  ;;  %1370 = vmatpush.bf16.msra.mxu1 %v4503_v19  ;;  %v4219_v36 = vor.u32 %v4768_v23, %v4216_v25  ;;  %1548 = vmatpush.bf16.msra.mxu3 %v4507_v24  ;;  %v4739_v63 = vld [vmem:[%s5346_s16 + $0x14] sm:$0xf0] }
  0x55   : > { %v4836_v22 = vld [vmem:[#allocation5 + $0x21c] sm:$0xf0]  ;;  %v4472_v27 = vld [vmem:[#allocation5 + $0x220] sm:$0xf0]  ;;  %v4738_v0 = vld [vmem:[%s5346_s16 + $0x14] sm:$0xf]  ;;  %v5372_v2 = vor.u32 %v4739_v63, %v4094_v62 }
  0x56   : > { %v4086_v28 = vld [vmem:[%s5346_s16] sm:$0xf]  ;;  %v4471_v35 = vor.u32 %v4836_v22, %v4470_v21  ;;  %v4736_v37 = vld [vmem:[%s5346_s16 + $0x4] sm:$0xf]  ;;  %v4475_v39 = vor.u32 %v4832_v26, %v4472_v27  ;;  %1282 = vmatpush.bf16.msra.mxu0 %v4215_v31  ;;  %1460 = vmatpush.bf16.msra.mxu2 %v4219_v36  ;;  %v4096_v1 = vld [vmem:[%s5346_s16 + $0x18] sm:$0xf0] }
  0x57   : > { %v5360_v43 = vor.u32 %v4737_v32, %v4086_v28  ;;  %v5362_v47 = vor.u32 %v4736_v37, %v4088_v38  ;;  %v5374_v3 = vor.u32 %v4738_v0, %v4096_v1  ;;  %v4102_v4 = vld [vmem:[%s5346_s16 + $0x20] sm:$0xf]  ;;  %v4741_v5 = vld [vmem:[%s5346_s16 + $0x24] sm:$0xf0]  ;;  %v4740_v6 = vld [vmem:[%s5346_s16 + $0x24] sm:$0xf] }
  0x58   : > { %1371 = vmatpush.bf16.msra.mxu1 %v4471_v35  ;;  %1549 = vmatpush.bf16.msra.mxu3 %v4475_v39  ;;  %v4104_v7 = vld [vmem:[%s5346_s16 + $0x28] sm:$0xf0]  ;;  %v5384_v8 = vor.u32 %v4741_v5, %v4102_v4  ;;  %v4382_v15 = vld [vmem:[#allocation5 + $0x148] sm:$0xf]  ;;  %v4110_v22 = vld [vmem:[%s5346_s16 + $0x30] sm:$0xf] }
  0x59   : > { %1283 = vmatmul.bf16.vlgmr.msra.gmra.mxu0 %v5360_v43  ;;  %1461 = vmatmul.bf16.vlgmr.msra.gmra.mxu2 %v5360_v43  ;;  %v5386_v9 = vor.u32 %v4740_v6, %v4104_v7  ;;  %v4809_v10 = vld [vmem:[#allocation5 + $0x14c] sm:$0xf]  ;;  %v4813_v16 = vld [vmem:[#allocation5 + $0x164] sm:$0xf0]  ;;  %v4743_v23 = vld [vmem:[%s5346_s16 + $0x34] sm:$0xf0] }
  0x5a   : > { %1809 = vmatpush.bf16.msrb.mxu2 %v4451_v40  ;;  %1631 = vmatpush.bf16.msrb.mxu0 %v4447_v48  ;;  %v4384_v11 = vld [vmem:[#allocation5 + $0x168] sm:$0xf0]  ;;  %v4383_v18 = vor.u32 %v4813_v16, %v4382_v15  ;;  %v4638_v19 = vld [vmem:[#allocation5 + $0x348] sm:$0xf]  ;;  %v4742_v24 = vld [vmem:[%s5346_s16 + $0x34] sm:$0xf]  ;;  %v5396_v26 = vor.u32 %v4743_v23, %v4110_v22 }
  0x5b   : > { %1372 = vmatmul.bf16.vlgmr.msra.gmra.mxu1 %v5362_v47  ;;  %1550 = vmatmul.bf16.vlgmr.msra.gmra.mxu3 %v5362_v47  ;;  %v4873_v12 = vld [vmem:[#allocation5 + $0x34c] sm:$0xf]  ;;  %v4387_v13 = vor.u32 %v4809_v10, %v4384_v11  ;;  %v4877_v20 = vld [vmem:[#allocation5 + $0x364] sm:$0xf0]  ;;  %v4112_v25 = vld [vmem:[%s5346_s16 + $0x38] sm:$0xf0] }
  0x5c   : > { %1898 = vmatpush.bf16.msrb.mxu3 %v4707_v44  ;;  %1720 = vmatpush.bf16.msrb.mxu1 %v4703_v49  ;;  %v4640_v14 = vld [vmem:[#allocation5 + $0x368] sm:$0xf0]  ;;  %v4639_v21 = vor.u32 %v4877_v20, %v4638_v19  ;;  %v5398_v27 = vor.u32 %v4742_v24, %v4112_v25  ;;  %v4118_v28 = vld [vmem:[%s5346_s16 + $0x40] sm:$0xf]  ;;  %v4745_v29 = vld [vmem:[%s5346_s16 + $0x44] sm:$0xf0] }
  0x5d   : > { %v4643_v17 = vor.u32 %v4873_v12, %v4640_v14  ;;  %v4744_v30 = vld [vmem:[%s5346_s16 + $0x44] sm:$0xf]  ;;  %v4120_v31 = vld [vmem:[%s5346_s16 + $0x48] sm:$0xf0]  ;;  %v5408_v32 = vor.u32 %v4745_v29, %v4118_v28  ;;  %v4350_v39 = vld [vmem:[#allocation5 + $0x108] sm:$0xf] }
  0x5e   : > { %1810 = vmatpush.bf16.msrb.mxu2 %v4419_v53  ;;  %1632 = vmatpush.bf16.msrb.mxu0 %v4415_v58  ;;  %v5410_v33 = vor.u32 %v4744_v30, %v4120_v31  ;;  %v4801_v34 = vld [vmem:[#allocation5 + $0x10c] sm:$0xf]  ;;  %v4805_v40 = vld [vmem:[#allocation5 + $0x124] sm:$0xf0]  ;;  %v4126_v48 = vld [vmem:[%s5346_s16 + $0x50] sm:$0xf] }
  0x5f   : > { %v4352_v35 = vld [vmem:[#allocation5 + $0x128] sm:$0xf0]  ;;  %v4351_v42 = vor.u32 %v4805_v40, %v4350_v39  ;;  %v4606_v44 = vld [vmem:[#allocation5 + $0x308] sm:$0xf]  ;;  %v4747_v49 = vld [vmem:[%s5346_s16 + $0x54] sm:$0xf0] }
  0x60   : > { %1899 = vmatpush.bf16.msrb.mxu3 %v4675_v57  ;;  %1721 = vmatpush.bf16.msrb.mxu1 %v4671_v61  ;;  %v4865_v36 = vld [vmem:[#allocation5 + $0x30c] sm:$0xf]  ;;  %v4355_v37 = vor.u32 %v4801_v34, %v4352_v35  ;;  %v4869_v45 = vld [vmem:[#allocation5 + $0x324] sm:$0xf0]  ;;  %v4746_v50 = vld [vmem:[%s5346_s16 + $0x54] sm:$0xf]  ;;  %v5420_v52 = vor.u32 %v4747_v49, %v4126_v48 }
  0x61   : > { %v4608_v38 = vld [vmem:[#allocation5 + $0x328] sm:$0xf0]  ;;  %v4607_v46 = vor.u32 %v4869_v45, %v4606_v44  ;;  %v4128_v51 = vld [vmem:[%s5346_s16 + $0x58] sm:$0xf0]  ;;  %v4134_v54 = vld [vmem:[%s5346_s16 + $0x60] sm:$0xf] }
  0x62   : > { %1811 = vmatpush.bf16.msrb.mxu2 %v4387_v13  ;;  %1633 = vmatpush.bf16.msrb.mxu0 %v4383_v18  ;;  %v4611_v41 = vor.u32 %v4865_v36, %v4608_v38  ;;  %v5422_v53 = vor.u32 %v4746_v50, %v4128_v51  ;;  %v4749_v55 = vld [vmem:[%s5346_s16 + $0x64] sm:$0xf0]  ;;  %v4748_v56 = vld [vmem:[%s5346_s16 + $0x64] sm:$0xf]  ;;  %v4136_v57 = vld [vmem:[%s5346_s16 + $0x68] sm:$0xf0] }
  0x63   : > { %v5432_v58 = vor.u32 %v4749_v55, %v4134_v54  ;;  %v5434_v59 = vor.u32 %v4748_v56, %v4136_v57  ;;  %v4793_v60 = vld [vmem:[#allocation5 + $0xcc] sm:$0xf]  ;;  %v4142_v4 = vld [vmem:[%s5346_s16 + $0x70] sm:$0xf]  ;;  %v4751_v5 = vld [vmem:[%s5346_s16 + $0x74] sm:$0xf0] }
  0x64   : > { %1900 = vmatpush.bf16.msrb.mxu3 %v4643_v17  ;;  %1722 = vmatpush.bf16.msrb.mxu1 %v4639_v21  ;;  %v4320_v61 = vld [vmem:[#allocation5 + $0xe8] sm:$0xf0]  ;;  %v4750_v6 = vld [vmem:[%s5346_s16 + $0x74] sm:$0xf]  ;;  %v4144_v7 = vld [vmem:[%s5346_s16 + $0x78] sm:$0xf0]  ;;  %v5444_v10 = vor.u32 %v4751_v5, %v4142_v4 }
  0x65   : > { %v4857_v62 = vld [vmem:[#allocation5 + $0x2cc] sm:$0xf]  ;;  %v4323_v63 = vor.u32 %v4793_v60, %v4320_v61  ;;  %v4318_v11 = vld [vmem:[#allocation5 + $0xc8] sm:$0xf]  ;;  %v5446_v14 = vor.u32 %v4750_v6, %v4144_v7  ;;  %v4150_v18 = vld [vmem:[%s5346_s16 + $0x80] sm:$0xf] }
  0x66   : > { %1812 = vmatpush.bf16.msrb.mxu2 %v4355_v37  ;;  %1634 = vmatpush.bf16.msrb.mxu0 %v4351_v42  ;;  %v4576_v0 = vld [vmem:[#allocation5 + $0x2e8] sm:$0xf0]  ;;  %v4797_v12 = vld [vmem:[#allocation5 + $0xe4] sm:$0xf0]  ;;  %v457_v20 = vld [vmem:[#allocation7] sm:$0xff] }
  0x67   : > { %v4579_v1 = vor.u32 %v4857_v62, %v4576_v0  ;;  %v4574_v13 = vld [vmem:[#allocation5 + $0x2c8] sm:$0xf]  ;;  %6344 = vst [vmem:[#allocation16_spill] sm:$0xff] %v5446_v14  ;;  %v4319_v15 = vor.u32 %v4797_v12, %v4318_v11  ;;  %v4752_v21 = vld [vmem:[%s5346_s16 + $0x84] sm:$0xf]  ;;  %v5458_v24 = vperm.slane %v457_v20, 0 }
  0x68   : > { %1901 = vmatpush.bf16.msrb.mxu3 %v4611_v41  ;;  %1723 = vmatpush.bf16.msrb.mxu1 %v4607_v46  ;;  %v4861_v16 = vld [vmem:[#allocation5 + $0x2e4] sm:$0xf0]  ;;  %v4152_v22 = vld [vmem:[%s5346_s16 + $0x88] sm:$0xf0]  ;;  %v5466_v31 = vperm.slane %v457_v20, 1 }
  0x69   : > { %1288 = vmatmul.bf16.gmra.mxu0 %v5372_v2  ;;  %1466 = vmatmul.bf16.gmra.mxu2 %v5372_v2  ;;  %v4575_v17 = vor.u32 %v4861_v16, %v4574_v13  ;;  %v4753_v19 = vld [vmem:[%s5346_s16 + $0x84] sm:$0xf0]  ;;  %v5460_v28 = vor.u32 %v4752_v21, %v4152_v22  ;;  %v4785_v35 = vld [vmem:[#allocation5 + $0x8c] sm:$0xf]  ;;  %v4158_v54 = vld [vmem:[%s5346_s16 + $0x90] sm:$0xf] }
  0x6a   : > { %1813 = vmatpush.bf16.msrb.mxu2 %v4323_v63  ;;  %1635 = vmatpush.bf16.msrb.mxu0 %v4319_v15  ;;  %v5456_v23 = vor.u32 %v4753_v19, %v4150_v18  ;;  %v4288_v36 = vld [vmem:[#allocation5 + $0xa8] sm:$0xf0]  ;;  %v4755_v55 = vld [vmem:[%s5346_s16 + $0x94] sm:$0xf0]  ;;  %v4754_v61 = vld [vmem:[%s5346_s16 + $0x94] sm:$0xf] }
  0x6b   : > { %1377 = vmatmul.bf16.gmra.mxu1 %v5374_v3  ;;  %1555 = vmatmul.bf16.gmra.mxu3 %v5374_v3  ;;  %6346 = vst [vmem:[#allocation18_spill] sm:$0xff] %v5460_v28  ;;  %v4849_v37 = vld [vmem:[#allocation5 + $0x28c] sm:$0xf]  ;;  %v4291_v42 = vor.u32 %v4785_v35, %v4288_v36  ;;  %v4160_v62 = vld [vmem:[%s5346_s16 + $0x98] sm:$0xf0] }
  0x6c   : > { %1902 = vmatpush.bf16.msrb.mxu3 %v4579_v1  ;;  %1724 = vmatpush.bf16.msrb.mxu1 %v4575_v17  ;;  %6345 = vst [vmem:[#allocation17_spill] sm:$0xff] %v5456_v23  ;;  %v4544_v44 = vld [vmem:[#allocation5 + $0x2a8] sm:$0xf0]  ;;  %v5479_v1 = vor.u32 %v4755_v55, %v4158_v54  ;;  %v4286_v4 = vld [vmem:[#allocation5 + $0x88] sm:$0xf]  ;;  %v5482_v13 = vor.u32 %v4754_v61, %v4160_v62 }
  0x6d   : > { %v4547_v48 = vor.u32 %v4849_v37, %v4544_v44  ;;  %v4789_v5 = vld [vmem:[#allocation5 + $0xa4] sm:$0xf0] }
  0x6e   : > { %1814 = vmatpush.bf16.msrb.mxu2 %v4291_v42  ;;  %v4542_v6 = vld [vmem:[#allocation5 + $0x288] sm:$0xf]  ;;  %v4287_v15 = vor.u32 %v4789_v5, %v4286_v4 }
  0x6f   : > { %v4853_v16 = vld [vmem:[#allocation5 + $0x2a4] sm:$0xf0] }
  0x70   : > { %1903 = vmatpush.bf16.msrb.mxu3 %v4547_v48  ;;  %v4543_v19 = vor.u32 %v4853_v16, %v4542_v6  ;;  %1636 = vmatpush.bf16.msrb.mxu0 %v4287_v15  ;;  %v4757_v54 = vld [vmem:[%s5346_s16 + $0xa4] sm:$0xf0] }
  0x72   : > { %1725 = vmatpush.bf16.msrb.mxu1 %v4543_v19 }
  0x79   : > { %1293 = vmatmul.bf16.gmra.mxu0 %v5384_v8  ;;  %1471 = vmatmul.bf16.gmra.mxu2 %v5384_v8 }
  0x7b   : > { %1382 = vmatmul.bf16.gmra.mxu1 %v5386_v9  ;;  %1560 = vmatmul.bf16.gmra.mxu3 %v5386_v9 }
  0x89   : > { %1298 = vmatmul.bf16.gmra.mxu0 %v5396_v26  ;;  %1476 = vmatmul.bf16.gmra.mxu2 %v5396_v26 }
  0x8b   : > { %1387 = vmatmul.bf16.gmra.mxu1 %v5398_v27  ;;  %1565 = vmatmul.bf16.gmra.mxu3 %v5398_v27 }
  0x99   : > { %1303 = vmatmul.bf16.gmra.mxu0 %v5408_v32  ;;  %1481 = vmatmul.bf16.gmra.mxu2 %v5408_v32 }
  0x9b   : > { %1392 = vmatmul.bf16.gmra.mxu1 %v5410_v33  ;;  %1570 = vmatmul.bf16.gmra.mxu3 %v5410_v33 }
  0xa9   : > { %1308 = vmatmul.bf16.gmra.mxu0 %v5420_v52  ;;  %1486 = vmatmul.bf16.gmra.mxu2 %v5420_v52 }
  0xab   : > { %1397 = vmatmul.bf16.gmra.mxu1 %v5422_v53  ;;  %1575 = vmatmul.bf16.gmra.mxu3 %v5422_v53 }
  0xb9   : > { %1313 = vmatmul.bf16.gmra.mxu0 %v5432_v58  ;;  %1491 = vmatmul.bf16.gmra.mxu2 %v5432_v58 }
  0xbb   : > { %1402 = vmatmul.bf16.gmra.mxu1 %v5434_v59  ;;  %1580 = vmatmul.bf16.gmra.mxu3 %v5434_v59 }
  0xc9   : > { %1318 = vmatmul.bf16.gmra.mxu0 %v5444_v10  ;;  %1496 = vmatmul.bf16.gmra.mxu2 %v5444_v10 }
  0xcb   : > { %1407 = vmatmul.bf16.gmra.mxu1 %v5446_v14  ;;  %1585 = vmatmul.bf16.gmra.mxu3 %v5446_v14 }
  0xd6   : > { %v1284_v25 = vpop.f32.mrf.mxu0 }
  0xd7   : > { %v1285_v30 = vadd.f32 %v1284_v25, %v5458_v24 }
  0xd8   : > { %v1373_v29 = vpop.f32.mrf.mxu1 }
  0xd9   : > { %1323 = vmatmul.bf16.gmra.mxu0 %v5456_v23  ;;  %1501 = vmatmul.bf16.gmra.mxu2 %v5456_v23  ;;  %v1374_v38 = vadd.f32 %v1373_v29, %v1285_v30 }
  0xdb   : > { %1412 = vmatmul.bf16.gmra.mxu1 %v5460_v28  ;;  %1590 = vmatmul.bf16.gmra.mxu3 %v5460_v28  ;;  %v3282_v56 = vmul.f32 %v1374_v38, %v1374_v38 }
  0xdc   : > { %v1462_v34 = vpop.f32.mrf.mxu2 }
  0xdd   : > { %v1463_v39 = vadd.f32 %v1462_v34, %v5466_v31 }
  0xde   : > { %v1551_v40 = vpop.f32.mrf.mxu3  ;;  %v1286_v41 = vpop.f32.mrf.mxu0 }
  0xdf   : > { %v1287_v45 = vadd.f32 %v1286_v41, %v5458_v24  ;;  %v1552_v49 = vadd.f32 %v1551_v40, %v1463_v39 }
  0xe0   : > { %v1375_v46 = vpop.f32.mrf.mxu1 }
  0xe1   : > { %v1376_v50 = vadd.f32 %v1375_v46, %v1287_v45  ;;  %v2699_v51 = vpack.c.bf16 %v1552_v49, %v1374_v38  ;;  %v3283_v21 = vmul.f32 %v1552_v49, %v1552_v49 }
  0xe3   : > { %v2955_v57 = vadd.f32 %v1376_v50, %v1374_v38  ;;  %v3290_v60 = vmul.f32 %v1376_v50, %v1376_v50  ;;  %2827 = vst [vmem:[%s5476_s29] sm:$0xff] %v2699_v51  ;;  %v4166_v51 = vld [vmem:[%s5346_s16 + $0xa0] sm:$0xf] }
  0xe4   : > { %v1464_v0 = vpop.f32.mrf.mxu2 }
  0xe5   : > { %v3538_v63 = vadd.f32 %v3290_v60, %v3282_v56  ;;  %v1465_v7 = vadd.f32 %v1464_v0, %v5466_v31  ;;  %v4168_v60 = vld [vmem:[%s5346_s16 + $0xa8] sm:$0xf0]  ;;  %v5497_v0 = vor.u32 %v4757_v54, %v4166_v51  ;;  %v4174_v51 = vld [vmem:[%s5346_s16 + $0xb0] sm:$0xf]  ;;  %v4759_v54 = vld [vmem:[%s5346_s16 + $0xb4] sm:$0xf0] }
  0xe6   : > { %v1553_v11 = vpop.f32.mrf.mxu3  ;;  %v1289_v12 = vpop.f32.mrf.mxu0 }
  0xe7   : > { %v1290_v17 = vadd.f32 %v1289_v12, %v5458_v24  ;;  %v1554_v20 = vadd.f32 %v1553_v11, %v1465_v7 }
  0xe8   : > { %v1378_v18 = vpop.f32.mrf.mxu1 }
  0xe9   : > { %v1379_v22 = vadd.f32 %v1378_v18, %v1290_v17  ;;  %1328 = vmatmul.bf16.gmra.mxu0 %v5479_v1  ;;  %v2703_v25 = vpack.c.bf16 %v1554_v20, %v1376_v50  ;;  %v2992_v29 = vadd.f32 %v1554_v20, %v1552_v49  ;;  %v3291_v30 = vmul.f32 %v1554_v20, %v1554_v20 }
  0xea   : > { %1506 = vmatmul.bf16.gmra.mxu2 %v5479_v1 }
  0xeb   : > { %1417 = vmatmul.bf16.gmra.mxu1 %v5482_v13  ;;  %v2956_v34 = vadd.f32 %v2955_v57, %v1379_v22  ;;  %v3298_v35 = vmul.f32 %v1379_v22, %v1379_v22  ;;  %1595 = vmatmul.bf16.gmra.mxu3 %v5482_v13  ;;  %2831 = vst [vmem:[%s5476_s29 + $0x20] sm:$0xff] %v2703_v25  ;;  %v4756_v57 = vld [vmem:[%s5346_s16 + $0xa4] sm:$0xf] }
  0xec   : > { %v3575_v36 = vadd.f32 %v3291_v30, %v3283_v21  ;;  %v1467_v38 = vpop.f32.mrf.mxu2  ;;  %v5500_v7 = vor.u32 %v4756_v57, %v4168_v60  ;;  %v4777_v30 = vld [vmem:[#allocation5 + $0x4c] sm:$0xf]  ;;  %v4758_v57 = vld [vmem:[%s5346_s16 + $0xb4] sm:$0xf]  ;;  %v4176_v60 = vld [vmem:[%s5346_s16 + $0xb8] sm:$0xf0] }
  0xed   : > { %v3539_v37 = vadd.f32 %v3538_v63, %v3298_v35  ;;  %v1468_v39 = vadd.f32 %v1467_v38, %v5466_v31  ;;  %v4841_v35 = vld [vmem:[#allocation5 + $0x24c] sm:$0xf] }
  0xee   : > { %v1556_v40 = vpop.f32.mrf.mxu3  ;;  %v1291_v41 = vpop.f32.mrf.mxu0 }
  0xef   : > { %v1292_v42 = vadd.f32 %v1291_v41, %v5458_v24  ;;  %v1557_v45 = vadd.f32 %v1556_v40, %v1468_v39  ;;  %v4512_v40 = vld [vmem:[#allocation5 + $0x268] sm:$0xf0] }
  0xf0   : > { %v1380_v44 = vpop.f32.mrf.mxu1 }
  0xf1   : > { %v1381_v46 = vadd.f32 %v1380_v44, %v1292_v42  ;;  %v2707_v48 = vpack.c.bf16 %v1557_v45, %v1379_v22  ;;  %v2993_v49 = vadd.f32 %v2992_v29, %v1557_v45  ;;  %v3299_v50 = vmul.f32 %v1557_v45, %v1557_v45 }
  0xf2   : > { %v4515_v44 = vor.u32 %v4841_v35, %v4512_v40 }
  0xf3   : > { %v2957_v55 = vadd.f32 %v2956_v34, %v1381_v46  ;;  %v3306_v56 = vmul.f32 %v1381_v46, %v1381_v46  ;;  %2835 = vst [vmem:[%s5476_s29 + $0x40] sm:$0xff] %v2707_v48  ;;  %v3576_v61 = vadd.f32 %v3575_v36, %v3299_v50  ;;  %v4256_v34 = vld [vmem:[#allocation5 + $0x68] sm:$0xf0] }
  0xf4   : > { %v1469_v63 = vpop.f32.mrf.mxu2  ;;  %v4259_v39 = vor.u32 %v4777_v30, %v4256_v34  ;;  %1904 = vmatpush.bf16.msrb.mxu3 %v4515_v44 }
  0xf5   : > { %v3540_v62 = vadd.f32 %v3539_v37, %v3306_v56  ;;  %v1470_v4 = vadd.f32 %v1469_v63, %v5466_v31 }
  0xf6   : > { %v1558_v5 = vpop.f32.mrf.mxu3  ;;  %v1294_v6 = vpop.f32.mrf.mxu0  ;;  %1815 = vmatpush.bf16.msrb.mxu2 %v4259_v39 }
  0xf7   : > { %v1295_v11 = vadd.f32 %v1294_v6, %v5458_v24  ;;  %v1559_v15 = vadd.f32 %v1558_v5, %v1470_v4  ;;  %v5515_v4 = vor.u32 %v4759_v54, %v4174_v51  ;;  %v4254_v5 = vld [vmem:[#allocation5 + $0x48] sm:$0xf] }
  0xf8   : > { %v1383_v12 = vpop.f32.mrf.mxu1  ;;  %v4781_v6 = vld [vmem:[#allocation5 + $0x64] sm:$0xf0] }
  0xf9   : > { %v1384_v16 = vadd.f32 %v1383_v12, %v1295_v11  ;;  %1333 = vmatmul.bf16.gmra.mxu0 %v5497_v0  ;;  %v2711_v17 = vpack.c.bf16 %v1559_v15, %v1381_v46  ;;  %v2994_v18 = vadd.f32 %v2993_v49, %v1559_v15  ;;  %v3307_v19 = vmul.f32 %v1559_v15, %v1559_v15  ;;  %v4510_v11 = vld [vmem:[#allocation5 + $0x248] sm:$0xf] }
  0xfa   : > { %1511 = vmatmul.bf16.gmra.mxu2 %v5497_v0 }
  0xfb   : > { %1422 = vmatmul.bf16.gmra.mxu1 %v5500_v7  ;;  %v2958_v20 = vadd.f32 %v2957_v55, %v1384_v16  ;;  %v3314_v21 = vmul.f32 %v1384_v16, %v1384_v16  ;;  %1600 = vmatmul.bf16.gmra.mxu3 %v5500_v7  ;;  %2839 = vst [vmem:[%s5476_s29 + $0x60] sm:$0xff] %v2711_v17 }
  0xfc   : > { %v3577_v22 = vadd.f32 %v3576_v61, %v3307_v19  ;;  %v1472_v29 = vpop.f32.mrf.mxu2  ;;  %v5518_v17 = vor.u32 %v4758_v57, %v4176_v60  ;;  %v4845_v19 = vld [vmem:[#allocation5 + $0x264] sm:$0xf0] }
  0xfd   : > { %v3541_v25 = vadd.f32 %v3540_v62, %v3314_v21  ;;  %v1473_v36 = vadd.f32 %v1472_v29, %v5466_v31 }
  0xfe   : > { %v1561_v37 = vpop.f32.mrf.mxu3  ;;  %v1296_v38 = vpop.f32.mrf.mxu0 }
  0xff   : > { %v1297_v41 = vadd.f32 %v1296_v38, %v5458_v24  ;;  %v1562_v45 = vadd.f32 %v1561_v37, %v1473_v36 }
 0x100   : > { %v1385_v42 = vpop.f32.mrf.mxu1 }
 0x101   : > { %v1386_v46 = vadd.f32 %v1385_v42, %v1297_v41  ;;  %v2715_v48 = vpack.c.bf16 %v1562_v45, %v1384_v16  ;;  %v2995_v49 = vadd.f32 %v2994_v18, %v1562_v45  ;;  %v3315_v50 = vmul.f32 %v1562_v45, %v1562_v45 }
 0x102   : > { %v4255_v18 = vor.u32 %v4781_v6, %v4254_v5 }
 0x103   : > { %v2959_v55 = vadd.f32 %v2958_v20, %v1386_v46  ;;  %v3322_v56 = vmul.f32 %v1386_v46, %v1386_v46  ;;  %2843 = vst [vmem:[%s5476_s29 + $0x80] sm:$0xff] %v2715_v48  ;;  %v3578_v61 = vadd.f32 %v3577_v22, %v3315_v50  ;;  %v4511_v22 = vor.u32 %v4845_v19, %v4510_v11 }
 0x104   : > { %v1474_v63 = vpop.f32.mrf.mxu2  ;;  %1637 = vmatpush.bf16.msrb.mxu0 %v4255_v18 }
 0x105   : > { %v3542_v62 = vadd.f32 %v3541_v25, %v3322_v56  ;;  %v1475_v12 = vadd.f32 %v1474_v63, %v5466_v31  ;;  %1726 = vmatpush.bf16.msrb.mxu1 %v4511_v22  ;;  %v4761_v56 = vld [vmem:[%s5346_s16 + $0xc4] sm:$0xf0] }
 0x106   : > { %v1563_v15 = vpop.f32.mrf.mxu3  ;;  %v1299_v16 = vpop.f32.mrf.mxu0 }
 0x107   : > { %v1300_v20 = vadd.f32 %v1299_v16, %v5458_v24  ;;  %v1564_v25 = vadd.f32 %v1563_v15, %v1475_v12 }
 0x108   : > { %v1388_v21 = vpop.f32.mrf.mxu1 }
 0x109   : > { %v1389_v29 = vadd.f32 %v1388_v21, %v1300_v20  ;;  %1338 = vmatmul.bf16.gmra.mxu0 %v5515_v4  ;;  %v2719_v30 = vpack.c.bf16 %v1564_v25, %v1386_v46  ;;  %v2996_v34 = vadd.f32 %v2995_v49, %v1564_v25  ;;  %v3323_v35 = vmul.f32 %v1564_v25, %v1564_v25 }
 0x10a   : > { %1516 = vmatmul.bf16.gmra.mxu2 %v5515_v4 }
 0x10b   : > { %1427 = vmatmul.bf16.gmra.mxu1 %v5518_v17  ;;  %v2960_v36 = vadd.f32 %v2959_v55, %v1389_v29  ;;  %v3330_v37 = vmul.f32 %v1389_v29, %v1389_v29  ;;  %1605 = vmatmul.bf16.gmra.mxu3 %v5518_v17  ;;  %2847 = vst [vmem:[%s5476_s29 + $0xa0] sm:$0xff] %v2719_v30  ;;  %v4182_v55 = vld [vmem:[%s5346_s16 + $0xc0] sm:$0xf] }
 0x10c   : > { %v3579_v38 = vadd.f32 %v3578_v61, %v3323_v35  ;;  %v1477_v40 = vpop.f32.mrf.mxu2  ;;  %v4760_v61 = vld [vmem:[%s5346_s16 + $0xc4] sm:$0xf]  ;;  %v5533_v11 = vor.u32 %v4761_v56, %v4182_v55 }
 0x10d   : > { %v3543_v39 = vadd.f32 %v3542_v62, %v3330_v37  ;;  %v1478_v41 = vadd.f32 %v1477_v40, %v5466_v31  ;;  %v4184_v62 = vld [vmem:[%s5346_s16 + $0xc8] sm:$0xf0] }
 0x10e   : > { %v1566_v42 = vpop.f32.mrf.mxu3  ;;  %v1301_v44 = vpop.f32.mrf.mxu0  ;;  %v5536_v18 = vor.u32 %v4760_v61, %v4184_v62  ;;  %v4224_v40 = vld [vmem:[#allocation5 + $0x28] sm:$0xf0]  ;;  %v4190_v61 = vld [vmem:[%s5346_s16 + $0xd0] sm:$0xf]  ;;  %v4763_v62 = vld [vmem:[%s5346_s16 + $0xd4] sm:$0xf0] }
 0x10f   : > { %v1302_v45 = vadd.f32 %v1301_v44, %v5458_v24  ;;  %v1567_v48 = vadd.f32 %v1566_v42, %v1478_v41  ;;  %v4833_v41 = vld [vmem:[#allocation5 + $0x20c] sm:$0xf] }
 0x110   : > { %v1390_v46 = vpop.f32.mrf.mxu1 }
 0x111   : > { %v1391_v49 = vadd.f32 %v1390_v46, %v1302_v45  ;;  %v2723_v50 = vpack.c.bf16 %v1567_v48, %v1389_v29  ;;  %v2997_v51 = vadd.f32 %v2996_v34, %v1567_v48  ;;  %v3331_v54 = vmul.f32 %v1567_v48, %v1567_v48  ;;  %v4480_v48 = vld [vmem:[#allocation5 + $0x228] sm:$0xf0] }
 0x113   : > { %v2961_v57 = vadd.f32 %v2960_v36, %v1391_v49  ;;  %v3338_v60 = vmul.f32 %v1391_v49, %v1391_v49  ;;  %2851 = vst [vmem:[%s5476_s29 + $0xc0] sm:$0xff] %v2723_v50  ;;  %v3580_v63 = vadd.f32 %v3579_v38, %v3331_v54 }
 0x114   : > { %v1479_v6 = vpop.f32.mrf.mxu2 }
 0x115   : > { %v3544_v5 = vadd.f32 %v3543_v39, %v3338_v60  ;;  %v1480_v12 = vadd.f32 %v1479_v6, %v5466_v31  ;;  %v4769_v39 = vld [vmem:[#allocation5 + $0xc] sm:$0xf]  ;;  %v4762_v6 = vld [vmem:[%s5346_s16 + $0xd4] sm:$0xf] }
 0x116   : > { %v1568_v15 = vpop.f32.mrf.mxu3  ;;  %v1304_v16 = vpop.f32.mrf.mxu0  ;;  %v4227_v46 = vor.u32 %v4769_v39, %v4224_v40 }
 0x117   : > { %v1305_v19 = vadd.f32 %v1304_v16, %v5458_v24  ;;  %v1569_v21 = vadd.f32 %v1568_v15, %v1480_v12  ;;  %v4192_v12 = vld [vmem:[%s5346_s16 + $0xd8] sm:$0xf0] }
 0x118   : > { %v1393_v20 = vpop.f32.mrf.mxu1  ;;  %1816 = vmatpush.bf16.msrb.mxu2 %v4227_v46 }
 0x119   : > { %v1394_v22 = vadd.f32 %v1393_v20, %v1305_v19  ;;  %1343 = vmatmul.bf16.gmra.mxu0 %v5533_v11  ;;  %v2727_v25 = vpack.c.bf16 %v1569_v21, %v1391_v49  ;;  %v2998_v29 = vadd.f32 %v2997_v51, %v1569_v21  ;;  %v3339_v30 = vmul.f32 %v1569_v21, %v1569_v21  ;;  %v4222_v21 = vld [vmem:[#allocation5 + $0x8] sm:$0xf] }
 0x11a   : > { %1521 = vmatmul.bf16.gmra.mxu2 %v5533_v11  ;;  %v4483_v51 = vor.u32 %v4833_v41, %v4480_v48  ;;  %v5551_v20 = vor.u32 %v4763_v62, %v4190_v61 }
 0x11b   : > { %1432 = vmatmul.bf16.gmra.mxu1 %v5536_v18  ;;  %v2962_v34 = vadd.f32 %v2961_v57, %v1394_v22  ;;  %v3346_v35 = vmul.f32 %v1394_v22, %v1394_v22  ;;  %1610 = vmatmul.bf16.gmra.mxu3 %v5536_v18  ;;  %2855 = vst [vmem:[%s5476_s29 + $0xe0] sm:$0xff] %v2727_v25  ;;  %v4773_v25 = vld [vmem:[#allocation5 + $0x24] sm:$0xf0] }
 0x11c   : > { %v3581_v36 = vadd.f32 %v3580_v63, %v3339_v30  ;;  %v1482_v38 = vpop.f32.mrf.mxu2  ;;  %1905 = vmatpush.bf16.msrb.mxu3 %v4483_v51  ;;  %v4478_v30 = vld [vmem:[#allocation5 + $0x208] sm:$0xf]  ;;  %v4223_v39 = vor.u32 %v4773_v25, %v4222_v21  ;;  %v4764_v25 = vld [vmem:[%s5346_s16 + $0xe4] sm:$0xf] }
 0x11d   : > { %v3545_v37 = vadd.f32 %v3544_v5, %v3346_v35  ;;  %v1483_v42 = vadd.f32 %v1482_v38, %v5466_v31  ;;  %v5554_v38 = vor.u32 %v4762_v6, %v4192_v12  ;;  %v4765_v21 = vld [vmem:[%s5346_s16 + $0xe4] sm:$0xf0] }
 0x11e   : > { %v1571_v44 = vpop.f32.mrf.mxu3  ;;  %v1306_v45 = vpop.f32.mrf.mxu0  ;;  %1638 = vmatpush.bf16.msrb.mxu0 %v4223_v39 }
 0x11f   : > { %v1307_v49 = vadd.f32 %v1306_v45, %v5458_v24  ;;  %v1572_v54 = vadd.f32 %v1571_v44, %v1483_v42 }
 0x120   : > { %v1395_v50 = vpop.f32.mrf.mxu1 }
 0x121   : > { %v1396_v55 = vadd.f32 %v1395_v50, %v1307_v49  ;;  %v2731_v56 = vpack.c.bf16 %v1572_v54, %v1394_v22  ;;  %v2999_v57 = vadd.f32 %v2998_v29, %v1572_v54  ;;  %v3347_v60 = vmul.f32 %v1572_v54, %v1572_v54 }
 0x123   : > { %v2963_v63 = vadd.f32 %v2962_v34, %v1396_v55  ;;  %v3354_v5 = vmul.f32 %v1396_v55, %v1396_v55  ;;  %2859 = vst [vmem:[%s5476_s29 + $0x100] sm:$0xff] %v2731_v56  ;;  %v3582_v15 = vadd.f32 %v3581_v36, %v3347_v60  ;;  %v4837_v34 = vld [vmem:[#allocation5 + $0x224] sm:$0xf0] }
 0x124   : > { %v1484_v19 = vpop.f32.mrf.mxu2  ;;  %v4479_v36 = vor.u32 %v4837_v34, %v4478_v30  ;;  %v4200_v30 = vld [vmem:[%s5346_s16 + $0xe8] sm:$0xf0] }
 0x125   : > { %v3546_v16 = vadd.f32 %v3545_v37, %v3354_v5  ;;  %v1485_v35 = vadd.f32 %v1484_v19, %v5466_v31  ;;  %v4198_v19 = vld [vmem:[%s5346_s16 + $0xe0] sm:$0xf] }
 0x126   : > { %v1573_v22 = vpop.f32.mrf.mxu3  ;;  %v1309_v29 = vpop.f32.mrf.mxu0  ;;  %1727 = vmatpush.bf16.msrb.mxu1 %v4479_v36  ;;  %v5569_v39 = vor.u32 %v4765_v21, %v4198_v19  ;;  %v5572_v36 = vor.u32 %v4764_v25, %v4200_v30 }
 0x127   : > { %v1310_v40 = vadd.f32 %v1309_v29, %v5458_v24  ;;  %v1574_v37 = vadd.f32 %v1573_v22, %v1485_v35 }
 0x128   : > { %v1398_v41 = vpop.f32.mrf.mxu1 }
 0x129   : > { %v1399_v42 = vadd.f32 %v1398_v41, %v1310_v40  ;;  %1348 = vmatmul.bf16.gmra.mxu0 %v5551_v20  ;;  %v2735_v44 = vpack.c.bf16 %v1574_v37, %v1396_v55  ;;  %v3000_v45 = vadd.f32 %v2999_v57, %v1574_v37  ;;  %v3355_v46 = vmul.f32 %v1574_v37, %v1574_v37 }
 0x12a   : > { %1526 = vmatmul.bf16.gmra.mxu2 %v5551_v20 }
 0x12b   : > { %1437 = vmatmul.bf16.gmra.mxu1 %v5554_v38  ;;  %v2964_v48 = vadd.f32 %v2963_v63, %v1399_v42  ;;  %v3362_v49 = vmul.f32 %v1399_v42, %v1399_v42  ;;  %1615 = vmatmul.bf16.gmra.mxu3 %v5554_v38  ;;  %2863 = vst [vmem:[%s5476_s29 + $0x120] sm:$0xff] %v2735_v44 }
 0x12c   : > { %v3583_v50 = vadd.f32 %v3582_v15, %v3355_v46  ;;  %v1487_v54 = vpop.f32.mrf.mxu2 }
 0x12d   : > { %v3547_v51 = vadd.f32 %v3546_v16, %v3362_v49  ;;  %v1488_v55 = vadd.f32 %v1487_v54, %v5466_v31 }
 0x12e   : > { %v1576_v56 = vpop.f32.mrf.mxu3  ;;  %v1311_v57 = vpop.f32.mrf.mxu0 }
 0x12f   : > { %v1312_v60 = vadd.f32 %v1311_v57, %v5458_v24  ;;  %v1577_v62 = vadd.f32 %v1576_v56, %v1488_v55  ;;  %v4826_v57 = vld [vmem:[#allocation5 + $0x1d4] sm:$0xf] }
 0x130   : > { %v1400_v61 = vpop.f32.mrf.mxu1 }
 0x131   : > { %v1401_v63 = vadd.f32 %v1400_v61, %v1312_v60  ;;  %v2739_v5 = vpack.c.bf16 %v1577_v62, %v1399_v42  ;;  %v3001_v6 = vadd.f32 %v3000_v45, %v1577_v62  ;;  %v3363_v12 = vmul.f32 %v1577_v62, %v1577_v62  ;;  %v4456_v60 = vld [vmem:[#allocation5 + $0x1f0] sm:$0xf0] }
 0x132   : > { %v4890_v61 = vld [vmem:[#allocation5 + $0x3d4] sm:$0xf] }
 0x133   : > { %v2965_v15 = vadd.f32 %v2964_v48, %v1401_v63  ;;  %v3370_v16 = vmul.f32 %v1401_v63, %v1401_v63  ;;  %2867 = vst [vmem:[%s5476_s29 + $0x140] sm:$0xff] %v2739_v5  ;;  %v3584_v35 = vadd.f32 %v3583_v50, %v3363_v12  ;;  %v4712_v12 = vld [vmem:[#allocation5 + $0x3f0] sm:$0xf0] }
 0x134   : > { %v1489_v29 = vpop.f32.mrf.mxu2 }
 0x135   : > { %v3548_v22 = vadd.f32 %v3547_v51, %v3370_v16  ;;  %v1490_v34 = vadd.f32 %v1489_v29, %v5466_v31  ;;  %v4206_v29 = vld [vmem:[%s5346_s16 + $0xf0] sm:$0xf] }
 0x136   : > { %v1578_v40 = vpop.f32.mrf.mxu3  ;;  %v1314_v41 = vpop.f32.mrf.mxu0 }
 0x137   : > { %v1315_v37 = vadd.f32 %v1314_v41, %v5458_v24  ;;  %v1579_v44 = vadd.f32 %v1578_v40, %v1490_v34  ;;  %v4767_v34 = vld [vmem:[%s5346_s16 + $0xf4] sm:$0xf0] }
 0x138   : > { %v1403_v42 = vpop.f32.mrf.mxu1 }
 0x139   : > { %v1404_v45 = vadd.f32 %v1403_v42, %v1315_v37  ;;  %1353 = vmatmul.bf16.gmra.mxu0 %v5569_v39  ;;  %v2743_v46 = vpack.c.bf16 %v1579_v44, %v1401_v63  ;;  %v3002_v48 = vadd.f32 %v3001_v6, %v1579_v44  ;;  %v3371_v49 = vmul.f32 %v1579_v44, %v1579_v44  ;;  %v4766_v37 = vld [vmem:[%s5346_s16 + $0xf4] sm:$0xf]  ;;  %v4208_v42 = vld [vmem:[%s5346_s16 + $0xf8] sm:$0xf0]  ;;  %s5094_s16 = scalar_lea.hbm %s6329_s3, 2048 }
 0x13a   : > { %1531 = vmatmul.bf16.gmra.mxu2 %v5569_v39  ;;  %v4459_v6 = vor.u32 %v4826_v57, %v4456_v60  ;;  %v4830_v57 = vld [vmem:[#allocation5 + $0x1ec] sm:$0xf0]  ;;  %p5096_p2 = scmp.lt.s32.totalorder %s5094_s16, %s5090_s9 }
 0x13b   : > { %1442 = vmatmul.bf16.gmra.mxu1 %v5572_v36  ;;  %v2966_v50 = vadd.f32 %v2965_v15, %v1404_v45  ;;  %v3378_v51 = vmul.f32 %v1404_v45, %v1404_v45  ;;  %1620 = vmatmul.bf16.gmra.mxu3 %v5572_v36  ;;  %2871 = vst [vmem:[%s5476_s29 + $0x160] sm:$0xff] %v2743_v46  ;;  %v4710_v60 = vld [vmem:[#allocation5 + $0x3d0] sm:$0xf] }
 0x13c   : > { %v3585_v54 = vadd.f32 %v3584_v35, %v3371_v49  ;;  %v1492_v56 = vpop.f32.mrf.mxu2  ;;  %v4715_v15 = vor.u32 %v4890_v61, %v4712_v12  ;;  %2165 = vmatpush.bf16.msra.mxu2 %v4459_v6  ;;  %p5097_p9 = por %p5096_p2, %p5095_p11 }
 0x13d   : > { %v3549_v55 = vadd.f32 %v3548_v22, %v3378_v51  ;;  %v1493_v62 = vadd.f32 %v1492_v56, %v5466_v31  ;;  %v5587_v51 = vor.u32 %v4767_v34, %v4206_v29  ;;  %v4454_v56 = vld [vmem:[#allocation5 + $0x1d0] sm:$0xf] }
 0x13e   : > { %v1581_v63 = vpop.f32.mrf.mxu3  ;;  %v1316_v5 = vpop.f32.mrf.mxu0  ;;  %2254 = vmatpush.bf16.msra.mxu3 %v4715_v15  ;;  %p5098_p10 = pnand %p5097_p9, %p5093_p8 }
 0x13f   : > { %v1317_v19 = vadd.f32 %v1316_v5, %v5458_v24  ;;  %v1582_v16 = vadd.f32 %v1581_v63, %v1493_v62  ;;  %v5590_v62 = vor.u32 %v4766_v37, %v4208_v42  ;;  %v4455_v63 = vor.u32 %v4830_v57, %v4454_v56 }
 0x140   : > { %v1405_v21 = vpop.f32.mrf.mxu1 }
 0x141   : > { %v1406_v25 = vadd.f32 %v1405_v21, %v1317_v19  ;;  %v2747_v30 = vpack.c.bf16 %v1582_v16, %v1404_v45  ;;  %v3003_v35 = vadd.f32 %v3002_v48, %v1582_v16  ;;  %v3379_v22 = vmul.f32 %v1582_v16, %v1582_v16  ;;  %1987 = vmatpush.bf16.msra.mxu0 %v4455_v63 }
 0x143   : > { %v2967_v40 = vadd.f32 %v2966_v50, %v1406_v25  ;;  %v3386_v41 = vmul.f32 %v1406_v25, %v1406_v25  ;;  %2875 = vst [vmem:[%s5476_s29 + $0x180] sm:$0xff] %v2747_v30  ;;  %v3586_v44 = vadd.f32 %v3585_v54, %v3379_v22  ;;  %v4894_v50 = vld [vmem:[#allocation5 + $0x3ec] sm:$0xf0] }
 0x144   : > { %v1494_v49 = vpop.f32.mrf.mxu2  ;;  %v4711_v54 = vor.u32 %v4894_v50, %v4710_v60 }
 0x145   : > { %v3550_v46 = vadd.f32 %v3549_v55, %v3386_v41  ;;  %v1495_v61 = vadd.f32 %v1494_v49, %v5466_v31 }
 0x146   : > { %v1583_v45 = vpop.f32.mrf.mxu3  ;;  %v1319_v48 = vpop.f32.mrf.mxu0  ;;  %2076 = vmatpush.bf16.msra.mxu1 %v4711_v54 }
 0x147   : > { %v1320_v5 = vadd.f32 %v1319_v48, %v5458_v24  ;;  %v1584_v55 = vadd.f32 %v1583_v45, %v1495_v61 }
 0x148   : > { %v1408_v6 = vpop.f32.mrf.mxu1 }
 0x149   : > { %v1409_v12 = vadd.f32 %v1408_v6, %v1320_v5  ;;  %1358 = vmatmul.bf16.gmra.mxu0 %v5587_v51  ;;  %v2751_v19 = vpack.c.bf16 %v1584_v55, %v1406_v25  ;;  %v3004_v21 = vadd.f32 %v3003_v35, %v1584_v55  ;;  %v3387_v15 = vmul.f32 %v1584_v55, %v1584_v55 }
 0x14a   : > { %1536 = vmatmul.bf16.gmra.mxu2 %v5587_v51 }
 0x14b   : > { %1447 = vmatmul.bf16.gmra.mxu1 %v5590_v62  ;;  %v2968_v16 = vadd.f32 %v2967_v40, %v1409_v12  ;;  %v3394_v30 = vmul.f32 %v1409_v12, %v1409_v12  ;;  %1625 = vmatmul.bf16.gmra.mxu3 %v5590_v62  ;;  %2879 = vst [vmem:[%s5476_s29 + $0x1a0] sm:$0xff] %v2751_v19 }
 0x14c   : > { %v3587_v22 = vadd.f32 %v3586_v44, %v3387_v15  ;;  %v1497_v34 = vpop.f32.mrf.mxu2 }
 0x14d   : > { %v3551_v29 = vadd.f32 %v3550_v46, %v3394_v30  ;;  %v1498_v41 = vadd.f32 %v1497_v34, %v5466_v31 }
 0x14e   : > { %v1586_v37 = vpop.f32.mrf.mxu3  ;;  %v1321_v42 = vpop.f32.mrf.mxu0 }
 0x14f   : > { %v1322_v25 = vadd.f32 %v1321_v42, %v5458_v24  ;;  %v1587_v49 = vadd.f32 %v1586_v37, %v1498_v41  ;;  %v4818_v41 = vld [vmem:[#allocation5 + $0x194] sm:$0xf] }
 0x150   : > { %v1410_v35 = vpop.f32.mrf.mxu1  ;;  %v4424_v37 = vld [vmem:[#allocation5 + $0x1b0] sm:$0xf0] }
 0x151   : > { %v1411_v56 = vadd.f32 %v1410_v35, %v1322_v25  ;;  %v2755_v57 = vpack.c.bf16 %v1587_v49, %v1409_v12  ;;  %v3005_v60 = vadd.f32 %v3004_v21, %v1587_v49  ;;  %v3395_v40 = vmul.f32 %v1587_v49, %v1587_v49  ;;  %v4882_v42 = vld [vmem:[#allocation5 + $0x394] sm:$0xf] }
 0x153   : > { %v2969_v61 = vadd.f32 %v2968_v16, %v1411_v56  ;;  %v3402_v45 = vmul.f32 %v1411_v56, %v1411_v56  ;;  %2883 = vst [vmem:[%s5476_s29 + $0x1c0] sm:$0xff] %v2755_v57  ;;  %v3588_v48 = vadd.f32 %v3587_v22, %v3395_v40  ;;  %v4680_v57 = vld [vmem:[#allocation5 + $0x3b0] sm:$0xf0] }
 0x154   : > { %v1499_v44 = vpop.f32.mrf.mxu2 }
 0x155   : > { %v3552_v63 = vadd.f32 %v3551_v29, %v3402_v45  ;;  %v1500_v46 = vadd.f32 %v1499_v44, %v5466_v31 }
 0x156   : > { %v1588_v50 = vpop.f32.mrf.mxu3  ;;  %v1324_v5 = vpop.f32.mrf.mxu0 }
 0x157   : > { %v1325_v6 = vadd.f32 %v1324_v5, %v5458_v24  ;;  %v1589_v55 = vadd.f32 %v1588_v50, %v1500_v46 }
 0x158   : > { %v1413_v54 = vpop.f32.mrf.mxu1 }
 0x159   : > { %v1414_v19 = vadd.f32 %v1413_v54, %v1325_v6  ;;  %1639 = vmatmul.bf16.vlgmr.msrb.gmra.mxu0 %v5360_v43  ;;  %v2759_v12 = vpack.c.bf16 %v1589_v55, %v1411_v56  ;;  %v3006_v21 = vadd.f32 %v3005_v60, %v1589_v55  ;;  %v3403_v15 = vmul.f32 %v1589_v55, %v1589_v55 }
 0x15a   : > { %1817 = vmatmul.bf16.vlgmr.msrb.gmra.mxu2 %v5360_v43  ;;  %v4427_v56 = vor.u32 %v4818_v41, %v4424_v37 }
 0x15b   : > { %1728 = vmatmul.bf16.vlgmr.msrb.gmra.mxu1 %v5362_v47  ;;  %v2970_v16 = vadd.f32 %v2969_v61, %v1414_v19  ;;  %v3410_v30 = vmul.f32 %v1414_v19, %v1414_v19  ;;  %1906 = vmatmul.bf16.vlgmr.msrb.gmra.mxu3 %v5362_v47  ;;  %2887 = vst [vmem:[%s5476_s29 + $0x1e0] sm:$0xff] %v2759_v12  ;;  %v4422_v12 = vld [vmem:[#allocation5 + $0x190] sm:$0xf] }
 0x15c   : > { %v3589_v22 = vadd.f32 %v3588_v48, %v3403_v15  ;;  %v1502_v34 = vpop.f32.mrf.mxu2  ;;  %v4683_v61 = vor.u32 %v4882_v42, %v4680_v57  ;;  %2166 = vmatpush.bf16.msra.mxu2 %v4427_v56  ;;  %v4822_v15 = vld [vmem:[#allocation5 + $0x1ac] sm:$0xf0] }
 0x15d   : > { %v3553_v29 = vadd.f32 %v3552_v63, %v3410_v30  ;;  %v1503_v25 = vadd.f32 %v1502_v34, %v5466_v31  ;;  %v4678_v30 = vld [vmem:[#allocation5 + $0x390] sm:$0xf]  ;;  %v4423_v42 = vor.u32 %v4822_v15, %v4422_v12 }
 0x15e   : > { %v1591_v35 = vpop.f32.mrf.mxu3  ;;  %v1326_v49 = vpop.f32.mrf.mxu0  ;;  %2255 = vmatpush.bf16.msra.mxu3 %v4683_v61 }
 0x15f   : > { %v1327_v60 = vadd.f32 %v1326_v49, %v5458_v24  ;;  %v1592_v45 = vadd.f32 %v1591_v35, %v1503_v25  ;;  %v4886_v25 = vld [vmem:[#allocation5 + $0x3ac] sm:$0xf0]  ;;  %1988 = vmatpush.bf16.msra.mxu0 %v4423_v42 }
 0x160   : > { %v1415_v40 = vpop.f32.mrf.mxu1 }
 0x161   : > { %v1416_v44 = vadd.f32 %v1415_v40, %v1327_v60  ;;  %v2763_v48 = vpack.c.bf16 %v1592_v45, %v1414_v19  ;;  %v3007_v63 = vadd.f32 %v3006_v21, %v1592_v45  ;;  %v3411_v46 = vmul.f32 %v1592_v45, %v1592_v45 }
 0x162   : > { %v4679_v21 = vor.u32 %v4886_v25, %v4678_v30 }
 0x163   : > { %v2971_v50 = vadd.f32 %v2970_v16, %v1416_v44  ;;  %v3418_v5 = vmul.f32 %v1416_v44, %v1416_v44  ;;  %2891 = vst [vmem:[%s5476_s29 + $0x200] sm:$0xff] %v2763_v48  ;;  %v3590_v6 = vadd.f32 %v3589_v22, %v3411_v46 }
 0x164   : > { %v1504_v55 = vpop.f32.mrf.mxu2  ;;  %2077 = vmatpush.bf16.msra.mxu1 %v4679_v21 }
 0x165   : > { %v3554_v54 = vadd.f32 %v3553_v29, %v3418_v5  ;;  %v1505_v34 = vadd.f32 %v1504_v55, %v5466_v31 }
 0x166   : > { %v1593_v41 = vpop.f32.mrf.mxu3  ;;  %v1329_v37 = vpop.f32.mrf.mxu0 }
 0x167   : > { %v1330_v35 = vadd.f32 %v1329_v37, %v5458_v24  ;;  %v1594_v16 = vadd.f32 %v1593_v41, %v1505_v34 }
 0x168   : > { %v1418_v19 = vpop.f32.mrf.mxu1 }
 0x169   : > { %v1419_v49 = vadd.f32 %v1418_v19, %v1330_v35  ;;  %1644 = vmatmul.bf16.gmra.mxu0 %v5372_v2  ;;  %v2767_v22 = vpack.c.bf16 %v1594_v16, %v1416_v44  ;;  %v3008_v29 = vadd.f32 %v3007_v63, %v1594_v16  ;;  %v3419_v56 = vmul.f32 %v1594_v16, %v1594_v16 }
 0x16a   : > { %1822 = vmatmul.bf16.gmra.mxu2 %v5372_v2 }
 0x16b   : > { %1733 = vmatmul.bf16.gmra.mxu1 %v5374_v3  ;;  %v2972_v57 = vadd.f32 %v2971_v50, %v1419_v49  ;;  %v3426_v60 = vmul.f32 %v1419_v49, %v1419_v49  ;;  %1911 = vmatmul.bf16.gmra.mxu3 %v5374_v3  ;;  %2895 = vst [vmem:[%s5476_s29 + $0x220] sm:$0xff] %v2767_v22 }
 0x16c   : > { %v3591_v40 = vadd.f32 %v3590_v6, %v3419_v56 }
 0x16d   : > { %v3555_v61 = vadd.f32 %v3554_v54, %v3426_v60  ;;  %v1507_v45 = vpop.f32.mrf.mxu2 }
 0x16e   : > { %v1508_v48 = vadd.f32 %v1507_v45, %v5466_v31  ;;  %v1596_v46 = vpop.f32.mrf.mxu3  ;;  %v1331_v5 = vpop.f32.mrf.mxu0 }
 0x16f   : > { %v1332_v44 = vadd.f32 %v1331_v5, %v5458_v24  ;;  %v4874_v5 = vld [vmem:[#allocation5 + $0x354] sm:$0xf] }
 0x170   : > { %v1420_v63 = vpop.f32.mrf.mxu1  ;;  %v1597_v55 = vadd.f32 %v1596_v46, %v1508_v48  ;;  %v4810_v48 = vld [vmem:[#allocation5 + $0x154] sm:$0xf] }
 0x171   : > { %v1421_v12 = vadd.f32 %v1420_v63, %v1332_v44  ;;  %v4392_v46 = vld [vmem:[#allocation5 + $0x170] sm:$0xf0] }
 0x172   : > { %v2771_v15 = vpack.c.bf16 %v1597_v55, %v1419_v49  ;;  %v3009_v30 = vadd.f32 %v3008_v29, %v1597_v55  ;;  %v3427_v50 = vmul.f32 %v1597_v55, %v1597_v55 }
 0x173   : > { %v2973_v34 = vadd.f32 %v2972_v57, %v1421_v12  ;;  %v3434_v41 = vmul.f32 %v1421_v12, %v1421_v12 }
 0x174   : > { %2899 = vst [vmem:[%s5476_s29 + $0x240] sm:$0xff] %v2771_v15  ;;  %v3592_v37 = vadd.f32 %v3591_v40, %v3427_v50  ;;  %v4648_v15 = vld [vmem:[#allocation5 + $0x370] sm:$0xf0] }
 0x175   : > { %v3556_v42 = vadd.f32 %v3555_v61, %v3434_v41  ;;  %v1509_v6 = vpop.f32.mrf.mxu2 }
 0x176   : > { %v1510_v54 = vadd.f32 %v1509_v6, %v5466_v31  ;;  %v1598_v25 = vpop.f32.mrf.mxu3  ;;  %v1334_v35 = vpop.f32.mrf.mxu0 }
 0x177   : > { %v1335_v19 = vadd.f32 %v1334_v35, %v5458_v24 }
 0x178   : > { %v1423_v21 = vpop.f32.mrf.mxu1  ;;  %v1599_v16 = vadd.f32 %v1598_v25, %v1510_v54 }
 0x179   : > { %v1424_v22 = vadd.f32 %v1423_v21, %v1335_v19  ;;  %1649 = vmatmul.bf16.gmra.mxu0 %v5384_v8 }
 0x17a   : > { %v2775_v49 = vpack.c.bf16 %v1599_v16, %v1421_v12  ;;  %v3010_v29 = vadd.f32 %v3009_v30, %v1599_v16  ;;  %v3435_v56 = vmul.f32 %v1599_v16, %v1599_v16  ;;  %1827 = vmatmul.bf16.gmra.mxu2 %v5384_v8  ;;  %v4395_v12 = vor.u32 %v4810_v48, %v4392_v46 }
 0x17b   : > { %1738 = vmatmul.bf16.gmra.mxu1 %v5386_v9  ;;  %v2974_v57 = vadd.f32 %v2973_v34, %v1424_v22  ;;  %v3442_v60 = vmul.f32 %v1424_v22, %v1424_v22  ;;  %1916 = vmatmul.bf16.gmra.mxu3 %v5386_v9  ;;  %v4651_v34 = vor.u32 %v4874_v5, %v4648_v15 }
 0x17c   : > { %2903 = vst [vmem:[%s5476_s29 + $0x260] sm:$0xff] %v2775_v49  ;;  %v3593_v40 = vadd.f32 %v3592_v37, %v3435_v56  ;;  %2167 = vmatpush.bf16.msra.mxu2 %v4395_v12  ;;  %v4390_v49 = vld [vmem:[#allocation5 + $0x150] sm:$0xf] }
 0x17d   : > { %v3557_v61 = vadd.f32 %v3556_v42, %v3442_v60  ;;  %v1512_v45 = vpop.f32.mrf.mxu2  ;;  %2256 = vmatpush.bf16.msra.mxu3 %v4651_v34  ;;  %v4814_v56 = vld [vmem:[#allocation5 + $0x16c] sm:$0xf0] }
 0x17e   : > { %v1513_v44 = vadd.f32 %v1512_v45, %v5466_v31  ;;  %v1601_v63 = vpop.f32.mrf.mxu3  ;;  %v1336_v55 = vpop.f32.mrf.mxu0  ;;  %v4646_v60 = vld [vmem:[#allocation5 + $0x350] sm:$0xf]  ;;  %v4391_v5 = vor.u32 %v4814_v56, %v4390_v49 }
 0x17f   : > { %v1337_v30 = vadd.f32 %v1336_v55, %v5458_v24 }
 0x180   : > { %v1425_v50 = vpop.f32.mrf.mxu1  ;;  %v1602_v41 = vadd.f32 %v1601_v63, %v1513_v44  ;;  %v4878_v44 = vld [vmem:[#allocation5 + $0x36c] sm:$0xf0]  ;;  %1989 = vmatpush.bf16.msra.mxu0 %v4391_v5 }
 0x181   : > { %v1426_v6 = vadd.f32 %v1425_v50, %v1337_v30 }
 0x182   : > { %v2779_v37 = vpack.c.bf16 %v1602_v41, %v1424_v22  ;;  %v3011_v42 = vadd.f32 %v3010_v29, %v1602_v41  ;;  %v3443_v54 = vmul.f32 %v1602_v41, %v1602_v41  ;;  %v4647_v29 = vor.u32 %v4878_v44, %v4646_v60 }
 0x183   : > { %v2975_v25 = vadd.f32 %v2974_v57, %v1426_v6  ;;  %v3450_v35 = vmul.f32 %v1426_v6, %v1426_v6 }
 0x184   : > { %2907 = vst [vmem:[%s5476_s29 + $0x280] sm:$0xff] %v2779_v37  ;;  %v3594_v19 = vadd.f32 %v3593_v40, %v3443_v54  ;;  %2078 = vmatpush.bf16.msra.mxu1 %v4647_v29 }
 0x185   : > { %v3558_v21 = vadd.f32 %v3557_v61, %v3450_v35  ;;  %v1514_v16 = vpop.f32.mrf.mxu2 }
 0x186   : > { %v1515_v45 = vadd.f32 %v1514_v16, %v5466_v31  ;;  %v1603_v48 = vpop.f32.mrf.mxu3  ;;  %v1339_v46 = vpop.f32.mrf.mxu0 }
 0x187   : > { %v1340_v63 = vadd.f32 %v1339_v46, %v5458_v24 }
 0x188   : > { %v1428_v22 = vpop.f32.mrf.mxu1  ;;  %v1604_v57 = vadd.f32 %v1603_v48, %v1515_v45 }
 0x189   : > { %v1429_v55 = vadd.f32 %v1428_v22, %v1340_v63  ;;  %1654 = vmatmul.bf16.gmra.mxu0 %v5396_v26 }
 0x18a   : > { %v2783_v40 = vpack.c.bf16 %v1604_v57, %v1426_v6  ;;  %v3012_v61 = vadd.f32 %v3011_v42, %v1604_v57  ;;  %v3451_v12 = vmul.f32 %v1604_v57, %v1604_v57  ;;  %1832 = vmatmul.bf16.gmra.mxu2 %v5396_v26 }
 0x18b   : > { %1743 = vmatmul.bf16.gmra.mxu1 %v5398_v27  ;;  %v2976_v15 = vadd.f32 %v2975_v25, %v1429_v55  ;;  %v3458_v30 = vmul.f32 %v1429_v55, %v1429_v55  ;;  %1921 = vmatmul.bf16.gmra.mxu3 %v5398_v27 }
 0x18c   : > { %2911 = vst [vmem:[%s5476_s29 + $0x2a0] sm:$0xff] %v2783_v40  ;;  %v3595_v50 = vadd.f32 %v3594_v19, %v3451_v12 }
 0x18d   : > { %v3559_v34 = vadd.f32 %v3558_v21, %v3458_v30  ;;  %v1517_v41 = vpop.f32.mrf.mxu2 }
 0x18e   : > { %v1518_v37 = vadd.f32 %v1517_v41, %v5466_v31  ;;  %v1606_v54 = vpop.f32.mrf.mxu3  ;;  %v1341_v35 = vpop.f32.mrf.mxu0 }
 0x18f   : > { %v1342_v6 = vadd.f32 %v1341_v35, %v5458_v24  ;;  %v4866_v35 = vld [vmem:[#allocation5 + $0x314] sm:$0xf] }
 0x190   : > { %v1430_v42 = vpop.f32.mrf.mxu1  ;;  %v1607_v16 = vadd.f32 %v1606_v54, %v1518_v37  ;;  %v4802_v37 = vld [vmem:[#allocation5 + $0x114] sm:$0xf] }
 0x191   : > { %v1431_v49 = vadd.f32 %v1430_v42, %v1342_v6  ;;  %v4360_v54 = vld [vmem:[#allocation5 + $0x130] sm:$0xf0] }
 0x192   : > { %v2787_v56 = vpack.c.bf16 %v1607_v16, %v1429_v55  ;;  %v3013_v60 = vadd.f32 %v3012_v61, %v1607_v16  ;;  %v3459_v25 = vmul.f32 %v1607_v16, %v1607_v16 }
 0x193   : > { %v2977_v45 = vadd.f32 %v2976_v15, %v1431_v49  ;;  %v3466_v48 = vmul.f32 %v1431_v49, %v1431_v49 }
 0x194   : > { %2915 = vst [vmem:[%s5476_s29 + $0x2c0] sm:$0xff] %v2787_v56  ;;  %v3596_v46 = vadd.f32 %v3595_v50, %v3459_v25  ;;  %v4616_v56 = vld [vmem:[#allocation5 + $0x330] sm:$0xf0] }
 0x195   : > { %v3560_v5 = vadd.f32 %v3559_v34, %v3466_v48  ;;  %v1519_v19 = vpop.f32.mrf.mxu2 }
 0x196   : > { %v1520_v21 = vadd.f32 %v1519_v19, %v5466_v31  ;;  %v1608_v44 = vpop.f32.mrf.mxu3  ;;  %v1344_v63 = vpop.f32.mrf.mxu0 }
 0x197   : > { %v1345_v22 = vadd.f32 %v1344_v63, %v5458_v24 }
 0x198   : > { %v1433_v29 = vpop.f32.mrf.mxu1  ;;  %v1609_v57 = vadd.f32 %v1608_v44, %v1520_v21 }
 0x199   : > { %v1434_v40 = vadd.f32 %v1433_v29, %v1345_v22  ;;  %1659 = vmatmul.bf16.gmra.mxu0 %v5408_v32 }
 0x19a   : > { %v2791_v55 = vpack.c.bf16 %v1609_v57, %v1431_v49  ;;  %v3014_v61 = vadd.f32 %v3013_v60, %v1609_v57  ;;  %v3467_v12 = vmul.f32 %v1609_v57, %v1609_v57  ;;  %1837 = vmatmul.bf16.gmra.mxu2 %v5408_v32  ;;  %v4363_v49 = vor.u32 %v4802_v37, %v4360_v54 }
 0x19b   : > { %1748 = vmatmul.bf16.gmra.mxu1 %v5410_v33  ;;  %v2978_v15 = vadd.f32 %v2977_v45, %v1434_v40  ;;  %v3474_v30 = vmul.f32 %v1434_v40, %v1434_v40  ;;  %1926 = vmatmul.bf16.gmra.mxu3 %v5410_v33  ;;  %v4619_v45 = vor.u32 %v4866_v35, %v4616_v56 }
 0x19c   : > { %2919 = vst [vmem:[%s5476_s29 + $0x2e0] sm:$0xff] %v2791_v55  ;;  %v3597_v50 = vadd.f32 %v3596_v46, %v3467_v12  ;;  %2168 = vmatpush.bf16.msra.mxu2 %v4363_v49  ;;  %v4358_v55 = vld [vmem:[#allocation5 + $0x110] sm:$0xf] }
 0x19d   : > { %v3561_v34 = vadd.f32 %v3560_v5, %v3474_v30  ;;  %v1522_v41 = vpop.f32.mrf.mxu2  ;;  %2257 = vmatpush.bf16.msra.mxu3 %v4619_v45  ;;  %v4806_v12 = vld [vmem:[#allocation5 + $0x12c] sm:$0xf0] }
 0x19e   : > { %v1523_v6 = vadd.f32 %v1522_v41, %v5466_v31  ;;  %v1611_v42 = vpop.f32.mrf.mxu3  ;;  %v1346_v16 = vpop.f32.mrf.mxu0  ;;  %v4614_v30 = vld [vmem:[#allocation5 + $0x310] sm:$0xf]  ;;  %v4359_v35 = vor.u32 %v4806_v12, %v4358_v55 }
 0x19f   : > { %v1347_v60 = vadd.f32 %v1346_v16, %v5458_v24 }
 0x1a0   : > { %v1435_v25 = vpop.f32.mrf.mxu1  ;;  %v1612_v48 = vadd.f32 %v1611_v42, %v1523_v6  ;;  %v4870_v6 = vld [vmem:[#allocation5 + $0x32c] sm:$0xf0]  ;;  %1990 = vmatpush.bf16.msra.mxu0 %v4359_v35 }
 0x1a1   : > { %v1436_v19 = vadd.f32 %v1435_v25, %v1347_v60 }
 0x1a2   : > { %v2795_v46 = vpack.c.bf16 %v1612_v48, %v1434_v40  ;;  %v3015_v5 = vadd.f32 %v3014_v61, %v1612_v48  ;;  %v3475_v21 = vmul.f32 %v1612_v48, %v1612_v48  ;;  %v4615_v61 = vor.u32 %v4870_v6, %v4614_v30 }
 0x1a3   : > { %v2979_v44 = vadd.f32 %v2978_v15, %v1436_v19  ;;  %v3482_v63 = vmul.f32 %v1436_v19, %v1436_v19 }
 0x1a4   : > { %2923 = vst [vmem:[%s5476_s29 + $0x300] sm:$0xff] %v2795_v46  ;;  %v3598_v22 = vadd.f32 %v3597_v50, %v3475_v21  ;;  %2079 = vmatpush.bf16.msra.mxu1 %v4615_v61 }
 0x1a5   : > { %v3562_v29 = vadd.f32 %v3561_v34, %v3482_v63  ;;  %v1524_v57 = vpop.f32.mrf.mxu2 }
 0x1a6   : > { %v1525_v41 = vadd.f32 %v1524_v57, %v5466_v31  ;;  %v1613_v37 = vpop.f32.mrf.mxu3  ;;  %v1349_v54 = vpop.f32.mrf.mxu0 }
 0x1a7   : > { %v1350_v42 = vadd.f32 %v1349_v54, %v5458_v24 }
 0x1a8   : > { %v1438_v40 = vpop.f32.mrf.mxu1  ;;  %v1614_v15 = vadd.f32 %v1613_v37, %v1525_v41 }
 0x1a9   : > { %v1439_v16 = vadd.f32 %v1438_v40, %v1350_v42  ;;  %1664 = vmatmul.bf16.gmra.mxu0 %v5420_v52 }
 0x1aa   : > { %v2799_v50 = vpack.c.bf16 %v1614_v15, %v1436_v19  ;;  %v3016_v34 = vadd.f32 %v3015_v5, %v1614_v15  ;;  %v3483_v49 = vmul.f32 %v1614_v15, %v1614_v15  ;;  %1842 = vmatmul.bf16.gmra.mxu2 %v5420_v52 }
 0x1ab   : > { %1753 = vmatmul.bf16.gmra.mxu1 %v5422_v53  ;;  %v2980_v56 = vadd.f32 %v2979_v44, %v1439_v16  ;;  %v3490_v60 = vmul.f32 %v1439_v16, %v1439_v16  ;;  %1931 = vmatmul.bf16.gmra.mxu3 %v5422_v53 }
 0x1ac   : > { %2927 = vst [vmem:[%s5476_s29 + $0x320] sm:$0xff] %v2799_v50  ;;  %v3599_v25 = vadd.f32 %v3598_v22, %v3483_v49 }
 0x1ad   : > { %v3563_v45 = vadd.f32 %v3562_v29, %v3490_v60  ;;  %v1527_v48 = vpop.f32.mrf.mxu2 }
 0x1ae   : > { %v1528_v46 = vadd.f32 %v1527_v48, %v5466_v31  ;;  %v1616_v21 = vpop.f32.mrf.mxu3  ;;  %v1351_v63 = vpop.f32.mrf.mxu0 }
 0x1af   : > { %v1352_v19 = vadd.f32 %v1351_v63, %v5458_v24 }
 0x1b0   : > { %v1440_v5 = vpop.f32.mrf.mxu1  ;;  %v1617_v57 = vadd.f32 %v1616_v21, %v1528_v46 }
 0x1b1   : > { %v1441_v55 = vadd.f32 %v1440_v5, %v1352_v19 }
 0x1b2   : > { %v2803_v12 = vpack.c.bf16 %v1617_v57, %v1439_v16  ;;  %v3017_v30 = vadd.f32 %v3016_v34, %v1617_v57  ;;  %v3491_v44 = vmul.f32 %v1617_v57, %v1617_v57 }
 0x1b3   : > { %v2981_v41 = vadd.f32 %v2980_v56, %v1441_v55  ;;  %v3498_v37 = vmul.f32 %v1441_v55, %v1441_v55 }
 0x1b4   : > { %2931 = vst [vmem:[%s5476_s29 + $0x340] sm:$0xff] %v2803_v12  ;;  %v3600_v54 = vadd.f32 %v3599_v25, %v3491_v44 }
 0x1b5   : > { %v3564_v35 = vadd.f32 %v3563_v45, %v3498_v37  ;;  %v1529_v22 = vpop.f32.mrf.mxu2 }
 0x1b6   : > { %v1530_v29 = vadd.f32 %v1529_v22, %v5466_v31  ;;  %v1618_v6 = vpop.f32.mrf.mxu3  ;;  %v1354_v42 = vpop.f32.mrf.mxu0 }
 0x1b7   : > { %v1355_v40 = vadd.f32 %v1354_v42, %v5458_v24 }
 0x1b8   : > { %v1443_v61 = vpop.f32.mrf.mxu1  ;;  %v1619_v15 = vadd.f32 %v1618_v6, %v1530_v29 }
 0x1b9   : > { %v1444_v50 = vadd.f32 %v1443_v61, %v1355_v40  ;;  %1669 = vmatmul.bf16.gmra.mxu0 %v5432_v58 }
 0x1ba   : > { %v2807_v16 = vpack.c.bf16 %v1619_v15, %v1441_v55  ;;  %v3018_v34 = vadd.f32 %v3017_v30, %v1619_v15  ;;  %v3499_v49 = vmul.f32 %v1619_v15, %v1619_v15  ;;  %1847 = vmatmul.bf16.gmra.mxu2 %v5432_v58 }
 0x1bb   : > { %1758 = vmatmul.bf16.gmra.mxu1 %v5434_v59  ;;  %v2982_v56 = vadd.f32 %v2981_v41, %v1444_v50  ;;  %v3506_v60 = vmul.f32 %v1444_v50, %v1444_v50  ;;  %1936 = vmatmul.bf16.gmra.mxu3 %v5434_v59 }
 0x1bc   : > { %2935 = vst [vmem:[%s5476_s29 + $0x360] sm:$0xff] %v2807_v16  ;;  %v3601_v25 = vadd.f32 %v3600_v54, %v3499_v49 }
 0x1bd   : > { %v3565_v45 = vadd.f32 %v3564_v35, %v3506_v60  ;;  %v1532_v48 = vpop.f32.mrf.mxu2  ;;  %v4328_v60 = vld [vmem:[#allocation5 + $0xf0] sm:$0xf0] }
 0x1be   : > { %v1533_v46 = vadd.f32 %v1532_v48, %v5466_v31  ;;  %v1621_v21 = vpop.f32.mrf.mxu3  ;;  %v1356_v63 = vpop.f32.mrf.mxu0 }
 0x1bf   : > { %v1357_v19 = vadd.f32 %v1356_v63, %v5458_v24  ;;  %v4326_v63 = vld [vmem:[#allocation5 + $0xd0] sm:$0xf] }
 0x1c0   : > { %v1445_v5 = vpop.f32.mrf.mxu1  ;;  %v1622_v57 = vadd.f32 %v1621_v21, %v1533_v46  ;;  %v4584_v21 = vld [vmem:[#allocation5 + $0x2f0] sm:$0xf0] }
 0x1c1   : > { %v1446_v55 = vadd.f32 %v1445_v5, %v1357_v19  ;;  %v4798_v19 = vld [vmem:[#allocation5 + $0xec] sm:$0xf0] }
 0x1c2   : > { %v2811_v12 = vpack.c.bf16 %v1622_v57, %v1444_v50  ;;  %v3019_v30 = vadd.f32 %v3018_v34, %v1622_v57  ;;  %v3507_v44 = vmul.f32 %v1622_v57, %v1622_v57 }
 0x1c3   : > { %v2983_v41 = vadd.f32 %v2982_v56, %v1446_v55  ;;  %v3514_v37 = vmul.f32 %v1446_v55, %v1446_v55  ;;  %v4794_v56 = vld [vmem:[#allocation5 + $0xd4] sm:$0xf] }
 0x1c4   : > { %2939 = vst [vmem:[%s5476_s29 + $0x380] sm:$0xff] %v2811_v12  ;;  %v3602_v22 = vadd.f32 %v3601_v25, %v3507_v44  ;;  %v4858_v25 = vld [vmem:[#allocation5 + $0x2d4] sm:$0xf]  ;;  %v4331_v46 = vor.u32 %v4794_v56, %v4328_v60  ;;  %v4582_v12 = vld [vmem:[#allocation5 + $0x2d0] sm:$0xf] }
 0x1c5   : > { %v3566_v29 = vadd.f32 %v3565_v45, %v3514_v37  ;;  %v1534_v54 = vpop.f32.mrf.mxu2  ;;  %v4587_v57 = vor.u32 %v4858_v25, %v4584_v21  ;;  %v4981_v21 = vld [vmem:[#allocation7] sm:$0xff] }
 0x1c6   : > { %v1535_v35 = vadd.f32 %v1534_v54, %v5466_v31  ;;  %v1623_v6 = vpop.f32.mrf.mxu3  ;;  %v1359_v42 = vpop.f32.mrf.mxu0  ;;  %2169 = vmatpush.bf16.msra.mxu2 %v4331_v46 }
 0x1c7   : > { %v1360_v40 = vadd.f32 %v1359_v42, %v5458_v24  ;;  %2258 = vmatpush.bf16.msra.mxu3 %v4587_v57 }
 0x1c8   : > { %v1448_v61 = vpop.f32.mrf.mxu1  ;;  %v1624_v15 = vadd.f32 %v1623_v6, %v1535_v35 }
 0x1c9   : > { %v1449_v16 = vadd.f32 %v1448_v61, %v1360_v40  ;;  %1674 = vmatmul.bf16.gmra.mxu0 %v5444_v10 }
 0x1ca   : > { %v2815_v50 = vpack.c.bf16 %v1624_v15, %v1446_v55  ;;  %v3020_v34 = vadd.f32 %v3019_v30, %v1624_v15  ;;  %v3515_v49 = vmul.f32 %v1624_v15, %v1624_v15  ;;  %1852 = vmatmul.bf16.gmra.mxu2 %v5444_v10  ;;  %v4327_v55 = vor.u32 %v4798_v19, %v4326_v63  ;;  %v4862_v30 = vld [vmem:[#allocation5 + $0x2ec] sm:$0xf0] }
 0x1cb   : > { %1763 = vmatmul.bf16.gmra.mxu1 %v5446_v14  ;;  %v2984_v45 = vadd.f32 %v2983_v41, %v1449_v16  ;;  %v3522_v48 = vmul.f32 %v1449_v16, %v1449_v16  ;;  %1941 = vmatmul.bf16.gmra.mxu3 %v5446_v14  ;;  %v4583_v54 = vor.u32 %v4862_v30, %v4582_v12  ;;  %v5681_v63 = vperm.slane %v4981_v21, 2 }
 0x1cc   : > { %2943 = vst [vmem:[%s5476_s29 + $0x3a0] sm:$0xff] %v2815_v50  ;;  %v3603_v5 = vadd.f32 %v3602_v22, %v3515_v49  ;;  %1991 = vmatpush.bf16.msra.mxu0 %v4327_v55 }
 0x1cd   : > { %v3567_v44 = vadd.f32 %v3566_v29, %v3522_v48  ;;  %v1537_v37 = vpop.f32.mrf.mxu2  ;;  %2080 = vmatpush.bf16.msra.mxu1 %v4583_v54 }
 0x1ce   : > { %v1538_v41 = vadd.f32 %v1537_v37, %v5466_v31  ;;  %v1626_v35 = vpop.f32.mrf.mxu3  ;;  %v1361_v6 = vpop.f32.mrf.mxu0 }
 0x1cf   : > { %v1362_v42 = vadd.f32 %v1361_v6, %v5458_v24 }
 0x1d0   : > { %v1450_v40 = vpop.f32.mrf.mxu1  ;;  %v1627_v22 = vadd.f32 %v1626_v35, %v1538_v41 }
 0x1d1   : > { %v1451_v61 = vadd.f32 %v1450_v40, %v1362_v42 }
 0x1d2   : > { %v2819_v15 = vpack.c.bf16 %v1627_v22, %v1449_v16  ;;  %v3021_v50 = vadd.f32 %v3020_v34, %v1627_v22  ;;  %v3523_v49 = vmul.f32 %v1627_v22, %v1627_v22  ;;  %v4786_v22 = vld [vmem:[#allocation5 + $0x94] sm:$0xf] }
 0x1d3   : > { %v2985_v29 = vadd.f32 %v2984_v45, %v1451_v61  ;;  %v3530_v56 = vmul.f32 %v1451_v61, %v1451_v61 }
 0x1d4   : > { %2947 = vst [vmem:[%s5476_s29 + $0x3c0] sm:$0xff] %v2819_v15  ;;  %v3604_v60 = vadd.f32 %v3603_v5, %v3523_v49  ;;  %v4296_v15 = vld [vmem:[#allocation5 + $0xb0] sm:$0xf0] }
 0x1d5   : > { %v2986_v25 = vrot.slane %v2985_v29, 4  ;;  %v3568_v48 = vadd.f32 %v3567_v44, %v3530_v56  ;;  %v1539_v46 = vpop.f32.mrf.mxu2 }
 0x1d6   : > { %v1540_v19 = vadd.f32 %v1539_v46, %v5466_v31  ;;  %v1628_v24 = vpop.f32.mrf.mxu3  ;;  %v1640_v57 = vpop.f32.mrf.mxu0  ;;  %v5688_v31 = vperm.slane %v4981_v21, 3  ;;  %v4552_v46 = vld [vmem:[#allocation5 + $0x2b0] sm:$0xf0] }
 0x1d7   : > { %v2987_v55 = vadd.f32 %v2986_v25, %v2985_v29  ;;  %v3569_v12 = vrot.slane %v3568_v48, 4  ;;  %v1641_v45 = vadd.f32 %v1640_v57, %v5681_v63  ;;  %v4299_v25 = vor.u32 %v4786_v22, %v4296_v15 }
 0x1d8   : > { %v1729_v16 = vpop.f32.mrf.mxu1  ;;  %v1629_v34 = vadd.f32 %v1628_v24, %v1540_v19 }
 0x1d9   : > { %v3570_v30 = vadd.f32 %v3569_v12, %v3568_v48  ;;  %1679 = vmatmul.bf16.gmra.mxu0 %v5456_v23  ;;  %v2988_v54 = vrot.slane %v2987_v55, 2  ;;  %v1730_v42 = vadd.f32 %v1729_v16, %v1641_v45  ;;  %v4850_v48 = vld [vmem:[#allocation5 + $0x294] sm:$0xf]  ;;  %2170 = vmatpush.bf16.msra.mxu2 %v4299_v25 }
 0x1da   : > { %v2823_v5 = vpack.c.bf16 %v1629_v34, %v1451_v61  ;;  %v3022_v44 = vadd.f32 %v3021_v50, %v1629_v34  ;;  %v3531_v37 = vmul.f32 %v1629_v34, %v1629_v34  ;;  %1857 = vmatmul.bf16.gmra.mxu2 %v5456_v23  ;;  %v4555_v57 = vor.u32 %v4850_v48, %v4552_v46  ;;  %v4790_v46 = vld [vmem:[#allocation5 + $0xac] sm:$0xf0] }
 0x1db   : > { %1768 = vmatmul.bf16.gmra.mxu1 %v5460_v28  ;;  %1946 = vmatmul.bf16.gmra.mxu3 %v5460_v28  ;;  %v3571_v41 = vrot.slane %v3570_v30, 2  ;;  %v2989_v21 = vadd.f32 %v2988_v54, %v2987_v55 }
 0x1dc   : > { %2951 = vst [vmem:[%s5476_s29 + $0x3e0] sm:$0xff] %v2823_v5  ;;  %v3023_v35 = vrot.slane %v3022_v44, 4  ;;  %v3605_v6 = vadd.f32 %v3604_v60, %v3531_v37  ;;  %2259 = vmatpush.bf16.msra.mxu3 %v4555_v57 }
 0x1dd   : > { %v1818_v40 = vpop.f32.mrf.mxu2  ;;  %v3572_v12 = vadd.f32 %v3571_v41, %v3570_v30  ;;  %v2990_v15 = vrot.slane %v2989_v21, 1  ;;  %v4294_v41 = vld [vmem:[#allocation5 + $0x90] sm:$0xf] }
 0x1de   : > { %v3024_v61 = vadd.f32 %v3023_v35, %v3022_v44  ;;  %v3606_v50 = vrot.slane %v3605_v6, 4  ;;  %v1819_v49 = vadd.f32 %v1818_v40, %v5688_v31  ;;  %v1907_v29 = vpop.f32.mrf.mxu3  ;;  %v1642_v56 = vpop.f32.mrf.mxu0  ;;  %v3284_v35 = vmul.f32 %v1730_v42, %v1730_v42 }
 0x1df   : > { %v1643_v19 = vadd.f32 %v1642_v56, %v5681_v63  ;;  %v3573_v55 = vrot.slane %v3572_v12, 1 }
 0x1e0   : > { %v1731_v24 = vpop.f32.mrf.mxu1  ;;  %v3025_v60 = vrot.slane %v3024_v61, 2  ;;  %v3607_v16 = vadd.f32 %v3606_v50, %v3605_v6  ;;  %v1908_v34 = vadd.f32 %v1907_v29, %v1819_v49  ;;  %v4550_v6 = vld [vmem:[#allocation5 + $0x290] sm:$0xf] }
 0x1e1   : > { %v1732_v45 = vadd.f32 %v1731_v24, %v1643_v19  ;;  %v4295_v19 = vor.u32 %v4790_v46, %v4294_v41  ;;  %v4854_v24 = vld [vmem:[#allocation5 + $0x2ac] sm:$0xf0] }
 0x1e2   : > { %v3026_v5 = vadd.f32 %v3025_v60, %v3024_v61  ;;  %v3608_v44 = vrot.slane %v3607_v16, 2  ;;  %v2700_v37 = vpack.c.bf16 %v1908_v34, %v1730_v42  ;;  %v4551_v60 = vor.u32 %v4854_v24, %v4550_v6 }
 0x1e3   : > { %v3029_v40 = vadd.f32 %v1732_v45, %v1730_v42  ;;  %v3292_v22 = vmul.f32 %v1732_v45, %v1732_v45  ;;  %1992 = vmatpush.bf16.msra.mxu0 %v4295_v19 }
 0x1e4   : > { %v3027_v54 = vrot.slane %v3026_v5, 1  ;;  %v3609_v56 = vadd.f32 %v3608_v44, %v3607_v16  ;;  %2828 = vst [vmem:[%s5476_s29 + $0x8] sm:$0xff] %v2700_v37  ;;  %v2991_v16 = vadd.f32 %v2990_v15, %v2989_v21  ;;  %2081 = vmatpush.bf16.msra.mxu1 %v4551_v60 }
 0x1e5   : > { %v3612_v48 = vadd.f32 %v3292_v22, %v3284_v35  ;;  %v1820_v30 = vpop.f32.mrf.mxu2  ;;  %v3574_v22 = vadd.f32 %v3573_v55, %v3572_v12 }
 0x1e6   : > { %v3028_v50 = vadd.f32 %v3027_v54, %v3026_v5  ;;  %v3610_v49 = vrot.slane %v3609_v56, 1  ;;  %v1821_v29 = vadd.f32 %v1820_v30, %v5688_v31  ;;  %v1909_v61 = vpop.f32.mrf.mxu3  ;;  %v1645_v25 = vpop.f32.mrf.mxu0  ;;  %v3285_v5 = vmul.f32 %v1908_v34, %v1908_v34 }
 0x1e7   : > { %v1646_v42 = vadd.f32 %v1645_v25, %v5681_v63 }
 0x1e8   : > { %v1734_v57 = vpop.f32.mrf.mxu1  ;;  %v3259_v44 = vrot.slane %v3028_v50, 7  ;;  %v3611_v37 = vadd.f32 %v3610_v49, %v3609_v56  ;;  %v1910_v35 = vadd.f32 %v1909_v61, %v1821_v29 }
 0x1e9   : > { %v1735_v54 = vadd.f32 %v1734_v57, %v1646_v42  ;;  %1684 = vmatmul.bf16.gmra.mxu0 %v5479_v1 }
 0x1ea   : > { %v3842_v30 = vrot.slane %v3611_v37, 7  ;;  %v2704_v41 = vpack.c.bf16 %v1910_v35, %v1732_v45  ;;  %v3066_v46 = vadd.f32 %v1910_v35, %v1908_v34  ;;  %v3293_v28 = vmul.f32 %v1910_v35, %v1910_v35  ;;  %1862 = vmatmul.bf16.gmra.mxu2 %v5479_v1 }
 0x1eb   : > { %1773 = vmatmul.bf16.gmra.mxu1 %v5482_v13  ;;  %v3030_v21 = vadd.f32 %v3029_v40, %v1735_v54  ;;  %v3300_v15 = vmul.f32 %v1735_v54, %v1735_v54  ;;  %1951 = vmatmul.bf16.gmra.mxu3 %v5482_v13  ;;  %v5702_v56 = vsel %vm3266_vm0, %v2991_v16, %v3259_v44 }
 0x1ec   : > { %2832 = vst [vmem:[%s5476_s29 + $0x28] sm:$0xff] %v2704_v41  ;;  %v3649_v12 = vadd.f32 %v3293_v28, %v3285_v5  ;;  %v5706_v55 = vsel %vm3266_vm0, %v3574_v22, %v3842_v30 }
 0x1ed   : > { %v3613_v45 = vadd.f32 %v3612_v48, %v3300_v15  ;;  %v1823_v34 = vpop.f32.mrf.mxu2 }
 0x1ee   : > { %v1824_v6 = vadd.f32 %v1823_v34, %v5688_v31  ;;  %v1912_v50 = vpop.f32.mrf.mxu3  ;;  %v1647_v49 = vpop.f32.mrf.mxu0 }
 0x1ef   : > { %v1648_v40 = vadd.f32 %v1647_v49, %v5681_v63  ;;  %v4264_v49 = vld [vmem:[#allocation5 + $0x70] sm:$0xf0] }
 0x1f0   : > { %v1736_v29 = vpop.f32.mrf.mxu1  ;;  %v1913_v61 = vadd.f32 %v1912_v50, %v1824_v6  ;;  %v4778_v50 = vld [vmem:[#allocation5 + $0x54] sm:$0xf] }
 0x1f1   : > { %v1737_v25 = vadd.f32 %v1736_v29, %v1648_v40  ;;  %v4842_v40 = vld [vmem:[#allocation5 + $0x254] sm:$0xf] }
 0x1f2   : > { %v2708_v19 = vpack.c.bf16 %v1913_v61, %v1735_v54  ;;  %v3067_v24 = vadd.f32 %v3066_v46, %v1913_v61  ;;  %v3301_v42 = vmul.f32 %v1913_v61, %v1913_v61 }
 0x1f3   : > { %v3031_v57 = vadd.f32 %v3030_v21, %v1737_v25  ;;  %v3308_v28 = vmul.f32 %v1737_v25, %v1737_v25 }
 0x1f4   : > { %2836 = vst [vmem:[%s5476_s29 + $0x48] sm:$0xff] %v2708_v19  ;;  %v3650_v60 = vadd.f32 %v3649_v12, %v3301_v42  ;;  %v4267_v19 = vor.u32 %v4778_v50, %v4264_v49 }
 0x1f5   : > { %v3614_v16 = vadd.f32 %v3613_v45, %v3308_v28  ;;  %v1825_v44 = vpop.f32.mrf.mxu2 }
 0x1f6   : > { %v1826_v48 = vadd.f32 %v1825_v44, %v5688_v31  ;;  %v1914_v37 = vpop.f32.mrf.mxu3  ;;  %v1650_v35 = vpop.f32.mrf.mxu0  ;;  %2171 = vmatpush.bf16.msra.mxu2 %v4267_v19 }
 0x1f7   : > { %v1651_v22 = vadd.f32 %v1650_v35, %v5681_v63 }
 0x1f8   : > { %v1739_v5 = vpop.f32.mrf.mxu1  ;;  %v1915_v30 = vadd.f32 %v1914_v37, %v1826_v48 }
 0x1f9   : > { %v1740_v41 = vadd.f32 %v1739_v5, %v1651_v22  ;;  %1689 = vmatmul.bf16.gmra.mxu0 %v5497_v0 }
 0x1fa   : > { %v2712_v54 = vpack.c.bf16 %v1915_v30, %v1737_v25  ;;  %v3068_v46 = vadd.f32 %v3067_v24, %v1915_v30  ;;  %v3309_v21 = vmul.f32 %v1915_v30, %v1915_v30  ;;  %1867 = vmatmul.bf16.gmra.mxu2 %v5497_v0  ;;  %v4520_v24 = vld [vmem:[#allocation5 + $0x270] sm:$0xf0] }
 0x1fb   : > { %1778 = vmatmul.bf16.gmra.mxu1 %v5500_v7  ;;  %v3032_v15 = vadd.f32 %v3031_v57, %v1740_v41  ;;  %v3316_v12 = vmul.f32 %v1740_v41, %v1740_v41  ;;  %1956 = vmatmul.bf16.gmra.mxu3 %v5500_v7  ;;  %v4523_v28 = vor.u32 %v4842_v40, %v4520_v24 }
 0x1fc   : > { %2840 = vst [vmem:[%s5476_s29 + $0x68] sm:$0xff] %v2712_v54  ;;  %v3651_v45 = vadd.f32 %v3650_v60, %v3309_v21  ;;  %v4262_v21 = vld [vmem:[#allocation5 + $0x50] sm:$0xf] }
 0x1fd   : > { %v3615_v34 = vadd.f32 %v3614_v16, %v3316_v12  ;;  %v1828_v6 = vpop.f32.mrf.mxu2  ;;  %2260 = vmatpush.bf16.msra.mxu3 %v4523_v28  ;;  %v4782_v12 = vld [vmem:[#allocation5 + $0x6c] sm:$0xf0] }
 0x1fe   : > { %v1829_v29 = vadd.f32 %v1828_v6, %v5688_v31  ;;  %v1917_v61 = vpop.f32.mrf.mxu3  ;;  %v1652_v25 = vpop.f32.mrf.mxu0  ;;  %v4518_v6 = vld [vmem:[#allocation5 + $0x250] sm:$0xf] }
 0x1ff   : > { %v1653_v42 = vadd.f32 %v1652_v25, %v5681_v63 }
 0x200   : > { %v1741_v57 = vpop.f32.mrf.mxu1  ;;  %v1918_v44 = vadd.f32 %v1917_v61, %v1829_v29  ;;  %v4263_v29 = vor.u32 %v4782_v12, %v4262_v21  ;;  %v4846_v61 = vld [vmem:[#allocation5 + $0x26c] sm:$0xf0] }
 0x201   : > { %v1742_v48 = vadd.f32 %v1741_v57, %v1653_v42 }
 0x202   : > { %v2716_v60 = vpack.c.bf16 %v1918_v44, %v1740_v41  ;;  %v3069_v16 = vadd.f32 %v3068_v46, %v1918_v44  ;;  %v3317_v37 = vmul.f32 %v1918_v44, %v1918_v44  ;;  %v4519_v46 = vor.u32 %v4846_v61, %v4518_v6  ;;  %1993 = vmatpush.bf16.msra.mxu0 %v4263_v29 }
 0x203   : > { %v3033_v35 = vadd.f32 %v3032_v15, %v1742_v48  ;;  %v3324_v22 = vmul.f32 %v1742_v48, %v1742_v48 }
 0x204   : > { %2844 = vst [vmem:[%s5476_s29 + $0x88] sm:$0xff] %v2716_v60  ;;  %v3652_v5 = vadd.f32 %v3651_v45, %v3317_v37  ;;  %2082 = vmatpush.bf16.msra.mxu1 %v4519_v46 }
 0x205   : > { %v3616_v30 = vadd.f32 %v3615_v34, %v3324_v22  ;;  %v1830_v54 = vpop.f32.mrf.mxu2 }
 0x206   : > { %v1831_v50 = vadd.f32 %v1830_v54, %v5688_v31  ;;  %v1919_v49 = vpop.f32.mrf.mxu3  ;;  %v1655_v40 = vpop.f32.mrf.mxu0 }
 0x207   : > { %v1656_v25 = vadd.f32 %v1655_v40, %v5681_v63 }
 0x208   : > { %v1744_v41 = vpop.f32.mrf.mxu1  ;;  %v1920_v15 = vadd.f32 %v1919_v49, %v1831_v50 }
 0x209   : > { %v1745_v19 = vadd.f32 %v1744_v41, %v1656_v25  ;;  %1694 = vmatmul.bf16.gmra.mxu0 %v5515_v4 }
 0x20a   : > { %v2720_v45 = vpack.c.bf16 %v1920_v15, %v1742_v48  ;;  %v3070_v34 = vadd.f32 %v3069_v16, %v1920_v15  ;;  %v3325_v24 = vmul.f32 %v1920_v15, %v1920_v15  ;;  %1872 = vmatmul.bf16.gmra.mxu2 %v5515_v4 }
 0x20b   : > { %1783 = vmatmul.bf16.gmra.mxu1 %v5518_v17  ;;  %v3034_v42 = vadd.f32 %v3033_v35, %v1745_v19  ;;  %v3332_v57 = vmul.f32 %v1745_v19, %v1745_v19  ;;  %1961 = vmatmul.bf16.gmra.mxu3 %v5518_v17 }
 0x20c   : > { %2848 = vst [vmem:[%s5476_s29 + $0xa8] sm:$0xff] %v2720_v45  ;;  %v3653_v28 = vadd.f32 %v3652_v5, %v3325_v24 }
 0x20d   : > { %v3617_v44 = vadd.f32 %v3616_v30, %v3332_v57  ;;  %v1833_v60 = vpop.f32.mrf.mxu2 }
 0x20e   : > { %v1834_v37 = vadd.f32 %v1833_v60, %v5688_v31  ;;  %v1922_v22 = vpop.f32.mrf.mxu3  ;;  %v1657_v54 = vpop.f32.mrf.mxu0 }
 0x20f   : > { %v1658_v48 = vadd.f32 %v1657_v54, %v5681_v63  ;;  %v4232_v54 = vld [vmem:[#allocation5 + $0x30] sm:$0xf0] }
 0x210   : > { %v1746_v16 = vpop.f32.mrf.mxu1  ;;  %v1923_v21 = vadd.f32 %v1922_v22, %v1834_v37  ;;  %v4770_v22 = vld [vmem:[#allocation5 + $0x14] sm:$0xf] }
 0x211   : > { %v1747_v12 = vadd.f32 %v1746_v16, %v1658_v48  ;;  %v4834_v48 = vld [vmem:[#allocation5 + $0x214] sm:$0xf] }
 0x212   : > { %v2724_v6 = vpack.c.bf16 %v1923_v21, %v1745_v19  ;;  %v3071_v50 = vadd.f32 %v3070_v34, %v1923_v21  ;;  %v3333_v35 = vmul.f32 %v1923_v21, %v1923_v21 }
 0x213   : > { %v3035_v49 = vadd.f32 %v3034_v42, %v1747_v12  ;;  %v3340_v40 = vmul.f32 %v1747_v12, %v1747_v12 }
 0x214   : > { %2852 = vst [vmem:[%s5476_s29 + $0xc8] sm:$0xff] %v2724_v6  ;;  %v3654_v29 = vadd.f32 %v3653_v28, %v3333_v35  ;;  %v4235_v6 = vor.u32 %v4770_v22, %v4232_v54 }
 0x215   : > { %v3618_v61 = vadd.f32 %v3617_v44, %v3340_v40  ;;  %v1835_v5 = vpop.f32.mrf.mxu2 }
 0x216   : > { %v1836_v30 = vadd.f32 %v1835_v5, %v5688_v31  ;;  %v1924_v25 = vpop.f32.mrf.mxu3  ;;  %v1660_v41 = vpop.f32.mrf.mxu0  ;;  %2172 = vmatpush.bf16.msra.mxu2 %v4235_v6 }
 0x217   : > { %v1661_v46 = vadd.f32 %v1660_v41, %v5681_v63 }
 0x218   : > { %v1749_v15 = vpop.f32.mrf.mxu1  ;;  %v1925_v45 = vadd.f32 %v1924_v25, %v1836_v30 }
 0x219   : > { %v1750_v24 = vadd.f32 %v1749_v15, %v1661_v46  ;;  %1699 = vmatmul.bf16.gmra.mxu0 %v5533_v11 }
 0x21a   : > { %v2728_v19 = vpack.c.bf16 %v1925_v45, %v1747_v12  ;;  %v3072_v34 = vadd.f32 %v3071_v50, %v1925_v45  ;;  %v3341_v42 = vmul.f32 %v1925_v45, %v1925_v45  ;;  %1877 = vmatmul.bf16.gmra.mxu2 %v5533_v11  ;;  %v4488_v50 = vld [vmem:[#allocation5 + $0x230] sm:$0xf0] }
 0x21b   : > { %1788 = vmatmul.bf16.gmra.mxu1 %v5536_v18  ;;  %v3036_v57 = vadd.f32 %v3035_v49, %v1750_v24  ;;  %v3348_v28 = vmul.f32 %v1750_v24, %v1750_v24  ;;  %1966 = vmatmul.bf16.gmra.mxu3 %v5536_v18  ;;  %v4491_v40 = vor.u32 %v4834_v48, %v4488_v50 }
 0x21c   : > { %2856 = vst [vmem:[%s5476_s29 + $0xe8] sm:$0xff] %v2728_v19  ;;  %v3655_v44 = vadd.f32 %v3654_v29, %v3341_v42  ;;  %v4230_v42 = vld [vmem:[#allocation5 + $0x10] sm:$0xf] }
 0x21d   : > { %v3619_v60 = vadd.f32 %v3618_v61, %v3348_v28  ;;  %v1838_v37 = vpop.f32.mrf.mxu2  ;;  %2261 = vmatpush.bf16.msra.mxu3 %v4491_v40  ;;  %v4774_v28 = vld [vmem:[#allocation5 + $0x2c] sm:$0xf0] }
 0x21e   : > { %v1839_v16 = vadd.f32 %v1838_v37, %v5688_v31  ;;  %v1927_v21 = vpop.f32.mrf.mxu3  ;;  %v1662_v12 = vpop.f32.mrf.mxu0  ;;  %v4486_v37 = vld [vmem:[#allocation5 + $0x210] sm:$0xf] }
 0x21f   : > { %v1663_v35 = vadd.f32 %v1662_v12, %v5681_v63 }
 0x220   : > { %v1751_v49 = vpop.f32.mrf.mxu1  ;;  %v1928_v5 = vadd.f32 %v1927_v21, %v1839_v16  ;;  %v4231_v16 = vor.u32 %v4774_v28, %v4230_v42  ;;  %v4838_v21 = vld [vmem:[#allocation5 + $0x22c] sm:$0xf0] }
 0x221   : > { %v1752_v30 = vadd.f32 %v1751_v49, %v1663_v35 }
 0x222   : > { %v2732_v29 = vpack.c.bf16 %v1928_v5, %v1750_v24  ;;  %v3073_v61 = vadd.f32 %v3072_v34, %v1928_v5  ;;  %v3349_v25 = vmul.f32 %v1928_v5, %v1928_v5  ;;  %v4487_v34 = vor.u32 %v4838_v21, %v4486_v37  ;;  %1994 = vmatpush.bf16.msra.mxu0 %v4231_v16 }
 0x223   : > { %v3037_v41 = vadd.f32 %v3036_v57, %v1752_v30  ;;  %v3356_v46 = vmul.f32 %v1752_v30, %v1752_v30 }
 0x224   : > { %2860 = vst [vmem:[%s5476_s29 + $0x108] sm:$0xff] %v2732_v29  ;;  %v3656_v15 = vadd.f32 %v3655_v44, %v3349_v25  ;;  %2083 = vmatpush.bf16.msra.mxu1 %v4487_v34 }
 0x225   : > { %v3620_v45 = vadd.f32 %v3619_v60, %v3356_v46  ;;  %v1840_v19 = vpop.f32.mrf.mxu2 }
 0x226   : > { %v1841_v22 = vadd.f32 %v1840_v19, %v5688_v31  ;;  %v1929_v54 = vpop.f32.mrf.mxu3  ;;  %v1665_v48 = vpop.f32.mrf.mxu0 }
 0x227   : > { %v1666_v12 = vadd.f32 %v1665_v48, %v5681_v63 }
 0x228   : > { %v1754_v24 = vpop.f32.mrf.mxu1  ;;  %v1930_v57 = vadd.f32 %v1929_v54, %v1841_v22 }
 0x229   : > { %v1755_v6 = vadd.f32 %v1754_v24, %v1666_v12  ;;  %1704 = vmatmul.bf16.gmra.mxu0 %v5551_v20 }
 0x22a   : > { %v2736_v44 = vpack.c.bf16 %v1930_v57, %v1752_v30  ;;  %v3074_v60 = vadd.f32 %v3073_v61, %v1930_v57  ;;  %v3357_v50 = vmul.f32 %v1930_v57, %v1930_v57  ;;  %1882 = vmatmul.bf16.gmra.mxu2 %v5551_v20 }
 0x22b   : > { %1793 = vmatmul.bf16.gmra.mxu1 %v5554_v38  ;;  %v3038_v35 = vadd.f32 %v3037_v41, %v1755_v6  ;;  %v3364_v49 = vmul.f32 %v1755_v6, %v1755_v6  ;;  %1971 = vmatmul.bf16.gmra.mxu3 %v5554_v38 }
 0x22c   : > { %2864 = vst [vmem:[%s5476_s29 + $0x128] sm:$0xff] %v2736_v44  ;;  %v3657_v40 = vadd.f32 %v3656_v15, %v3357_v50 }
 0x22d   : > { %v3621_v5 = vadd.f32 %v3620_v45, %v3364_v49  ;;  %v1843_v29 = vpop.f32.mrf.mxu2 }
 0x22e   : > { %v1844_v25 = vadd.f32 %v1843_v29, %v5688_v31  ;;  %v1932_v46 = vpop.f32.mrf.mxu3  ;;  %v1667_v19 = vpop.f32.mrf.mxu0 }
 0x22f   : > { %v1668_v30 = vadd.f32 %v1667_v19, %v5681_v63  ;;  %v4464_v19 = vld [vmem:[#allocation5 + $0x1f8] sm:$0xf0] }
 0x230   : > { %v1756_v61 = vpop.f32.mrf.mxu1  ;;  %v1933_v42 = vadd.f32 %v1932_v46, %v1844_v25  ;;  %v4827_v46 = vld [vmem:[#allocation5 + $0x1dc] sm:$0xf] }
 0x231   : > { %v1757_v28 = vadd.f32 %v1756_v61, %v1668_v30  ;;  %v4891_v30 = vld [vmem:[#allocation5 + $0x3dc] sm:$0xf] }
 0x232   : > { %v2740_v37 = vpack.c.bf16 %v1933_v42, %v1755_v6  ;;  %v3075_v22 = vadd.f32 %v3074_v60, %v1933_v42  ;;  %v3365_v41 = vmul.f32 %v1933_v42, %v1933_v42 }
 0x233   : > { %v3039_v54 = vadd.f32 %v3038_v35, %v1757_v28  ;;  %v3372_v48 = vmul.f32 %v1757_v28, %v1757_v28 }
 0x234   : > { %2868 = vst [vmem:[%s5476_s29 + $0x148] sm:$0xff] %v2740_v37  ;;  %v3658_v16 = vadd.f32 %v3657_v40, %v3365_v41  ;;  %v4467_v37 = vor.u32 %v4827_v46, %v4464_v19 }
 0x235   : > { %v3622_v21 = vadd.f32 %v3621_v5, %v3372_v48  ;;  %v1845_v15 = vpop.f32.mrf.mxu2 }
 0x236   : > { %v1846_v45 = vadd.f32 %v1845_v15, %v5688_v31  ;;  %v1934_v12 = vpop.f32.mrf.mxu3  ;;  %v1670_v24 = vpop.f32.mrf.mxu0  ;;  %2521 = vmatpush.bf16.msrb.mxu2 %v4467_v37 }
 0x237   : > { %v1671_v34 = vadd.f32 %v1670_v24, %v5681_v63 }
 0x238   : > { %v1759_v57 = vpop.f32.mrf.mxu1  ;;  %v1935_v44 = vadd.f32 %v1934_v12, %v1846_v45 }
 0x239   : > { %v1760_v50 = vadd.f32 %v1759_v57, %v1671_v34  ;;  %1709 = vmatmul.bf16.gmra.mxu0 %v5569_v39 }
 0x23a   : > { %v2744_v6 = vpack.c.bf16 %v1935_v44, %v1757_v28  ;;  %v3076_v60 = vadd.f32 %v3075_v22, %v1935_v44  ;;  %v3373_v35 = vmul.f32 %v1935_v44, %v1935_v44  ;;  %1887 = vmatmul.bf16.gmra.mxu2 %v5569_v39  ;;  %v4720_v22 = vld [vmem:[#allocation5 + $0x3f8] sm:$0xf0] }
 0x23b   : > { %1798 = vmatmul.bf16.gmra.mxu1 %v5572_v36  ;;  %v3040_v49 = vadd.f32 %v3039_v54, %v1760_v50  ;;  %v3380_v40 = vmul.f32 %v1760_v50, %v1760_v50  ;;  %1976 = vmatmul.bf16.gmra.mxu3 %v5572_v36  ;;  %v4723_v48 = vor.u32 %v4891_v30, %v4720_v22 }
 0x23c   : > { %2872 = vst [vmem:[%s5476_s29 + $0x168] sm:$0xff] %v2744_v6  ;;  %v3659_v5 = vadd.f32 %v3658_v16, %v3373_v35  ;;  %v4462_v35 = vld [vmem:[#allocation5 + $0x1d8] sm:$0xf] }
 0x23d   : > { %v3623_v29 = vadd.f32 %v3622_v21, %v3380_v40  ;;  %v1848_v25 = vpop.f32.mrf.mxu2  ;;  %2610 = vmatpush.bf16.msrb.mxu3 %v4723_v48  ;;  %v4831_v40 = vld [vmem:[#allocation5 + $0x1f4] sm:$0xf0] }
 0x23e   : > { %v1849_v61 = vadd.f32 %v1848_v25, %v5688_v31  ;;  %v1937_v42 = vpop.f32.mrf.mxu3  ;;  %v1672_v28 = vpop.f32.mrf.mxu0  ;;  %v4718_v25 = vld [vmem:[#allocation5 + $0x3d8] sm:$0xf] }
 0x23f   : > { %v1673_v41 = vadd.f32 %v1672_v28, %v5681_v63 }
 0x240   : > { %v1761_v54 = vpop.f32.mrf.mxu1  ;;  %v1938_v15 = vadd.f32 %v1937_v42, %v1849_v61  ;;  %v4463_v61 = vor.u32 %v4831_v40, %v4462_v35  ;;  %v4895_v42 = vld [vmem:[#allocation5 + $0x3f4] sm:$0xf0] }
 0x241   : > { %v1762_v45 = vadd.f32 %v1761_v54, %v1673_v41 }
 0x242   : > { %v2748_v16 = vpack.c.bf16 %v1938_v15, %v1760_v50  ;;  %v3077_v21 = vadd.f32 %v3076_v60, %v1938_v15  ;;  %v3381_v12 = vmul.f32 %v1938_v15, %v1938_v15  ;;  %v4719_v60 = vor.u32 %v4895_v42, %v4718_v25  ;;  %2343 = vmatpush.bf16.msrb.mxu0 %v4463_v61 }
 0x243   : > { %v3041_v24 = vadd.f32 %v3040_v49, %v1762_v45  ;;  %v3388_v34 = vmul.f32 %v1762_v45, %v1762_v45 }
 0x244   : > { %2876 = vst [vmem:[%s5476_s29 + $0x188] sm:$0xff] %v2748_v16  ;;  %v3660_v57 = vadd.f32 %v3659_v5, %v3381_v12  ;;  %2432 = vmatpush.bf16.msrb.mxu1 %v4719_v60 }
 0x245   : > { %v3624_v44 = vadd.f32 %v3623_v29, %v3388_v34  ;;  %v1850_v6 = vpop.f32.mrf.mxu2 }
 0x246   : > { %v1851_v46 = vadd.f32 %v1850_v6, %v5688_v31  ;;  %v1939_v19 = vpop.f32.mrf.mxu3  ;;  %v1675_v30 = vpop.f32.mrf.mxu0 }
 0x247   : > { %v1676_v28 = vadd.f32 %v1675_v30, %v5681_v63 }
 0x248   : > { %v1764_v50 = vpop.f32.mrf.mxu1  ;;  %v1940_v49 = vadd.f32 %v1939_v19, %v1851_v46 }
 0x249   : > { %v1765_v37 = vadd.f32 %v1764_v50, %v1676_v28  ;;  %1714 = vmatmul.bf16.gmra.mxu0 %v5587_v51 }
 0x24a   : > { %v2752_v5 = vpack.c.bf16 %v1940_v49, %v1762_v45  ;;  %v3078_v29 = vadd.f32 %v3077_v21, %v1940_v49  ;;  %v3389_v22 = vmul.f32 %v1940_v49, %v1940_v49  ;;  %1892 = vmatmul.bf16.gmra.mxu2 %v5587_v51 }
 0x24b   : > { %1803 = vmatmul.bf16.gmra.mxu1 %v5590_v62  ;;  %v3042_v41 = vadd.f32 %v3041_v24, %v1765_v37  ;;  %v3396_v54 = vmul.f32 %v1765_v37, %v1765_v37  ;;  %1981 = vmatmul.bf16.gmra.mxu3 %v5590_v62 }
 0x24c   : > { %2880 = vst [vmem:[%s5476_s29 + $0x1a8] sm:$0xff] %v2752_v5  ;;  %v3661_v48 = vadd.f32 %v3660_v57, %v3389_v22 }
 0x24d   : > { %v3625_v15 = vadd.f32 %v3624_v44, %v3396_v54  ;;  %v1853_v16 = vpop.f32.mrf.mxu2 }
 0x24e   : > { %v1854_v12 = vadd.f32 %v1853_v16, %v5688_v31  ;;  %v1942_v34 = vpop.f32.mrf.mxu3  ;;  %v1677_v6 = vpop.f32.mrf.mxu0 }
 0x24f   : > { %v1678_v45 = vadd.f32 %v1677_v6, %v5681_v63  ;;  %v4432_v6 = vld [vmem:[#allocation5 + $0x1b8] sm:$0xf0] }
 0x250   : > { %v1766_v21 = vpop.f32.mrf.mxu1  ;;  %v1943_v35 = vadd.f32 %v1942_v34, %v1854_v12  ;;  %v4819_v34 = vld [vmem:[#allocation5 + $0x19c] sm:$0xf] }
 0x251   : > { %v1767_v40 = vadd.f32 %v1766_v21, %v1678_v45  ;;  %v4883_v45 = vld [vmem:[#allocation5 + $0x39c] sm:$0xf] }
 0x252   : > { %v2756_v25 = vpack.c.bf16 %v1943_v35, %v1765_v37  ;;  %v3079_v46 = vadd.f32 %v3078_v29, %v1943_v35  ;;  %v3397_v24 = vmul.f32 %v1943_v35, %v1943_v35 }
 0x253   : > { %v3043_v19 = vadd.f32 %v3042_v41, %v1767_v40  ;;  %v3404_v30 = vmul.f32 %v1767_v40, %v1767_v40 }
 0x254   : > { %2884 = vst [vmem:[%s5476_s29 + $0x1c8] sm:$0xff] %v2756_v25  ;;  %v3662_v61 = vadd.f32 %v3661_v48, %v3397_v24  ;;  %v4435_v25 = vor.u32 %v4819_v34, %v4432_v6 }
 0x255   : > { %v3626_v42 = vadd.f32 %v3625_v15, %v3404_v30  ;;  %v1855_v57 = vpop.f32.mrf.mxu2 }
 0x256   : > { %v1856_v44 = vadd.f32 %v1855_v57, %v5688_v31  ;;  %v1944_v28 = vpop.f32.mrf.mxu3  ;;  %v1680_v50 = vpop.f32.mrf.mxu0  ;;  %2522 = vmatpush.bf16.msrb.mxu2 %v4435_v25 }
 0x257   : > { %v1681_v60 = vadd.f32 %v1680_v50, %v5681_v63 }
 0x258   : > { %v1769_v49 = vpop.f32.mrf.mxu1  ;;  %v1945_v5 = vadd.f32 %v1944_v28, %v1856_v44 }
 0x259   : > { %v1770_v22 = vadd.f32 %v1769_v49, %v1681_v60  ;;  %1995 = vmatmul.bf16.vlgmr.msra.gmra.mxu0 %v5360_v43 }
 0x25a   : > { %v2760_v37 = vpack.c.bf16 %v1945_v5, %v1767_v40  ;;  %v3080_v29 = vadd.f32 %v3079_v46, %v1945_v5  ;;  %v3405_v41 = vmul.f32 %v1945_v5, %v1945_v5  ;;  %2173 = vmatmul.bf16.vlgmr.msra.gmra.mxu2 %v5360_v43  ;;  %v4688_v46 = vld [vmem:[#allocation5 + $0x3b8] sm:$0xf0] }
 0x25b   : > { %2084 = vmatmul.bf16.vlgmr.msra.gmra.mxu1 %v5362_v47  ;;  %v3044_v54 = vadd.f32 %v3043_v19, %v1770_v22  ;;  %v3412_v48 = vmul.f32 %v1770_v22, %v1770_v22  ;;  %2262 = vmatmul.bf16.vlgmr.msra.gmra.mxu3 %v5362_v47  ;;  %v4691_v30 = vor.u32 %v4883_v45, %v4688_v46 }
 0x25c   : > { %2888 = vst [vmem:[%s5476_s29 + $0x1e8] sm:$0xff] %v2760_v37  ;;  %v3663_v15 = vadd.f32 %v3662_v61, %v3405_v41  ;;  %v4430_v41 = vld [vmem:[#allocation5 + $0x198] sm:$0xf] }
 0x25d   : > { %v3627_v16 = vadd.f32 %v3626_v42, %v3412_v48  ;;  %v1858_v12 = vpop.f32.mrf.mxu2  ;;  %2611 = vmatpush.bf16.msrb.mxu3 %v4691_v30  ;;  %v4823_v48 = vld [vmem:[#allocation5 + $0x1b4] sm:$0xf0] }
 0x25e   : > { %v1859_v21 = vadd.f32 %v1858_v12, %v5688_v31  ;;  %v1947_v35 = vpop.f32.mrf.mxu3  ;;  %v1682_v40 = vpop.f32.mrf.mxu0  ;;  %v4686_v12 = vld [vmem:[#allocation5 + $0x398] sm:$0xf] }
 0x25f   : > { %v1683_v24 = vadd.f32 %v1682_v40, %v5681_v63 }
 0x260   : > { %v1771_v19 = vpop.f32.mrf.mxu1  ;;  %v1948_v57 = vadd.f32 %v1947_v35, %v1859_v21  ;;  %v4431_v21 = vor.u32 %v4823_v48, %v4430_v41  ;;  %v4887_v35 = vld [vmem:[#allocation5 + $0x3b4] sm:$0xf0] }
 0x261   : > { %v1772_v44 = vadd.f32 %v1771_v19, %v1683_v24 }
 0x262   : > { %v2764_v61 = vpack.c.bf16 %v1948_v57, %v1770_v22  ;;  %v3081_v42 = vadd.f32 %v3080_v29, %v1948_v57  ;;  %v3413_v28 = vmul.f32 %v1948_v57, %v1948_v57  ;;  %v4687_v29 = vor.u32 %v4887_v35, %v4686_v12  ;;  %2344 = vmatpush.bf16.msrb.mxu0 %v4431_v21 }
 0x263   : > { %v3045_v50 = vadd.f32 %v3044_v54, %v1772_v44  ;;  %v3420_v60 = vmul.f32 %v1772_v44, %v1772_v44 }
 0x264   : > { %2892 = vst [vmem:[%s5476_s29 + $0x208] sm:$0xff] %v2764_v61  ;;  %v3664_v49 = vadd.f32 %v3663_v15, %v3413_v28  ;;  %2433 = vmatpush.bf16.msrb.mxu1 %v4687_v29 }
 0x265   : > { %v3628_v5 = vadd.f32 %v3627_v16, %v3420_v60  ;;  %v1860_v37 = vpop.f32.mrf.mxu2 }
 0x266   : > { %v1861_v34 = vadd.f32 %v1860_v37, %v5688_v31  ;;  %v1949_v6 = vpop.f32.mrf.mxu3  ;;  %v1685_v45 = vpop.f32.mrf.mxu0 }
 0x267   : > { %v1686_v40 = vadd.f32 %v1685_v45, %v5681_v63 }
 0x268   : > { %v1774_v22 = vpop.f32.mrf.mxu1  ;;  %v1950_v54 = vadd.f32 %v1949_v6, %v1861_v34 }
 0x269   : > { %v1775_v25 = vadd.f32 %v1774_v22, %v1686_v40  ;;  %2000 = vmatmul.bf16.gmra.mxu0 %v5372_v2 }
 0x26a   : > { %v2768_v15 = vpack.c.bf16 %v1950_v54, %v1772_v44  ;;  %v3082_v16 = vadd.f32 %v3081_v42, %v1950_v54  ;;  %v3421_v46 = vmul.f32 %v1950_v54, %v1950_v54  ;;  %2178 = vmatmul.bf16.gmra.mxu2 %v5372_v2 }
 0x26b   : > { %2089 = vmatmul.bf16.gmra.mxu1 %v5374_v3  ;;  %v3046_v24 = vadd.f32 %v3045_v50, %v1775_v25  ;;  %v3428_v19 = vmul.f32 %v1775_v25, %v1775_v25  ;;  %2267 = vmatmul.bf16.gmra.mxu3 %v5374_v3 }
 0x26c   : > { %2896 = vst [vmem:[%s5476_s29 + $0x228] sm:$0xff] %v2768_v15  ;;  %v3665_v30 = vadd.f32 %v3664_v49, %v3421_v46 }
 0x26d   : > { %v3629_v57 = vadd.f32 %v3628_v5, %v3428_v19  ;;  %v1863_v61 = vpop.f32.mrf.mxu2 }
 0x26e   : > { %v1864_v28 = vadd.f32 %v1863_v61, %v5688_v31  ;;  %v1952_v60 = vpop.f32.mrf.mxu3  ;;  %v1687_v37 = vpop.f32.mrf.mxu0 }
 0x26f   : > { %v1688_v44 = vadd.f32 %v1687_v37, %v5681_v63  ;;  %v4400_v37 = vld [vmem:[#allocation5 + $0x178] sm:$0xf0] }
 0x270   : > { %v1776_v42 = vpop.f32.mrf.mxu1  ;;  %v1953_v41 = vadd.f32 %v1952_v60, %v1864_v28  ;;  %v4811_v60 = vld [vmem:[#allocation5 + $0x15c] sm:$0xf] }
 0x271   : > { %v1777_v48 = vadd.f32 %v1776_v42, %v1688_v44  ;;  %v4875_v44 = vld [vmem:[#allocation5 + $0x35c] sm:$0xf] }
 0x272   : > { %v2772_v12 = vpack.c.bf16 %v1953_v41, %v1775_v25  ;;  %v3083_v34 = vadd.f32 %v3082_v16, %v1953_v41  ;;  %v3429_v50 = vmul.f32 %v1953_v41, %v1953_v41 }
 0x273   : > { %v3047_v6 = vadd.f32 %v3046_v24, %v1777_v48  ;;  %v3436_v45 = vmul.f32 %v1777_v48, %v1777_v48 }
 0x274   : > { %2900 = vst [vmem:[%s5476_s29 + $0x248] sm:$0xff] %v2772_v12  ;;  %v3666_v21 = vadd.f32 %v3665_v30, %v3429_v50  ;;  %v4403_v12 = vor.u32 %v4811_v60, %v4400_v37 }
 0x275   : > { %v3630_v35 = vadd.f32 %v3629_v57, %v3436_v45  ;;  %v1865_v49 = vpop.f32.mrf.mxu2 }
 0x276   : > { %v1866_v5 = vadd.f32 %v1865_v49, %v5688_v31  ;;  %v1954_v40 = vpop.f32.mrf.mxu3  ;;  %v1690_v22 = vpop.f32.mrf.mxu0  ;;  %2523 = vmatpush.bf16.msrb.mxu2 %v4403_v12 }
 0x277   : > { %v1691_v29 = vadd.f32 %v1690_v22, %v5681_v63 }
 0x278   : > { %v1779_v54 = vpop.f32.mrf.mxu1  ;;  %v1955_v15 = vadd.f32 %v1954_v40, %v1866_v5 }
 0x279   : > { %v1780_v46 = vadd.f32 %v1779_v54, %v1691_v29  ;;  %2005 = vmatmul.bf16.gmra.mxu0 %v5384_v8 }
 0x27a   : > { %v2776_v25 = vpack.c.bf16 %v1955_v15, %v1777_v48  ;;  %v3084_v16 = vadd.f32 %v3083_v34, %v1955_v15  ;;  %v3437_v24 = vmul.f32 %v1955_v15, %v1955_v15  ;;  %2183 = vmatmul.bf16.gmra.mxu2 %v5384_v8  ;;  %v4656_v34 = vld [vmem:[#allocation5 + $0x378] sm:$0xf0] }
 0x27b   : > { %2094 = vmatmul.bf16.gmra.mxu1 %v5386_v9  ;;  %v3048_v19 = vadd.f32 %v3047_v6, %v1780_v46  ;;  %v3444_v30 = vmul.f32 %v1780_v46, %v1780_v46  ;;  %2272 = vmatmul.bf16.gmra.mxu3 %v5386_v9  ;;  %v4659_v45 = vor.u32 %v4875_v44, %v4656_v34 }
 0x27c   : > { %2904 = vst [vmem:[%s5476_s29 + $0x268] sm:$0xff] %v2776_v25  ;;  %v3667_v57 = vadd.f32 %v3666_v21, %v3437_v24  ;;  %v4398_v24 = vld [vmem:[#allocation5 + $0x158] sm:$0xf] }
 0x27d   : > { %v3631_v61 = vadd.f32 %v3630_v35, %v3444_v30  ;;  %v1868_v28 = vpop.f32.mrf.mxu2  ;;  %2612 = vmatpush.bf16.msrb.mxu3 %v4659_v45  ;;  %v4815_v30 = vld [vmem:[#allocation5 + $0x174] sm:$0xf0] }
 0x27e   : > { %v1869_v42 = vadd.f32 %v1868_v28, %v5688_v31  ;;  %v1957_v41 = vpop.f32.mrf.mxu3  ;;  %v1692_v48 = vpop.f32.mrf.mxu0  ;;  %v4654_v28 = vld [vmem:[#allocation5 + $0x358] sm:$0xf] }
 0x27f   : > { %v1693_v50 = vadd.f32 %v1692_v48, %v5681_v63 }
 0x280   : > { %v1781_v6 = vpop.f32.mrf.mxu1  ;;  %v1958_v49 = vadd.f32 %v1957_v41, %v1869_v42  ;;  %v4399_v42 = vor.u32 %v4815_v30, %v4398_v24  ;;  %v4879_v41 = vld [vmem:[#allocation5 + $0x374] sm:$0xf0] }
 0x281   : > { %v1782_v5 = vadd.f32 %v1781_v6, %v1693_v50 }
 0x282   : > { %v2780_v21 = vpack.c.bf16 %v1958_v49, %v1780_v46  ;;  %v3085_v35 = vadd.f32 %v3084_v16, %v1958_v49  ;;  %v3445_v40 = vmul.f32 %v1958_v49, %v1958_v49  ;;  %v4655_v16 = vor.u32 %v4879_v41, %v4654_v28  ;;  %2345 = vmatpush.bf16.msrb.mxu0 %v4399_v42 }
 0x283   : > { %v3049_v22 = vadd.f32 %v3048_v19, %v1782_v5  ;;  %v3452_v29 = vmul.f32 %v1782_v5, %v1782_v5 }
 0x284   : > { %2908 = vst [vmem:[%s5476_s29 + $0x288] sm:$0xff] %v2780_v21  ;;  %v3668_v54 = vadd.f32 %v3667_v57, %v3445_v40  ;;  %2434 = vmatpush.bf16.msrb.mxu1 %v4655_v16 }
 0x285   : > { %v3632_v15 = vadd.f32 %v3631_v61, %v3452_v29  ;;  %v1870_v25 = vpop.f32.mrf.mxu2 }
 0x286   : > { %v1871_v60 = vadd.f32 %v1870_v25, %v5688_v31  ;;  %v1959_v37 = vpop.f32.mrf.mxu3  ;;  %v1695_v44 = vpop.f32.mrf.mxu0 }
 0x287   : > { %v1696_v48 = vadd.f32 %v1695_v44, %v5681_v63 }
 0x288   : > { %v1784_v46 = vpop.f32.mrf.mxu1  ;;  %v1960_v19 = vadd.f32 %v1959_v37, %v1871_v60 }
 0x289   : > { %v1785_v12 = vadd.f32 %v1784_v46, %v1696_v48  ;;  %2010 = vmatmul.bf16.gmra.mxu0 %v5396_v26 }
 0x28a   : > { %v2784_v57 = vpack.c.bf16 %v1960_v19, %v1782_v5  ;;  %v3086_v61 = vadd.f32 %v3085_v35, %v1960_v19  ;;  %v3453_v34 = vmul.f32 %v1960_v19, %v1960_v19  ;;  %2188 = vmatmul.bf16.gmra.mxu2 %v5396_v26 }
 0x28b   : > { %2099 = vmatmul.bf16.gmra.mxu1 %v5398_v27  ;;  %v3050_v50 = vadd.f32 %v3049_v22, %v1785_v12  ;;  %v3460_v6 = vmul.f32 %v1785_v12, %v1785_v12  ;;  %2277 = vmatmul.bf16.gmra.mxu3 %v5398_v27 }
 0x28c   : > { %2912 = vst [vmem:[%s5476_s29 + $0x2a8] sm:$0xff] %v2784_v57  ;;  %v3669_v45 = vadd.f32 %v3668_v54, %v3453_v34 }
 0x28d   : > { %v3633_v49 = vadd.f32 %v3632_v15, %v3460_v6  ;;  %v1873_v21 = vpop.f32.mrf.mxu2 }
 0x28e   : > { %v1874_v40 = vadd.f32 %v1873_v21, %v5688_v31  ;;  %v1962_v29 = vpop.f32.mrf.mxu3  ;;  %v1697_v25 = vpop.f32.mrf.mxu0 }
 0x28f   : > { %v1698_v5 = vadd.f32 %v1697_v25, %v5681_v63  ;;  %v4368_v25 = vld [vmem:[#allocation5 + $0x138] sm:$0xf0] }
 0x290   : > { %v1786_v35 = vpop.f32.mrf.mxu1  ;;  %v1963_v24 = vadd.f32 %v1962_v29, %v1874_v40  ;;  %v4803_v29 = vld [vmem:[#allocation5 + $0x11c] sm:$0xf] }
 0x291   : > { %v1787_v30 = vadd.f32 %v1786_v35, %v1698_v5  ;;  %v4867_v5 = vld [vmem:[#allocation5 + $0x31c] sm:$0xf] }
 0x292   : > { %v2788_v28 = vpack.c.bf16 %v1963_v24, %v1785_v12  ;;  %v3087_v60 = vadd.f32 %v3086_v61, %v1963_v24  ;;  %v3461_v22 = vmul.f32 %v1963_v24, %v1963_v24 }
 0x293   : > { %v3051_v37 = vadd.f32 %v3050_v50, %v1787_v30  ;;  %v3468_v44 = vmul.f32 %v1787_v30, %v1787_v30 }
 0x294   : > { %2916 = vst [vmem:[%s5476_s29 + $0x2c8] sm:$0xff] %v2788_v28  ;;  %v3670_v42 = vadd.f32 %v3669_v45, %v3461_v22  ;;  %v4371_v28 = vor.u32 %v4803_v29, %v4368_v25 }
 0x295   : > { %v3634_v41 = vadd.f32 %v3633_v49, %v3468_v44  ;;  %v1875_v54 = vpop.f32.mrf.mxu2 }
 0x296   : > { %v1876_v15 = vadd.f32 %v1875_v54, %v5688_v31  ;;  %v1964_v48 = vpop.f32.mrf.mxu3  ;;  %v1700_v46 = vpop.f32.mrf.mxu0  ;;  %2524 = vmatpush.bf16.msrb.mxu2 %v4371_v28 }
 0x297   : > { %v1701_v16 = vadd.f32 %v1700_v46, %v5681_v63 }
 0x298   : > { %v1789_v19 = vpop.f32.mrf.mxu1  ;;  %v1965_v57 = vadd.f32 %v1964_v48, %v1876_v15 }
 0x299   : > { %v1790_v34 = vadd.f32 %v1789_v19, %v1701_v16  ;;  %2015 = vmatmul.bf16.gmra.mxu0 %v5408_v32 }
 0x29a   : > { %v2792_v12 = vpack.c.bf16 %v1965_v57, %v1787_v30  ;;  %v3088_v61 = vadd.f32 %v3087_v60, %v1965_v57  ;;  %v3469_v50 = vmul.f32 %v1965_v57, %v1965_v57  ;;  %2193 = vmatmul.bf16.gmra.mxu2 %v5408_v32  ;;  %v4624_v60 = vld [vmem:[#allocation5 + $0x338] sm:$0xf0] }
 0x29b   : > { %2104 = vmatmul.bf16.gmra.mxu1 %v5410_v33  ;;  %v3052_v6 = vadd.f32 %v3051_v37, %v1790_v34  ;;  %v3476_v45 = vmul.f32 %v1790_v34, %v1790_v34  ;;  %2282 = vmatmul.bf16.gmra.mxu3 %v5410_v33  ;;  %v4627_v44 = vor.u32 %v4867_v5, %v4624_v60 }
 0x29c   : > { %2920 = vst [vmem:[%s5476_s29 + $0x2e8] sm:$0xff] %v2792_v12  ;;  %v3671_v49 = vadd.f32 %v3670_v42, %v3469_v50  ;;  %v4366_v50 = vld [vmem:[#allocation5 + $0x118] sm:$0xf] }
 0x29d   : > { %v3635_v21 = vadd.f32 %v3634_v41, %v3476_v45  ;;  %v1878_v40 = vpop.f32.mrf.mxu2  ;;  %2613 = vmatpush.bf16.msrb.mxu3 %v4627_v44  ;;  %v4807_v45 = vld [vmem:[#allocation5 + $0x134] sm:$0xf0] }
 0x29e   : > { %v1879_v35 = vadd.f32 %v1878_v40, %v5688_v31  ;;  %v1967_v24 = vpop.f32.mrf.mxu3  ;;  %v1702_v30 = vpop.f32.mrf.mxu0  ;;  %v4622_v40 = vld [vmem:[#allocation5 + $0x318] sm:$0xf] }
 0x29f   : > { %v1703_v22 = vadd.f32 %v1702_v30, %v5681_v63 }
 0x2a0   : > { %v1791_v37 = vpop.f32.mrf.mxu1  ;;  %v1968_v54 = vadd.f32 %v1967_v24, %v1879_v35  ;;  %v4367_v35 = vor.u32 %v4807_v45, %v4366_v50  ;;  %v4871_v24 = vld [vmem:[#allocation5 + $0x334] sm:$0xf0] }
 0x2a1   : > { %v1792_v15 = vadd.f32 %v1791_v37, %v1703_v22 }
 0x2a2   : > { %v2796_v42 = vpack.c.bf16 %v1968_v54, %v1790_v34  ;;  %v3089_v41 = vadd.f32 %v3088_v61, %v1968_v54  ;;  %v3477_v48 = vmul.f32 %v1968_v54, %v1968_v54  ;;  %v4623_v61 = vor.u32 %v4871_v24, %v4622_v40  ;;  %2346 = vmatpush.bf16.msrb.mxu0 %v4367_v35 }
 0x2a3   : > { %v3053_v46 = vadd.f32 %v3052_v6, %v1792_v15  ;;  %v3484_v16 = vmul.f32 %v1792_v15, %v1792_v15 }
 0x2a4   : > { %2924 = vst [vmem:[%s5476_s29 + $0x308] sm:$0xff] %v2796_v42  ;;  %v3672_v19 = vadd.f32 %v3671_v49, %v3477_v48  ;;  %2435 = vmatpush.bf16.msrb.mxu1 %v4623_v61 }
 0x2a5   : > { %v3636_v57 = vadd.f32 %v3635_v21, %v3484_v16  ;;  %v1880_v12 = vpop.f32.mrf.mxu2 }
 0x2a6   : > { %v1881_v29 = vadd.f32 %v1880_v12, %v5688_v31  ;;  %v1969_v25 = vpop.f32.mrf.mxu3  ;;  %v1705_v5 = vpop.f32.mrf.mxu0 }
 0x2a7   : > { %v1706_v30 = vadd.f32 %v1705_v5, %v5681_v63 }
 0x2a8   : > { %v1794_v34 = vpop.f32.mrf.mxu1  ;;  %v1970_v6 = vadd.f32 %v1969_v25, %v1881_v29 }
 0x2a9   : > { %v1795_v28 = vadd.f32 %v1794_v34, %v1706_v30  ;;  %2020 = vmatmul.bf16.gmra.mxu0 %v5420_v52 }
 0x2aa   : > { %v2800_v49 = vpack.c.bf16 %v1970_v6, %v1792_v15  ;;  %v3090_v21 = vadd.f32 %v3089_v41, %v1970_v6  ;;  %v3485_v60 = vmul.f32 %v1970_v6, %v1970_v6  ;;  %2198 = vmatmul.bf16.gmra.mxu2 %v5420_v52 }
 0x2ab   : > { %2109 = vmatmul.bf16.gmra.mxu1 %v5422_v53  ;;  %v3054_v22 = vadd.f32 %v3053_v46, %v1795_v28  ;;  %v3492_v37 = vmul.f32 %v1795_v28, %v1795_v28  ;;  %2287 = vmatmul.bf16.gmra.mxu3 %v5422_v53 }
 0x2ac   : > { %2928 = vst [vmem:[%s5476_s29 + $0x328] sm:$0xff] %v2800_v49  ;;  %v3673_v44 = vadd.f32 %v3672_v19, %v3485_v60 }
 0x2ad   : > { %v3637_v54 = vadd.f32 %v3636_v57, %v3492_v37  ;;  %v1883_v42 = vpop.f32.mrf.mxu2 }
 0x2ae   : > { %v1884_v48 = vadd.f32 %v1883_v42, %v5688_v31  ;;  %v1972_v16 = vpop.f32.mrf.mxu3  ;;  %v1707_v12 = vpop.f32.mrf.mxu0 }
 0x2af   : > { %v1708_v15 = vadd.f32 %v1707_v12, %v5681_v63 }
 0x2b0   : > { %v1796_v41 = vpop.f32.mrf.mxu1  ;;  %v1973_v50 = vadd.f32 %v1972_v16, %v1884_v48 }
 0x2b1   : > { %v1797_v45 = vadd.f32 %v1796_v41, %v1708_v15 }
 0x2b2   : > { %v2804_v40 = vpack.c.bf16 %v1973_v50, %v1795_v28  ;;  %v3091_v29 = vadd.f32 %v3090_v21, %v1973_v50  ;;  %v3493_v46 = vmul.f32 %v1973_v50, %v1973_v50 }
 0x2b3   : > { %v3055_v25 = vadd.f32 %v3054_v22, %v1797_v45  ;;  %v3500_v5 = vmul.f32 %v1797_v45, %v1797_v45 }
 0x2b4   : > { %2932 = vst [vmem:[%s5476_s29 + $0x348] sm:$0xff] %v2804_v40  ;;  %v3674_v35 = vadd.f32 %v3673_v44, %v3493_v46 }
 0x2b5   : > { %v3638_v24 = vadd.f32 %v3637_v54, %v3500_v5  ;;  %v1885_v19 = vpop.f32.mrf.mxu2 }
 0x2b6   : > { %v1886_v57 = vadd.f32 %v1885_v19, %v5688_v31  ;;  %v1974_v30 = vpop.f32.mrf.mxu3  ;;  %v1710_v34 = vpop.f32.mrf.mxu0 }
 0x2b7   : > { %v1711_v61 = vadd.f32 %v1710_v34, %v5681_v63 }
 0x2b8   : > { %v1799_v6 = vpop.f32.mrf.mxu1  ;;  %v1975_v49 = vadd.f32 %v1974_v30, %v1886_v57 }
 0x2b9   : > { %v1800_v60 = vadd.f32 %v1799_v6, %v1711_v61  ;;  %2025 = vmatmul.bf16.gmra.mxu0 %v5432_v58 }
 0x2ba   : > { %v2808_v28 = vpack.c.bf16 %v1975_v49, %v1797_v45  ;;  %v3092_v21 = vadd.f32 %v3091_v29, %v1975_v49  ;;  %v3501_v22 = vmul.f32 %v1975_v49, %v1975_v49  ;;  %2203 = vmatmul.bf16.gmra.mxu2 %v5432_v58 }
 0x2bb   : > { %2114 = vmatmul.bf16.gmra.mxu1 %v5434_v59  ;;  %v3056_v37 = vadd.f32 %v3055_v25, %v1800_v60  ;;  %v3508_v44 = vmul.f32 %v1800_v60, %v1800_v60  ;;  %2292 = vmatmul.bf16.gmra.mxu3 %v5434_v59 }
 0x2bc   : > { %2936 = vst [vmem:[%s5476_s29 + $0x368] sm:$0xff] %v2808_v28  ;;  %v3675_v54 = vadd.f32 %v3674_v35, %v3501_v22 }
 0x2bd   : > { %v3639_v42 = vadd.f32 %v3638_v24, %v3508_v44  ;;  %v1888_v48 = vpop.f32.mrf.mxu2  ;;  %v4795_v44 = vld [vmem:[#allocation5 + $0xdc] sm:$0xf] }
 0x2be   : > { %v1889_v16 = vadd.f32 %v1888_v48, %v5688_v31  ;;  %v1977_v12 = vpop.f32.mrf.mxu3  ;;  %v1712_v15 = vpop.f32.mrf.mxu0 }
 0x2bf   : > { %v1713_v41 = vadd.f32 %v1712_v15, %v5681_v63  ;;  %v4592_v15 = vld [vmem:[#allocation5 + $0x2f8] sm:$0xf0] }
 0x2c0   : > { %v1801_v50 = vpop.f32.mrf.mxu1  ;;  %v1978_v45 = vadd.f32 %v1977_v12, %v1889_v16 }
 0x2c1   : > { %v1802_v40 = vadd.f32 %v1801_v50, %v1713_v41  ;;  %v4334_v41 = vld [vmem:[#allocation5 + $0xd8] sm:$0xf] }
 0x2c2   : > { %v2812_v29 = vpack.c.bf16 %v1978_v45, %v1800_v60  ;;  %v3093_v46 = vadd.f32 %v3092_v21, %v1978_v45  ;;  %v3509_v25 = vmul.f32 %v1978_v45, %v1978_v45  ;;  %v4799_v50 = vld [vmem:[#allocation5 + $0xf4] sm:$0xf0] }
 0x2c3   : > { %v3057_v5 = vadd.f32 %v3056_v37, %v1802_v40  ;;  %v3516_v19 = vmul.f32 %v1802_v40, %v1802_v40 }
 0x2c4   : > { %2940 = vst [vmem:[%s5476_s29 + $0x388] sm:$0xff] %v2812_v29  ;;  %v3676_v57 = vadd.f32 %v3675_v54, %v3509_v25  ;;  %v4336_v54 = vld [vmem:[#allocation5 + $0xf8] sm:$0xf0]  ;;  %v4335_v29 = vor.u32 %v4799_v50, %v4334_v41  ;;  %v4863_v25 = vld [vmem:[#allocation5 + $0x2f4] sm:$0xf0]  ;;  %v4982_v41 = vld [vmem:[#allocation7] sm:$0xff] }
 0x2c5   : > { %v3640_v30 = vadd.f32 %v3639_v42, %v3516_v19  ;;  %v1890_v35 = vpop.f32.mrf.mxu2  ;;  %v4859_v42 = vld [vmem:[#allocation5 + $0x2dc] sm:$0xf]  ;;  %v4339_v12 = vor.u32 %v4795_v44, %v4336_v54  ;;  %v5851_v50 = vperm.slane %v4982_v41, 4 }
 0x2c6   : > { %v1891_v24 = vadd.f32 %v1890_v35, %v5688_v31  ;;  %v1979_v34 = vpop.f32.mrf.mxu3  ;;  %v1715_v61 = vpop.f32.mrf.mxu0  ;;  %2347 = vmatpush.bf16.msrb.mxu0 %v4335_v29 }
 0x2c7   : > { %v1716_v6 = vadd.f32 %v1715_v61, %v5681_v63  ;;  %2525 = vmatpush.bf16.msrb.mxu2 %v4339_v12 }
 0x2c8   : > { %v1804_v49 = vpop.f32.mrf.mxu1  ;;  %v1980_v28 = vadd.f32 %v1979_v34, %v1891_v24 }
 0x2c9   : > { %v1805_v22 = vadd.f32 %v1804_v49, %v1716_v6  ;;  %2030 = vmatmul.bf16.gmra.mxu0 %v5444_v10 }
 0x2ca   : > { %v2816_v60 = vpack.c.bf16 %v1980_v28, %v1802_v40  ;;  %v3094_v21 = vadd.f32 %v3093_v46, %v1980_v28  ;;  %v3517_v37 = vmul.f32 %v1980_v28, %v1980_v28  ;;  %2208 = vmatmul.bf16.gmra.mxu2 %v5444_v10  ;;  %v4595_v40 = vor.u32 %v4859_v42, %v4592_v15  ;;  %v4590_v46 = vld [vmem:[#allocation5 + $0x2d8] sm:$0xf] }
 0x2cb   : > { %2119 = vmatmul.bf16.gmra.mxu1 %v5446_v14  ;;  %v3058_v48 = vadd.f32 %v3057_v5, %v1805_v22  ;;  %v3524_v16 = vmul.f32 %v1805_v22, %v1805_v22  ;;  %2297 = vmatmul.bf16.gmra.mxu3 %v5446_v14  ;;  %v4591_v24 = vor.u32 %v4863_v25, %v4590_v46 }
 0x2cc   : > { %2944 = vst [vmem:[%s5476_s29 + $0x3a8] sm:$0xff] %v2816_v60  ;;  %v3677_v45 = vadd.f32 %v3676_v57, %v3517_v37  ;;  %2614 = vmatpush.bf16.msrb.mxu3 %v4595_v40 }
 0x2cd   : > { %v3641_v19 = vadd.f32 %v3640_v30, %v3524_v16  ;;  %v1893_v35 = vpop.f32.mrf.mxu2  ;;  %2436 = vmatpush.bf16.msrb.mxu1 %v4591_v24 }
 0x2ce   : > { %v1894_v5 = vadd.f32 %v1893_v35, %v5688_v31  ;;  %v1982_v34 = vpop.f32.mrf.mxu3  ;;  %v1717_v61 = vpop.f32.mrf.mxu0 }
 0x2cf   : > { %v1718_v6 = vadd.f32 %v1717_v61, %v5681_v63 }
 0x2d0   : > { %v1806_v49 = vpop.f32.mrf.mxu1  ;;  %v1983_v57 = vadd.f32 %v1982_v34, %v1894_v5  ;;  %v6347_v34 = vld [vmem:[#allocation18_spill] sm:$0xff] }
 0x2d1   : > { %v1807_v28 = vadd.f32 %v1806_v49, %v1718_v6 }
 0x2d2   : > { %v2820_v60 = vpack.c.bf16 %v1983_v57, %v1805_v22  ;;  %v3095_v37 = vadd.f32 %v3094_v21, %v1983_v57  ;;  %v3525_v44 = vmul.f32 %v1983_v57, %v1983_v57 }
 0x2d3   : > { %v3059_v30 = vadd.f32 %v3058_v48, %v1807_v28  ;;  %v3532_v54 = vmul.f32 %v1807_v28, %v1807_v28 }
 0x2d4   : > { %2948 = vst [vmem:[%s5476_s29 + $0x3c8] sm:$0xff] %v2820_v60  ;;  %v3678_v42 = vadd.f32 %v3677_v45, %v3525_v44 }
 0x2d5   : > { %v3060_v16 = vrot.slane %v3059_v30, 4  ;;  %v3642_v12 = vadd.f32 %v3641_v19, %v3532_v54  ;;  %v1895_v15 = vpop.f32.mrf.mxu2  ;;  %v4787_v54 = vld [vmem:[#allocation5 + $0x9c] sm:$0xf] }
 0x2d6   : > { %v1896_v40 = vadd.f32 %v1895_v15, %v5688_v31  ;;  %v1984_v63 = vpop.f32.mrf.mxu3  ;;  %v1996_v29 = vpop.f32.mrf.mxu0  ;;  %v5858_v31 = vperm.slane %v4982_v41, 5 }
 0x2d7   : > { %v3061_v46 = vadd.f32 %v3060_v16, %v3059_v30  ;;  %v3643_v25 = vrot.slane %v3642_v12, 4  ;;  %v1997_v24 = vadd.f32 %v1996_v29, %v5851_v50  ;;  %v4560_v29 = vld [vmem:[#allocation5 + $0x2b8] sm:$0xf0] }
 0x2d8   : > { %v2085_v22 = vpop.f32.mrf.mxu1  ;;  %v1985_v21 = vadd.f32 %v1984_v63, %v1896_v40  ;;  %v4851_v63 = vld [vmem:[#allocation5 + $0x29c] sm:$0xf] }
 0x2d9   : > { %v3062_v35 = vrot.slane %v3061_v46, 2  ;;  %v3644_v48 = vadd.f32 %v3643_v25, %v3642_v12  ;;  %2035 = vmatmul.bf16.gmra.mxu0 %v5456_v23  ;;  %v2086_v44 = vadd.f32 %v2085_v22, %v1997_v24 }
 0x2da   : > { %v2824_v45 = vpack.c.bf16 %v1985_v21, %v1807_v28  ;;  %v3096_v19 = vadd.f32 %v3095_v37, %v1985_v21  ;;  %v3533_v5 = vmul.f32 %v1985_v21, %v1985_v21  ;;  %2213 = vmatmul.bf16.gmra.mxu2 %v5456_v23  ;;  %v4304_v28 = vld [vmem:[#allocation5 + $0xb8] sm:$0xf0] }
 0x2db   : > { %2124 = vmatmul.bf16.gmra.mxu1 %v6347_v34  ;;  %v3645_v61 = vrot.slane %v3644_v48, 2  ;;  %2302 = vmatmul.bf16.gmra.mxu3 %v6347_v34  ;;  %v3063_v57 = vadd.f32 %v3062_v35, %v3061_v46  ;;  %v4307_v41 = vor.u32 %v4787_v54, %v4304_v28 }
 0x2dc   : > { %2952 = vst [vmem:[%s5476_s29 + $0x3e8] sm:$0xff] %v2824_v45  ;;  %v3097_v6 = vrot.slane %v3096_v19, 4  ;;  %v3679_v49 = vadd.f32 %v3678_v42, %v3533_v5  ;;  %v4563_v45 = vor.u32 %v4851_v63, %v4560_v29 }
 0x2dd   : > { %v3646_v60 = vadd.f32 %v3645_v61, %v3644_v48  ;;  %v2174_v30 = vpop.f32.mrf.mxu2  ;;  %2526 = vmatpush.bf16.msrb.mxu2 %v4307_v41  ;;  %v3064_v35 = vrot.slane %v3063_v57, 1 }
 0x2de   : > { %v3098_v37 = vadd.f32 %v3097_v6, %v3096_v19  ;;  %v3680_v16 = vrot.slane %v3679_v49, 4  ;;  %v2175_v12 = vadd.f32 %v2174_v30, %v5858_v31  ;;  %v2263_v15 = vpop.f32.mrf.mxu3  ;;  %v1998_v40 = vpop.f32.mrf.mxu0  ;;  %2615 = vmatpush.bf16.msrb.mxu3 %v4563_v45  ;;  %v3286_v6 = vmul.f32 %v2086_v44, %v2086_v44 }
 0x2df   : > { %v1999_v25 = vadd.f32 %v1998_v40, %v5851_v50  ;;  %v3647_v48 = vrot.slane %v3646_v60, 1  ;;  %v3065_v40 = vadd.f32 %v3064_v35, %v3063_v57 }
 0x2e0   : > { %v2087_v21 = vpop.f32.mrf.mxu1  ;;  %v3099_v42 = vrot.slane %v3098_v37, 2  ;;  %v3681_v46 = vadd.f32 %v3680_v16, %v3679_v49  ;;  %v2264_v22 = vadd.f32 %v2263_v15, %v2175_v12  ;;  %v4302_v49 = vld [vmem:[#allocation5 + $0x98] sm:$0xf] }
 0x2e1   : > { %v2088_v24 = vadd.f32 %v2087_v21, %v1999_v25  ;;  %v3648_v63 = vadd.f32 %v3647_v48, %v3646_v60  ;;  %v4791_v16 = vld [vmem:[#allocation5 + $0xb4] sm:$0xf0]  ;;  %v3260_v48 = vrot.slane %v3065_v40, 6 }
 0x2e2   : > { %v3100_v19 = vadd.f32 %v3099_v42, %v3098_v37  ;;  %v3682_v5 = vrot.slane %v3681_v46, 2  ;;  %v2701_v61 = vpack.c.bf16 %v2264_v22, %v2086_v44  ;;  %v4558_v12 = vld [vmem:[#allocation5 + $0x298] sm:$0xf]  ;;  %v4303_v45 = vor.u32 %v4791_v16, %v4302_v49 }
 0x2e3   : > { %v3103_v30 = vadd.f32 %v2088_v24, %v2086_v44  ;;  %v3294_v54 = vmul.f32 %v2088_v24, %v2088_v24  ;;  %v4855_v42 = vld [vmem:[#allocation5 + $0x2b4] sm:$0xf0] }
 0x2e4   : > { %v3101_v28 = vrot.slane %v3100_v19, 1  ;;  %v3683_v34 = vadd.f32 %v3682_v5, %v3681_v46  ;;  %2829 = vst [vmem:[%s5476_s29 + $0x10] sm:$0xff] %v2701_v61  ;;  %v4559_v46 = vor.u32 %v4855_v42, %v4558_v12  ;;  %2348 = vmatpush.bf16.msrb.mxu0 %v4303_v45  ;;  %v3287_v5 = vmul.f32 %v2264_v22, %v2264_v22 }
 0x2e5   : > { %v3686_v29 = vadd.f32 %v3294_v54, %v3286_v6  ;;  %v2176_v23 = vpop.f32.mrf.mxu2 }
 0x2e6   : > { %v3102_v15 = vadd.f32 %v3101_v28, %v3100_v19  ;;  %v3684_v41 = vrot.slane %v3683_v34, 1  ;;  %v2177_v25 = vadd.f32 %v2176_v23, %v5858_v31  ;;  %v2265_v37 = vpop.f32.mrf.mxu3  ;;  %v2001_v21 = vpop.f32.mrf.mxu0  ;;  %v3843_v19 = vrot.slane %v3648_v63, 6  ;;  %2437 = vmatpush.bf16.msrb.mxu1 %v4559_v46 }
 0x2e7   : > { %v2002_v44 = vadd.f32 %v2001_v21, %v5851_v50 }
 0x2e8   : > { %v2090_v14 = vpop.f32.mrf.mxu1  ;;  %v3261_v57 = vrot.slane %v3102_v15, 5  ;;  %v3685_v60 = vadd.f32 %v3684_v41, %v3683_v34  ;;  %v2266_v35 = vadd.f32 %v2265_v37, %v2177_v25 }
 0x2e9   : > { %v2091_v61 = vadd.f32 %v2090_v14, %v2002_v44  ;;  %2040 = vmatmul.bf16.gmra.mxu0 %v5479_v1 }
 0x2ea   : > { %v3844_v23 = vrot.slane %v3685_v60, 5  ;;  %v2705_v6 = vpack.c.bf16 %v2266_v35, %v2088_v24  ;;  %v3140_v54 = vadd.f32 %v2266_v35, %v2264_v22  ;;  %v3295_v28 = vmul.f32 %v2266_v35, %v2266_v35  ;;  %2218 = vmatmul.bf16.gmra.mxu2 %v5479_v1 }
 0x2eb   : > { %2129 = vmatmul.bf16.gmra.mxu1 %v5482_v13  ;;  %v3104_v34 = vadd.f32 %v3103_v30, %v2091_v61  ;;  %v3302_v49 = vmul.f32 %v2091_v61, %v2091_v61  ;;  %2307 = vmatmul.bf16.gmra.mxu3 %v5482_v13  ;;  %v3269_v40 = vsel %vm3268_vm1, %v3260_v48, %v3261_v57 }
 0x2ec   : > { %2833 = vst [vmem:[%s5476_s29 + $0x30] sm:$0xff] %v2705_v6  ;;  %v3723_v63 = vadd.f32 %v3295_v28, %v3287_v5  ;;  %v5875_v14 = vsel %vm3270_vm2, %v5702_v56, %v3269_v40  ;;  %v3850_v24 = vsel %vm3268_vm1, %v3843_v19, %v3844_v23 }
 0x2ed   : > { %v3687_v22 = vadd.f32 %v3686_v29, %v3302_v49  ;;  %v2179_v16 = vpop.f32.mrf.mxu2  ;;  %v5880_v12 = vsel %vm3270_vm2, %v5706_v55, %v3850_v24 }
 0x2ee   : > { %v2180_v30 = vadd.f32 %v2179_v16, %v5858_v31  ;;  %v2268_v15 = vpop.f32.mrf.mxu3  ;;  %v2003_v41 = vpop.f32.mrf.mxu0  ;;  %v4779_v16 = vld [vmem:[#allocation5 + $0x5c] sm:$0xf] }
 0x2ef   : > { %v2004_v25 = vadd.f32 %v2003_v41, %v5851_v50 }
 0x2f0   : > { %v2092_v37 = vpop.f32.mrf.mxu1  ;;  %v2269_v21 = vadd.f32 %v2268_v15, %v2180_v30  ;;  %v4272_v30 = vld [vmem:[#allocation5 + $0x78] sm:$0xf0] }
 0x2f1   : > { %v2093_v45 = vadd.f32 %v2092_v37, %v2004_v25  ;;  %v4843_v15 = vld [vmem:[#allocation5 + $0x25c] sm:$0xf] }
 0x2f2   : > { %v2709_v56 = vpack.c.bf16 %v2269_v21, %v2091_v61  ;;  %v3141_v42 = vadd.f32 %v3140_v54, %v2269_v21  ;;  %v3303_v44 = vmul.f32 %v2269_v21, %v2269_v21  ;;  %v4275_v21 = vor.u32 %v4779_v16, %v4272_v30 }
 0x2f3   : > { %v3105_v46 = vadd.f32 %v3104_v34, %v2093_v45  ;;  %v3310_v57 = vmul.f32 %v2093_v45, %v2093_v45 }
 0x2f4   : > { %2837 = vst [vmem:[%s5476_s29 + $0x50] sm:$0xff] %v2709_v56  ;;  %v3724_v29 = vadd.f32 %v3723_v63, %v3303_v44  ;;  %2527 = vmatpush.bf16.msrb.mxu2 %v4275_v21 }
 0x2f5   : > { %v3688_v60 = vadd.f32 %v3687_v22, %v3310_v57  ;;  %v2181_v35 = vpop.f32.mrf.mxu2 }
 0x2f6   : > { %v2182_v55 = vadd.f32 %v2181_v35, %v5858_v31  ;;  %v2270_v48 = vpop.f32.mrf.mxu3  ;;  %v2006_v19 = vpop.f32.mrf.mxu0 }
 0x2f7   : > { %v2007_v5 = vadd.f32 %v2006_v19, %v5851_v50 }
 0x2f8   : > { %v2095_v23 = vpop.f32.mrf.mxu1  ;;  %v2271_v6 = vadd.f32 %v2270_v48, %v2182_v55 }
 0x2f9   : > { %v2096_v28 = vadd.f32 %v2095_v23, %v2007_v5  ;;  %2045 = vmatmul.bf16.gmra.mxu0 %v5497_v0 }
 0x2fa   : > { %v2713_v61 = vpack.c.bf16 %v2271_v6, %v2093_v45  ;;  %v3142_v54 = vadd.f32 %v3141_v42, %v2271_v6  ;;  %v3311_v34 = vmul.f32 %v2271_v6, %v2271_v6  ;;  %2223 = vmatmul.bf16.gmra.mxu2 %v5497_v0  ;;  %v4528_v45 = vld [vmem:[#allocation5 + $0x278] sm:$0xf0]  ;;  %v4270_v6 = vld [vmem:[#allocation5 + $0x58] sm:$0xf] }
 0x2fb   : > { %2134 = vmatmul.bf16.gmra.mxu1 %v5500_v7  ;;  %v3106_v49 = vadd.f32 %v3105_v46, %v2096_v28  ;;  %v3318_v40 = vmul.f32 %v2096_v28, %v2096_v28  ;;  %2312 = vmatmul.bf16.gmra.mxu3 %v5500_v7  ;;  %v4531_v44 = vor.u32 %v4843_v15, %v4528_v45  ;;  %v4847_v15 = vld [vmem:[#allocation5 + $0x274] sm:$0xf0] }
 0x2fc   : > { %2841 = vst [vmem:[%s5476_s29 + $0x70] sm:$0xff] %v2713_v61  ;;  %v3725_v63 = vadd.f32 %v3724_v29, %v3311_v34  ;;  %v4783_v61 = vld [vmem:[#allocation5 + $0x74] sm:$0xf0] }
 0x2fd   : > { %v3689_v24 = vadd.f32 %v3688_v60, %v3318_v40  ;;  %v2184_v22 = vpop.f32.mrf.mxu2  ;;  %2616 = vmatpush.bf16.msrb.mxu3 %v4531_v44  ;;  %v4526_v34 = vld [vmem:[#allocation5 + $0x258] sm:$0xf]  ;;  %v4271_v30 = vor.u32 %v4783_v61, %v4270_v6 }
 0x2fe   : > { %v2185_v41 = vadd.f32 %v2184_v22, %v5858_v31  ;;  %v2273_v25 = vpop.f32.mrf.mxu3  ;;  %v2008_v37 = vpop.f32.mrf.mxu0 }
 0x2ff   : > { %v2009_v56 = vadd.f32 %v2008_v37, %v5851_v50  ;;  %2349 = vmatpush.bf16.msrb.mxu0 %v4271_v30 }
 0x300   : > { %v2097_v42 = vpop.f32.mrf.mxu1  ;;  %v2274_v46 = vadd.f32 %v2273_v25, %v2185_v41 }
 0x301   : > { %v2098_v57 = vadd.f32 %v2097_v42, %v2009_v56 }
 0x302   : > { %v2717_v29 = vpack.c.bf16 %v2274_v46, %v2096_v28  ;;  %v3143_v60 = vadd.f32 %v3142_v54, %v2274_v46  ;;  %v3319_v35 = vmul.f32 %v2274_v46, %v2274_v46  ;;  %v4527_v54 = vor.u32 %v4847_v15, %v4526_v34 }
 0x303   : > { %v3107_v55 = vadd.f32 %v3106_v49, %v2098_v57  ;;  %v3326_v48 = vmul.f32 %v2098_v57, %v2098_v57 }
 0x304   : > { %2845 = vst [vmem:[%s5476_s29 + $0x90] sm:$0xff] %v2717_v29  ;;  %v3726_v19 = vadd.f32 %v3725_v63, %v3319_v35  ;;  %2438 = vmatpush.bf16.msrb.mxu1 %v4527_v54 }
 0x305   : > { %v3690_v5 = vadd.f32 %v3689_v24, %v3326_v48  ;;  %v2186_v23 = vpop.f32.mrf.mxu2 }
 0x306   : > { %v2187_v40 = vadd.f32 %v2186_v23, %v5858_v31  ;;  %v2275_v22 = vpop.f32.mrf.mxu3  ;;  %v2011_v16 = vpop.f32.mrf.mxu0 }
 0x307   : > { %v2012_v41 = vadd.f32 %v2011_v16, %v5851_v50 }
 0x308   : > { %v2100_v28 = vpop.f32.mrf.mxu1  ;;  %v2276_v49 = vadd.f32 %v2275_v22, %v2187_v40 }
 0x309   : > { %v2101_v25 = vadd.f32 %v2100_v28, %v2012_v41  ;;  %2050 = vmatmul.bf16.gmra.mxu0 %v5515_v4 }
 0x30a   : > { %v2721_v63 = vpack.c.bf16 %v2276_v49, %v2098_v57  ;;  %v3144_v24 = vadd.f32 %v3143_v60, %v2276_v49  ;;  %v3327_v37 = vmul.f32 %v2276_v49, %v2276_v49  ;;  %2228 = vmatmul.bf16.gmra.mxu2 %v5515_v4 }
 0x30b   : > { %2139 = vmatmul.bf16.gmra.mxu1 %v5518_v17  ;;  %v3108_v21 = vadd.f32 %v3107_v55, %v2101_v25  ;;  %v3334_v45 = vmul.f32 %v2101_v25, %v2101_v25  ;;  %2317 = vmatmul.bf16.gmra.mxu3 %v5518_v17 }
 0x30c   : > { %2849 = vst [vmem:[%s5476_s29 + $0xb0] sm:$0xff] %v2721_v63  ;;  %v3727_v56 = vadd.f32 %v3726_v19, %v3327_v37 }
 0x30d   : > { %v3691_v42 = vadd.f32 %v3690_v5, %v3334_v45  ;;  %v2189_v44 = vpop.f32.mrf.mxu2 }
 0x30e   : > { %v2190_v46 = vadd.f32 %v2189_v44, %v5858_v31  ;;  %v2278_v29 = vpop.f32.mrf.mxu3  ;;  %v2013_v35 = vpop.f32.mrf.mxu0  ;;  %v4771_v44 = vld [vmem:[#allocation5 + $0x1c] sm:$0xf] }
 0x30f   : > { %v2014_v57 = vadd.f32 %v2013_v35, %v5851_v50 }
 0x310   : > { %v2102_v60 = vpop.f32.mrf.mxu1  ;;  %v2279_v48 = vadd.f32 %v2278_v29, %v2190_v46  ;;  %v4240_v46 = vld [vmem:[#allocation5 + $0x38] sm:$0xf0] }
 0x311   : > { %v2103_v23 = vadd.f32 %v2102_v60, %v2014_v57  ;;  %v4835_v29 = vld [vmem:[#allocation5 + $0x21c] sm:$0xf] }
 0x312   : > { %v2725_v6 = vpack.c.bf16 %v2279_v48, %v2101_v25  ;;  %v3145_v61 = vadd.f32 %v3144_v24, %v2279_v48  ;;  %v3335_v55 = vmul.f32 %v2279_v48, %v2279_v48  ;;  %v4243_v48 = vor.u32 %v4771_v44, %v4240_v46 }
 0x313   : > { %v3109_v34 = vadd.f32 %v3108_v21, %v2103_v23  ;;  %v3342_v40 = vmul.f32 %v2103_v23, %v2103_v23 }
 0x314   : > { %2853 = vst [vmem:[%s5476_s29 + $0xd0] sm:$0xff] %v2725_v6  ;;  %v3728_v22 = vadd.f32 %v3727_v56, %v3335_v55  ;;  %2528 = vmatpush.bf16.msrb.mxu2 %v4243_v48 }
 0x315   : > { %v3692_v16 = vadd.f32 %v3691_v42, %v3342_v40  ;;  %v2191_v19 = vpop.f32.mrf.mxu2 }
 0x316   : > { %v2192_v5 = vadd.f32 %v2191_v19, %v5858_v31  ;;  %v2280_v30 = vpop.f32.mrf.mxu3  ;;  %v2016_v15 = vpop.f32.mrf.mxu0 }
 0x317   : > { %v2017_v41 = vadd.f32 %v2016_v15, %v5851_v50 }
 0x318   : > { %v2105_v28 = vpop.f32.mrf.mxu1  ;;  %v2281_v54 = vadd.f32 %v2280_v30, %v2192_v5 }
 0x319   : > { %v2106_v49 = vadd.f32 %v2105_v28, %v2017_v41  ;;  %2055 = vmatmul.bf16.gmra.mxu0 %v5533_v11 }
 0x31a   : > { %v2729_v25 = vpack.c.bf16 %v2281_v54, %v2103_v23  ;;  %v3146_v63 = vadd.f32 %v3145_v61, %v2281_v54  ;;  %v3343_v24 = vmul.f32 %v2281_v54, %v2281_v54  ;;  %2233 = vmatmul.bf16.gmra.mxu2 %v5533_v11  ;;  %v4496_v23 = vld [vmem:[#allocation5 + $0x238] sm:$0xf0]  ;;  %v4238_v54 = vld [vmem:[#allocation5 + $0x18] sm:$0xf] }
 0x31b   : > { %2144 = vmatmul.bf16.gmra.mxu1 %v5536_v18  ;;  %v3110_v37 = vadd.f32 %v3109_v34, %v2106_v49  ;;  %v3350_v21 = vmul.f32 %v2106_v49, %v2106_v49  ;;  %2322 = vmatmul.bf16.gmra.mxu3 %v5536_v18  ;;  %v4499_v55 = vor.u32 %v4835_v29, %v4496_v23  ;;  %v4839_v29 = vld [vmem:[#allocation5 + $0x234] sm:$0xf0] }
 0x31c   : > { %2857 = vst [vmem:[%s5476_s29 + $0xf0] sm:$0xff] %v2729_v25  ;;  %v3729_v45 = vadd.f32 %v3728_v22, %v3343_v24  ;;  %v4775_v25 = vld [vmem:[#allocation5 + $0x34] sm:$0xf0] }
 0x31d   : > { %v3693_v56 = vadd.f32 %v3692_v16, %v3350_v21  ;;  %v2194_v42 = vpop.f32.mrf.mxu2  ;;  %2617 = vmatpush.bf16.msrb.mxu3 %v4499_v55  ;;  %v4494_v24 = vld [vmem:[#allocation5 + $0x218] sm:$0xf]  ;;  %v4239_v46 = vor.u32 %v4775_v25, %v4238_v54 }
 0x31e   : > { %v2195_v35 = vadd.f32 %v2194_v42, %v5858_v31  ;;  %v2283_v57 = vpop.f32.mrf.mxu3  ;;  %v2018_v60 = vpop.f32.mrf.mxu0 }
 0x31f   : > { %v2019_v6 = vadd.f32 %v2018_v60, %v5851_v50  ;;  %2350 = vmatpush.bf16.msrb.mxu0 %v4239_v46 }
 0x320   : > { %v2107_v61 = vpop.f32.mrf.mxu1  ;;  %v2284_v34 = vadd.f32 %v2283_v57, %v2195_v35 }
 0x321   : > { %v2108_v40 = vadd.f32 %v2107_v61, %v2019_v6 }
 0x322   : > { %v2733_v22 = vpack.c.bf16 %v2284_v34, %v2106_v49  ;;  %v3147_v16 = vadd.f32 %v3146_v63, %v2284_v34  ;;  %v3351_v19 = vmul.f32 %v2284_v34, %v2284_v34  ;;  %v4495_v63 = vor.u32 %v4839_v29, %v4494_v24 }
 0x323   : > { %v3111_v5 = vadd.f32 %v3110_v37, %v2108_v40  ;;  %v3358_v30 = vmul.f32 %v2108_v40, %v2108_v40 }
 0x324   : > { %2861 = vst [vmem:[%s5476_s29 + $0x110] sm:$0xff] %v2733_v22  ;;  %v3730_v15 = vadd.f32 %v3729_v45, %v3351_v19  ;;  %2439 = vmatpush.bf16.msrb.mxu1 %v4495_v63 }
 0x325   : > { %v3694_v41 = vadd.f32 %v3693_v56, %v3358_v30  ;;  %v2196_v28 = vpop.f32.mrf.mxu2 }
 0x326   : > { %v2197_v21 = vadd.f32 %v2196_v28, %v5858_v31  ;;  %v2285_v42 = vpop.f32.mrf.mxu3  ;;  %v2021_v44 = vpop.f32.mrf.mxu0 }
 0x327   : > { %v2022_v35 = vadd.f32 %v2021_v44, %v5851_v50 }
 0x328   : > { %v2110_v49 = vpop.f32.mrf.mxu1  ;;  %v2286_v37 = vadd.f32 %v2285_v42, %v2197_v21 }
 0x329   : > { %v2111_v57 = vadd.f32 %v2110_v49, %v2022_v35  ;;  %2060 = vmatmul.bf16.gmra.mxu0 %v5551_v20 }
 0x32a   : > { %v2737_v45 = vpack.c.bf16 %v2286_v37, %v2108_v40  ;;  %v3148_v56 = vadd.f32 %v3147_v16, %v2286_v37  ;;  %v3359_v60 = vmul.f32 %v2286_v37, %v2286_v37  ;;  %2238 = vmatmul.bf16.gmra.mxu2 %v5551_v20 }
 0x32b   : > { %2149 = vmatmul.bf16.gmra.mxu1 %v5554_v38  ;;  %v3112_v48 = vadd.f32 %v3111_v5, %v2111_v57  ;;  %v3366_v23 = vmul.f32 %v2111_v57, %v2111_v57  ;;  %2327 = vmatmul.bf16.gmra.mxu3 %v5554_v38 }
 0x32c   : > { %2865 = vst [vmem:[%s5476_s29 + $0x130] sm:$0xff] %v2737_v45  ;;  %v3731_v6 = vadd.f32 %v3730_v15, %v3359_v60 }
 0x32d   : > { %v3695_v61 = vadd.f32 %v3694_v41, %v3366_v23  ;;  %v2199_v55 = vpop.f32.mrf.mxu2 }
 0x32e   : > { %v2200_v34 = vadd.f32 %v2199_v55, %v5858_v31  ;;  %v2288_v22 = vpop.f32.mrf.mxu3  ;;  %v2023_v19 = vpop.f32.mrf.mxu0 }
 0x32f   : > { %v2024_v40 = vadd.f32 %v2023_v19, %v5851_v50 }
 0x330   : > { %v2112_v16 = vpop.f32.mrf.mxu1  ;;  %v2289_v30 = vadd.f32 %v2288_v22, %v2200_v34 }
 0x331   : > { %v2113_v28 = vadd.f32 %v2112_v16, %v2024_v40 }
 0x332   : > { %v2741_v54 = vpack.c.bf16 %v2289_v30, %v2111_v57  ;;  %v3149_v25 = vadd.f32 %v3148_v56, %v2289_v30  ;;  %v3367_v5 = vmul.f32 %v2289_v30, %v2289_v30 }
 0x333   : > { %v3113_v24 = vadd.f32 %v3112_v48, %v2113_v28  ;;  %v3374_v21 = vmul.f32 %v2113_v28, %v2113_v28 }
 0x334   : > { %2869 = vst [vmem:[%s5476_s29 + $0x150] sm:$0xff] %v2741_v54  ;;  %v3732_v42 = vadd.f32 %v3731_v6, %v3367_v5 }
 0x335   : > { %v3696_v44 = vadd.f32 %v3695_v61, %v3374_v21  ;;  %v2201_v15 = vpop.f32.mrf.mxu2 }
 0x336   : > { %v2202_v41 = vadd.f32 %v2201_v15, %v5858_v31  ;;  %v2290_v46 = vpop.f32.mrf.mxu3  ;;  %v2026_v29 = vpop.f32.mrf.mxu0 }
 0x337   : > { %v2027_v35 = vadd.f32 %v2026_v29, %v5851_v50 }
 0x338   : > { %v2115_v49 = vpop.f32.mrf.mxu1  ;;  %v2291_v63 = vadd.f32 %v2290_v46, %v2202_v41 }
 0x339   : > { %v2116_v37 = vadd.f32 %v2115_v49, %v2027_v35  ;;  %2065 = vmatmul.bf16.gmra.mxu0 %v5569_v39 }
 0x33a   : > { %v2745_v57 = vpack.c.bf16 %v2291_v63, %v2113_v28  ;;  %v3150_v45 = vadd.f32 %v3149_v25, %v2291_v63  ;;  %v3375_v56 = vmul.f32 %v2291_v63, %v2291_v63  ;;  %2243 = vmatmul.bf16.gmra.mxu2 %v5569_v39 }
 0x33b   : > { %2154 = vmatmul.bf16.gmra.mxu1 %v5572_v36  ;;  %v3114_v60 = vadd.f32 %v3113_v24, %v2116_v37  ;;  %v3382_v48 = vmul.f32 %v2116_v37, %v2116_v37  ;;  %2332 = vmatmul.bf16.gmra.mxu3 %v5572_v36 }
 0x33c   : > { %2873 = vst [vmem:[%s5476_s29 + $0x170] sm:$0xff] %v2745_v57  ;;  %v3733_v23 = vadd.f32 %v3732_v42, %v3375_v56 }
 0x33d   : > { %v3697_v6 = vadd.f32 %v3696_v44, %v3382_v48  ;;  %v2204_v61 = vpop.f32.mrf.mxu2 }
 0x33e   : > { %v2205_v55 = vadd.f32 %v2204_v61, %v5858_v31  ;;  %v2293_v34 = vpop.f32.mrf.mxu3  ;;  %v2028_v22 = vpop.f32.mrf.mxu0 }
 0x33f   : > { %v2029_v19 = vadd.f32 %v2028_v22, %v5851_v50 }
 0x340   : > { %v2117_v40 = vpop.f32.mrf.mxu1  ;;  %v2294_v16 = vadd.f32 %v2293_v34, %v2205_v55 }
 0x341   : > { %v2118_v30 = vadd.f32 %v2117_v40, %v2029_v19 }
 0x342   : > { %v2749_v28 = vpack.c.bf16 %v2294_v16, %v2116_v37  ;;  %v3151_v54 = vadd.f32 %v3150_v45, %v2294_v16  ;;  %v3383_v25 = vmul.f32 %v2294_v16, %v2294_v16 }
 0x343   : > { %v3115_v5 = vadd.f32 %v3114_v60, %v2118_v30  ;;  %v3390_v24 = vmul.f32 %v2118_v30, %v2118_v30 }
 0x344   : > { %2877 = vst [vmem:[%s5476_s29 + $0x190] sm:$0xff] %v2749_v28  ;;  %v3734_v21 = vadd.f32 %v3733_v23, %v3383_v25 }
 0x345   : > { %v3698_v15 = vadd.f32 %v3697_v6, %v3390_v24  ;;  %v2206_v42 = vpop.f32.mrf.mxu2 }
 0x346   : > { %v2207_v44 = vadd.f32 %v2206_v42, %v5858_v31  ;;  %v2295_v41 = vpop.f32.mrf.mxu3  ;;  %v2031_v46 = vpop.f32.mrf.mxu0 }
 0x347   : > { %v2032_v29 = vadd.f32 %v2031_v46, %v5851_v50 }
 0x348   : > { %v2120_v35 = vpop.f32.mrf.mxu1  ;;  %v2296_v49 = vadd.f32 %v2295_v41, %v2207_v44 }
 0x349   : > { %v2121_v63 = vadd.f32 %v2120_v35, %v2032_v29  ;;  %2070 = vmatmul.bf16.gmra.mxu0 %v5587_v51 }
 0x34a   : > { %v2753_v37 = vpack.c.bf16 %v2296_v49, %v2118_v30  ;;  %v3152_v57 = vadd.f32 %v3151_v54, %v2296_v49  ;;  %v3391_v45 = vmul.f32 %v2296_v49, %v2296_v49  ;;  %2248 = vmatmul.bf16.gmra.mxu2 %v5587_v51 }
 0x34b   : > { %2159 = vmatmul.bf16.gmra.mxu1 %v5590_v62  ;;  %v3116_v56 = vadd.f32 %v3115_v5, %v2121_v63  ;;  %v3398_v60 = vmul.f32 %v2121_v63, %v2121_v63  ;;  %2337 = vmatmul.bf16.gmra.mxu3 %v5590_v62 }
 0x34c   : > { %2881 = vst [vmem:[%s5476_s29 + $0x1b0] sm:$0xff] %v2753_v37  ;;  %v3735_v48 = vadd.f32 %v3734_v21, %v3391_v45 }
 0x34d   : > { %v3699_v23 = vadd.f32 %v3698_v15, %v3398_v60  ;;  %v2209_v6 = vpop.f32.mrf.mxu2 }
 0x34e   : > { %v2210_v61 = vadd.f32 %v2209_v6, %v5858_v31  ;;  %v2298_v55 = vpop.f32.mrf.mxu3  ;;  %v2033_v34 = vpop.f32.mrf.mxu0 }
 0x34f   : > { %v2034_v22 = vadd.f32 %v2033_v34, %v5851_v50 }
 0x350   : > { %v2122_v19 = vpop.f32.mrf.mxu1  ;;  %v2299_v40 = vadd.f32 %v2298_v55, %v2210_v61 }
 0x351   : > { %v2123_v16 = vadd.f32 %v2122_v19, %v2034_v22 }
 0x352   : > { %v2757_v30 = vpack.c.bf16 %v2299_v40, %v2121_v63  ;;  %v3153_v28 = vadd.f32 %v3152_v57, %v2299_v40  ;;  %v3399_v54 = vmul.f32 %v2299_v40, %v2299_v40 }
 0x353   : > { %v3117_v25 = vadd.f32 %v3116_v56, %v2123_v16  ;;  %v3406_v5 = vmul.f32 %v2123_v16, %v2123_v16 }
 0x354   : > { %2885 = vst [vmem:[%s5476_s29 + $0x1d0] sm:$0xff] %v2757_v30  ;;  %v3736_v24 = vadd.f32 %v3735_v48, %v3399_v54 }
 0x355   : > { %v3700_v42 = vadd.f32 %v3699_v23, %v3406_v5  ;;  %v2211_v21 = vpop.f32.mrf.mxu2 }
 0x356   : > { %v2212_v15 = vadd.f32 %v2211_v21, %v5858_v31  ;;  %v2300_v44 = vpop.f32.mrf.mxu3  ;;  %v2036_v41 = vpop.f32.mrf.mxu0 }
 0x357   : > { %v2037_v46 = vadd.f32 %v2036_v41, %v5851_v50 }
 0x358   : > { %v2125_v29 = vpop.f32.mrf.mxu1  ;;  %v2301_v35 = vadd.f32 %v2300_v44, %v2212_v15 }
 0x359   : > { %v2126_v49 = vadd.f32 %v2125_v29, %v2037_v46  ;;  %2351 = vmatmul.bf16.vlgmr.msrb.gmra.mxu0 %v5360_v43 }
 0x35a   : > { %v2761_v63 = vpack.c.bf16 %v2301_v35, %v2123_v16  ;;  %v3154_v37 = vadd.f32 %v3153_v28, %v2301_v35  ;;  %v3407_v57 = vmul.f32 %v2301_v35, %v2301_v35  ;;  %2529 = vmatmul.bf16.vlgmr.msrb.gmra.mxu2 %v5360_v43 }
 0x35b   : > { %2440 = vmatmul.bf16.vlgmr.msrb.gmra.mxu1 %v5362_v47  ;;  %v3118_v45 = vadd.f32 %v3117_v25, %v2126_v49  ;;  %v3414_v56 = vmul.f32 %v2126_v49, %v2126_v49  ;;  %2618 = vmatmul.bf16.vlgmr.msrb.gmra.mxu3 %v5362_v47 }
 0x35c   : > { %2889 = vst [vmem:[%s5476_s29 + $0x1f0] sm:$0xff] %v2761_v63  ;;  %v3737_v60 = vadd.f32 %v3736_v24, %v3407_v57 }
 0x35d   : > { %v3701_v48 = vadd.f32 %v3700_v42, %v3414_v56  ;;  %v2214_v23 = vpop.f32.mrf.mxu2 }
 0x35e   : > { %v2215_v6 = vadd.f32 %v2214_v23, %v5858_v31  ;;  %v2303_v61 = vpop.f32.mrf.mxu3  ;;  %v2038_v55 = vpop.f32.mrf.mxu0 }
 0x35f   : > { %v2039_v34 = vadd.f32 %v2038_v55, %v5851_v50 }
 0x360   : > { %v2127_v22 = vpop.f32.mrf.mxu1  ;;  %v2304_v19 = vadd.f32 %v2303_v61, %v2215_v6 }
 0x361   : > { %v2128_v40 = vadd.f32 %v2127_v22, %v2039_v34 }
 0x362   : > { %v2765_v16 = vpack.c.bf16 %v2304_v19, %v2126_v49  ;;  %v3155_v43 = vadd.f32 %v3154_v37, %v2304_v19  ;;  %v3415_v30 = vmul.f32 %v2304_v19, %v2304_v19 }
 0x363   : > { %v3119_v28 = vadd.f32 %v3118_v45, %v2128_v40  ;;  %v3422_v54 = vmul.f32 %v2128_v40, %v2128_v40 }
 0x364   : > { %2893 = vst [vmem:[%s5476_s29 + $0x210] sm:$0xff] %v2765_v16  ;;  %v3738_v47 = vadd.f32 %v3737_v60, %v3415_v30 }
 0x365   : > { %v3702_v25 = vadd.f32 %v3701_v48, %v3422_v54  ;;  %v2216_v5 = vpop.f32.mrf.mxu2 }
 0x366   : > { %v2217_v24 = vadd.f32 %v2216_v5, %v5858_v31  ;;  %v2305_v42 = vpop.f32.mrf.mxu3  ;;  %v2041_v21 = vpop.f32.mrf.mxu0 }
 0x367   : > { %v2042_v15 = vadd.f32 %v2041_v21, %v5851_v50 }
 0x368   : > { %v2130_v44 = vpop.f32.mrf.mxu1  ;;  %v2306_v41 = vadd.f32 %v2305_v42, %v2217_v24 }
 0x369   : > { %v2131_v46 = vadd.f32 %v2130_v44, %v2042_v15  ;;  %2356 = vmatmul.bf16.gmra.mxu0 %v5372_v2 }
 0x36a   : > { %v2769_v29 = vpack.c.bf16 %v2306_v41, %v2128_v40  ;;  %v3156_v35 = vadd.f32 %v3155_v43, %v2306_v41  ;;  %v3423_v49 = vmul.f32 %v2306_v41, %v2306_v41  ;;  %2534 = vmatmul.bf16.gmra.mxu2 %v5372_v2 }
 0x36b   : > { %2445 = vmatmul.bf16.gmra.mxu1 %v5374_v3  ;;  %v3120_v63 = vadd.f32 %v3119_v28, %v2131_v46  ;;  %v3430_v37 = vmul.f32 %v2131_v46, %v2131_v46  ;;  %2623 = vmatmul.bf16.gmra.mxu3 %v5374_v3 }
 0x36c   : > { %2897 = vst [vmem:[%s5476_s29 + $0x230] sm:$0xff] %v2769_v29  ;;  %v3739_v57 = vadd.f32 %v3738_v47, %v3423_v49 }
 0x36d   : > { %v3703_v45 = vadd.f32 %v3702_v25, %v3430_v37  ;;  %v2219_v56 = vpop.f32.mrf.mxu2 }
 0x36e   : > { %v2220_v60 = vadd.f32 %v2219_v56, %v5858_v31  ;;  %v2308_v48 = vpop.f32.mrf.mxu3  ;;  %v2043_v23 = vpop.f32.mrf.mxu0 }
 0x36f   : > { %v2044_v6 = vadd.f32 %v2043_v23, %v5851_v50 }
 0x370   : > { %v2132_v61 = vpop.f32.mrf.mxu1  ;;  %v2309_v55 = vadd.f32 %v2308_v48, %v2220_v60 }
 0x371   : > { %v2133_v34 = vadd.f32 %v2132_v61, %v2044_v6 }
 0x372   : > { %v2773_v22 = vpack.c.bf16 %v2309_v55, %v2131_v46  ;;  %v3157_v2 = vadd.f32 %v3156_v35, %v2309_v55  ;;  %v3431_v19 = vmul.f32 %v2309_v55, %v2309_v55 }
 0x373   : > { %v3121_v40 = vadd.f32 %v3120_v63, %v2133_v34  ;;  %v3438_v16 = vmul.f32 %v2133_v34, %v2133_v34 }
 0x374   : > { %2901 = vst [vmem:[%s5476_s29 + $0x250] sm:$0xff] %v2773_v22  ;;  %v3740_v3 = vadd.f32 %v3739_v57, %v3431_v19 }
 0x375   : > { %v3704_v43 = vadd.f32 %v3703_v45, %v3438_v16  ;;  %v2221_v30 = vpop.f32.mrf.mxu2 }
 0x376   : > { %v2222_v28 = vadd.f32 %v2221_v30, %v5858_v31  ;;  %v2310_v54 = vpop.f32.mrf.mxu3  ;;  %v2046_v47 = vpop.f32.mrf.mxu0 }
 0x377   : > { %v2047_v25 = vadd.f32 %v2046_v47, %v5851_v50 }
 0x378   : > { %v2135_v5 = vpop.f32.mrf.mxu1  ;;  %v2311_v24 = vadd.f32 %v2310_v54, %v2222_v28 }
 0x379   : > { %v2136_v42 = vadd.f32 %v2135_v5, %v2047_v25  ;;  %2361 = vmatmul.bf16.gmra.mxu0 %v5384_v8 }
 0x37a   : > { %v2777_v21 = vpack.c.bf16 %v2311_v24, %v2133_v34  ;;  %v3158_v15 = vadd.f32 %v3157_v2, %v2311_v24  ;;  %v3439_v44 = vmul.f32 %v2311_v24, %v2311_v24  ;;  %2539 = vmatmul.bf16.gmra.mxu2 %v5384_v8 }
 0x37b   : > { %2450 = vmatmul.bf16.gmra.mxu1 %v5386_v9  ;;  %v3122_v41 = vadd.f32 %v3121_v40, %v2136_v42  ;;  %v3446_v46 = vmul.f32 %v2136_v42, %v2136_v42  ;;  %2628 = vmatmul.bf16.gmra.mxu3 %v5386_v9 }
 0x37c   : > { %2905 = vst [vmem:[%s5476_s29 + $0x270] sm:$0xff] %v2777_v21  ;;  %v3741_v29 = vadd.f32 %v3740_v3, %v3439_v44 }
 0x37d   : > { %v3705_v35 = vadd.f32 %v3704_v43, %v3446_v46  ;;  %v2224_v49 = vpop.f32.mrf.mxu2 }
 0x37e   : > { %v2225_v63 = vadd.f32 %v2224_v49, %v5858_v31  ;;  %v2313_v37 = vpop.f32.mrf.mxu3  ;;  %v2048_v57 = vpop.f32.mrf.mxu0 }
 0x37f   : > { %v2049_v45 = vadd.f32 %v2048_v57, %v5851_v50 }
 0x380   : > { %v2137_v56 = vpop.f32.mrf.mxu1  ;;  %v2314_v60 = vadd.f32 %v2313_v37, %v2225_v63 }
 0x381   : > { %v2138_v48 = vadd.f32 %v2137_v56, %v2049_v45 }
 0x382   : > { %v2781_v23 = vpack.c.bf16 %v2314_v60, %v2136_v42  ;;  %v3159_v8 = vadd.f32 %v3158_v15, %v2314_v60  ;;  %v3447_v6 = vmul.f32 %v2314_v60, %v2314_v60 }
 0x383   : > { %v3123_v61 = vadd.f32 %v3122_v41, %v2138_v48  ;;  %v3454_v55 = vmul.f32 %v2138_v48, %v2138_v48 }
 0x384   : > { %2909 = vst [vmem:[%s5476_s29 + $0x290] sm:$0xff] %v2781_v23  ;;  %v3742_v9 = vadd.f32 %v3741_v29, %v3447_v6 }
 0x385   : > { %v3706_v34 = vadd.f32 %v3705_v35, %v3454_v55  ;;  %v2226_v22 = vpop.f32.mrf.mxu2 }
 0x386   : > { %v2227_v2 = vadd.f32 %v2226_v22, %v5858_v31  ;;  %v2315_v19 = vpop.f32.mrf.mxu3  ;;  %v2051_v40 = vpop.f32.mrf.mxu0 }
 0x387   : > { %v2052_v16 = vadd.f32 %v2051_v40, %v5851_v50 }
 0x388   : > { %v2140_v3 = vpop.f32.mrf.mxu1  ;;  %v2316_v43 = vadd.f32 %v2315_v19, %v2227_v2 }
 0x389   : > { %v2141_v30 = vadd.f32 %v2140_v3, %v2052_v16  ;;  %2366 = vmatmul.bf16.gmra.mxu0 %v5396_v26 }
 0x38a   : > { %v2785_v28 = vpack.c.bf16 %v2316_v43, %v2138_v48  ;;  %v3160_v54 = vadd.f32 %v3159_v8, %v2316_v43  ;;  %v3455_v47 = vmul.f32 %v2316_v43, %v2316_v43  ;;  %2544 = vmatmul.bf16.gmra.mxu2 %v5396_v26 }
 0x38b   : > { %2455 = vmatmul.bf16.gmra.mxu1 %v5398_v27  ;;  %v3124_v25 = vadd.f32 %v3123_v61, %v2141_v30  ;;  %v3462_v5 = vmul.f32 %v2141_v30, %v2141_v30  ;;  %2633 = vmatmul.bf16.gmra.mxu3 %v5398_v27 }
 0x38c   : > { %2913 = vst [vmem:[%s5476_s29 + $0x2b0] sm:$0xff] %v2785_v28  ;;  %v3743_v24 = vadd.f32 %v3742_v9, %v3455_v47 }
 0x38d   : > { %v3707_v42 = vadd.f32 %v3706_v34, %v3462_v5  ;;  %v2229_v21 = vpop.f32.mrf.mxu2 }
 0x38e   : > { %v2230_v15 = vadd.f32 %v2229_v21, %v5858_v31  ;;  %v2318_v44 = vpop.f32.mrf.mxu3  ;;  %v2053_v41 = vpop.f32.mrf.mxu0 }
 0x38f   : > { %v2054_v46 = vadd.f32 %v2053_v41, %v5851_v50 }
 0x390   : > { %v2142_v29 = vpop.f32.mrf.mxu1  ;;  %v2319_v35 = vadd.f32 %v2318_v44, %v2230_v15 }
 0x391   : > { %v2143_v49 = vadd.f32 %v2142_v29, %v2054_v46 }
 0x392   : > { %v2789_v63 = vpack.c.bf16 %v2319_v35, %v2141_v30  ;;  %v3161_v26 = vadd.f32 %v3160_v54, %v2319_v35  ;;  %v3463_v37 = vmul.f32 %v2319_v35, %v2319_v35 }
 0x393   : > { %v3125_v57 = vadd.f32 %v3124_v25, %v2143_v49  ;;  %v3470_v45 = vmul.f32 %v2143_v49, %v2143_v49 }
 0x394   : > { %2917 = vst [vmem:[%s5476_s29 + $0x2d0] sm:$0xff] %v2789_v63  ;;  %v3744_v27 = vadd.f32 %v3743_v24, %v3463_v37 }
 0x395   : > { %v3708_v56 = vadd.f32 %v3707_v42, %v3470_v45  ;;  %v2231_v60 = vpop.f32.mrf.mxu2 }
 0x396   : > { %v2232_v48 = vadd.f32 %v2231_v60, %v5858_v31  ;;  %v2320_v23 = vpop.f32.mrf.mxu3  ;;  %v2056_v8 = vpop.f32.mrf.mxu0 }
 0x397   : > { %v2057_v6 = vadd.f32 %v2056_v8, %v5851_v50 }
 0x398   : > { %v2145_v61 = vpop.f32.mrf.mxu1  ;;  %v2321_v55 = vadd.f32 %v2320_v23, %v2232_v48 }
 0x399   : > { %v2146_v9 = vadd.f32 %v2145_v61, %v2057_v6  ;;  %2371 = vmatmul.bf16.gmra.mxu0 %v5408_v32 }
 0x39a   : > { %v2793_v34 = vpack.c.bf16 %v2321_v55, %v2143_v49  ;;  %v3162_v22 = vadd.f32 %v3161_v26, %v2321_v55  ;;  %v3471_v2 = vmul.f32 %v2321_v55, %v2321_v55  ;;  %2549 = vmatmul.bf16.gmra.mxu2 %v5408_v32 }
 0x39b   : > { %2460 = vmatmul.bf16.gmra.mxu1 %v5410_v33  ;;  %v3126_v19 = vadd.f32 %v3125_v57, %v2146_v9  ;;  %v3478_v40 = vmul.f32 %v2146_v9, %v2146_v9  ;;  %2638 = vmatmul.bf16.gmra.mxu3 %v5410_v33 }
 0x39c   : > { %2921 = vst [vmem:[%s5476_s29 + $0x2f0] sm:$0xff] %v2793_v34  ;;  %v3745_v16 = vadd.f32 %v3744_v27, %v3471_v2 }
 0x39d   : > { %v3709_v3 = vadd.f32 %v3708_v56, %v3478_v40  ;;  %v2234_v43 = vpop.f32.mrf.mxu2 }
 0x39e   : > { %v2235_v30 = vadd.f32 %v2234_v43, %v5858_v31  ;;  %v2323_v28 = vpop.f32.mrf.mxu3  ;;  %v2058_v54 = vpop.f32.mrf.mxu0 }
 0x39f   : > { %v2059_v47 = vadd.f32 %v2058_v54, %v5851_v50 }
 0x3a0   : > { %v2147_v25 = vpop.f32.mrf.mxu1  ;;  %v2324_v5 = vadd.f32 %v2323_v28, %v2235_v30 }
 0x3a1   : > { %v2148_v24 = vadd.f32 %v2147_v25, %v2059_v47 }
 0x3a2   : > { %v2797_v42 = vpack.c.bf16 %v2324_v5, %v2146_v9  ;;  %v3163_v32 = vadd.f32 %v3162_v22, %v2324_v5  ;;  %v3479_v21 = vmul.f32 %v2324_v5, %v2324_v5 }
 0x3a3   : > { %v3127_v15 = vadd.f32 %v3126_v19, %v2148_v24  ;;  %v3486_v44 = vmul.f32 %v2148_v24, %v2148_v24 }
 0x3a4   : > { %2925 = vst [vmem:[%s5476_s29 + $0x310] sm:$0xff] %v2797_v42  ;;  %v3746_v33 = vadd.f32 %v3745_v16, %v3479_v21 }
 0x3a5   : > { %v3710_v41 = vadd.f32 %v3709_v3, %v3486_v44  ;;  %v2236_v46 = vpop.f32.mrf.mxu2 }
 0x3a6   : > { %v2237_v29 = vadd.f32 %v2236_v46, %v5858_v31  ;;  %v2325_v35 = vpop.f32.mrf.mxu3  ;;  %v2061_v49 = vpop.f32.mrf.mxu0 }
 0x3a7   : > { %v2062_v63 = vadd.f32 %v2061_v49, %v5851_v50 }
 0x3a8   : > { %v2150_v26 = vpop.f32.mrf.mxu1  ;;  %v2326_v37 = vadd.f32 %v2325_v35, %v2237_v29 }
 0x3a9   : > { %v2151_v57 = vadd.f32 %v2150_v26, %v2062_v63  ;;  %2376 = vmatmul.bf16.gmra.mxu0 %v5420_v52 }
 0x3aa   : > { %v2801_v45 = vpack.c.bf16 %v2326_v37, %v2148_v24  ;;  %v3164_v27 = vadd.f32 %v3163_v32, %v2326_v37  ;;  %v3487_v56 = vmul.f32 %v2326_v37, %v2326_v37  ;;  %2554 = vmatmul.bf16.gmra.mxu2 %v5420_v52 }
 0x3ab   : > { %2465 = vmatmul.bf16.gmra.mxu1 %v5422_v53  ;;  %v3128_v60 = vadd.f32 %v3127_v15, %v2151_v57  ;;  %v3494_v48 = vmul.f32 %v2151_v57, %v2151_v57  ;;  %2643 = vmatmul.bf16.gmra.mxu3 %v5422_v53 }
 0x3ac   : > { %2929 = vst [vmem:[%s5476_s29 + $0x330] sm:$0xff] %v2801_v45  ;;  %v3747_v23 = vadd.f32 %v3746_v33, %v3487_v56 }
 0x3ad   : > { %v3711_v8 = vadd.f32 %v3710_v41, %v3494_v48  ;;  %v2239_v6 = vpop.f32.mrf.mxu2 }
 0x3ae   : > { %v2240_v61 = vadd.f32 %v2239_v6, %v5858_v31  ;;  %v2328_v55 = vpop.f32.mrf.mxu3  ;;  %v2063_v9 = vpop.f32.mrf.mxu0 }
 0x3af   : > { %v2064_v34 = vadd.f32 %v2063_v9, %v5851_v50 }
 0x3b0   : > { %v2152_v22 = vpop.f32.mrf.mxu1  ;;  %v2329_v2 = vadd.f32 %v2328_v55, %v2240_v61 }
 0x3b1   : > { %v2153_v19 = vadd.f32 %v2152_v22, %v2064_v34 }
 0x3b2   : > { %v2805_v40 = vpack.c.bf16 %v2329_v2, %v2151_v57  ;;  %v3165_v52 = vadd.f32 %v3164_v27, %v2329_v2  ;;  %v3495_v16 = vmul.f32 %v2329_v2, %v2329_v2 }
 0x3b3   : > { %v3129_v3 = vadd.f32 %v3128_v60, %v2153_v19  ;;  %v3502_v43 = vmul.f32 %v2153_v19, %v2153_v19 }
 0x3b4   : > { %2933 = vst [vmem:[%s5476_s29 + $0x350] sm:$0xff] %v2805_v40  ;;  %v3748_v53 = vadd.f32 %v3747_v23, %v3495_v16 }
 0x3b5   : > { %v3712_v30 = vadd.f32 %v3711_v8, %v3502_v43  ;;  %v2241_v28 = vpop.f32.mrf.mxu2 }
 0x3b6   : > { %v2242_v54 = vadd.f32 %v2241_v28, %v5858_v31  ;;  %v2330_v47 = vpop.f32.mrf.mxu3  ;;  %v2066_v25 = vpop.f32.mrf.mxu0 }
 0x3b7   : > { %v2067_v5 = vadd.f32 %v2066_v25, %v5851_v50 }
 0x3b8   : > { %v2155_v24 = vpop.f32.mrf.mxu1  ;;  %v2331_v42 = vadd.f32 %v2330_v47, %v2242_v54 }
 0x3b9   : > { %v2156_v32 = vadd.f32 %v2155_v24, %v2067_v5  ;;  %2381 = vmatmul.bf16.gmra.mxu0 %v5432_v58 }
 0x3ba   : > { %v2809_v21 = vpack.c.bf16 %v2331_v42, %v2153_v19  ;;  %v3166_v15 = vadd.f32 %v3165_v52, %v2331_v42  ;;  %v3503_v44 = vmul.f32 %v2331_v42, %v2331_v42  ;;  %2559 = vmatmul.bf16.gmra.mxu2 %v5432_v58 }
 0x3bb   : > { %2470 = vmatmul.bf16.gmra.mxu1 %v5434_v59  ;;  %v3130_v33 = vadd.f32 %v3129_v3, %v2156_v32  ;;  %v3510_v41 = vmul.f32 %v2156_v32, %v2156_v32  ;;  %2648 = vmatmul.bf16.gmra.mxu3 %v5434_v59  ;;  %v6348_v3 = vld [vmem:[#allocation16_spill] sm:$0xff] }
 0x3bc   : > { %2937 = vst [vmem:[%s5476_s29 + $0x370] sm:$0xff] %v2809_v21  ;;  %v3749_v46 = vadd.f32 %v3748_v53, %v3503_v44 }
 0x3bd   : > { %v3713_v29 = vadd.f32 %v3712_v30, %v3510_v41  ;;  %v2244_v35 = vpop.f32.mrf.mxu2 }
 0x3be   : > { %v2245_v49 = vadd.f32 %v2244_v35, %v5858_v31  ;;  %v2333_v63 = vpop.f32.mrf.mxu3  ;;  %v2068_v26 = vpop.f32.mrf.mxu0 }
 0x3bf   : > { %v2069_v37 = vadd.f32 %v2068_v26, %v5851_v50 }
 0x3c0   : > { %v2157_v57 = vpop.f32.mrf.mxu1  ;;  %v2334_v45 = vadd.f32 %v2333_v63, %v2245_v49  ;;  %v4983_v63 = vld [vmem:[#allocation7] sm:$0xff] }
 0x3c1   : > { %v2158_v27 = vadd.f32 %v2157_v57, %v2069_v37  ;;  %v6025_v26 = vperm.slane %v4983_v63, 6 }
 0x3c2   : > { %v2813_v56 = vpack.c.bf16 %v2334_v45, %v2156_v32  ;;  %v3167_v58 = vadd.f32 %v3166_v15, %v2334_v45  ;;  %v3511_v60 = vmul.f32 %v2334_v45, %v2334_v45 }
 0x3c3   : > { %v3131_v48 = vadd.f32 %v3130_v33, %v2158_v27  ;;  %v3518_v23 = vmul.f32 %v2158_v27, %v2158_v27 }
 0x3c4   : > { %2941 = vst [vmem:[%s5476_s29 + $0x390] sm:$0xff] %v2813_v56  ;;  %v3750_v59 = vadd.f32 %v3749_v46, %v3511_v60 }
 0x3c5   : > { %v3714_v8 = vadd.f32 %v3713_v29, %v3518_v23  ;;  %v2246_v6 = vpop.f32.mrf.mxu2 }
 0x3c6   : > { %v2247_v61 = vadd.f32 %v2246_v6, %v5858_v31  ;;  %v2335_v55 = vpop.f32.mrf.mxu3  ;;  %v2071_v9 = vpop.f32.mrf.mxu0 }
 0x3c7   : > { %v2072_v34 = vadd.f32 %v2071_v9, %v5851_v50 }
 0x3c8   : > { %v2160_v22 = vpop.f32.mrf.mxu1  ;;  %v2336_v2 = vadd.f32 %v2335_v55, %v2247_v61  ;;  %v6350_v55 = vld [vmem:[#allocation18_spill] sm:$0xff] }
 0x3c9   : > { %v2161_v19 = vadd.f32 %v2160_v22, %v2072_v34  ;;  %2386 = vmatmul.bf16.gmra.mxu0 %v5444_v10 }
 0x3ca   : > { %v2817_v40 = vpack.c.bf16 %v2336_v2, %v2158_v27  ;;  %v3168_v52 = vadd.f32 %v3167_v58, %v2336_v2  ;;  %v3519_v16 = vmul.f32 %v2336_v2, %v2336_v2  ;;  %2564 = vmatmul.bf16.gmra.mxu2 %v5444_v10 }
 0x3cb   : > { %2475 = vmatmul.bf16.gmra.mxu1 %v6348_v3  ;;  %v3132_v43 = vadd.f32 %v3131_v48, %v2161_v19  ;;  %v3526_v53 = vmul.f32 %v2161_v19, %v2161_v19  ;;  %2653 = vmatmul.bf16.gmra.mxu3 %v6348_v3 }
 0x3cc   : > { %2945 = vst [vmem:[%s5476_s29 + $0x3b0] sm:$0xff] %v2817_v40  ;;  %v3751_v30 = vadd.f32 %v3750_v59, %v3519_v16  ;;  %v6349_v59 = vld [vmem:[#allocation17_spill] sm:$0xff] }
 0x3cd   : > { %v3715_v28 = vadd.f32 %v3714_v8, %v3526_v53  ;;  %v2249_v54 = vpop.f32.mrf.mxu2 }
 0x3ce   : > { %v2250_v47 = vadd.f32 %v2249_v54, %v5858_v31  ;;  %v2338_v25 = vpop.f32.mrf.mxu3  ;;  %v2073_v5 = vpop.f32.mrf.mxu0 }
 0x3cf   : > { %v2074_v24 = vadd.f32 %v2073_v5, %v5851_v50 }
 0x3d0   : > { %v2162_v42 = vpop.f32.mrf.mxu1  ;;  %v2339_v32 = vadd.f32 %v2338_v25, %v2250_v47 }
 0x3d1   : > { %v2163_v21 = vadd.f32 %v2162_v42, %v2074_v24 }
 0x3d2   : > { %v2821_v15 = vpack.c.bf16 %v2339_v32, %v2161_v19  ;;  %v3169_v10 = vadd.f32 %v3168_v52, %v2339_v32  ;;  %v3527_v44 = vmul.f32 %v2339_v32, %v2339_v32 }
 0x3d3   : > { %v3133_v33 = vadd.f32 %v3132_v43, %v2163_v21  ;;  %v3534_v41 = vmul.f32 %v2163_v21, %v2163_v21 }
 0x3d4   : > { %2949 = vst [vmem:[%s5476_s29 + $0x3d0] sm:$0xff] %v2821_v15  ;;  %v3752_v46 = vadd.f32 %v3751_v30, %v3527_v44 }
 0x3d5   : > { %v3134_v29 = vrot.slane %v3133_v33, 4  ;;  %v3716_v35 = vadd.f32 %v3715_v28, %v3534_v41  ;;  %v2251_v49 = vpop.f32.mrf.mxu2 }
 0x3d6   : > { %v2252_v37 = vadd.f32 %v2251_v49, %v5858_v31  ;;  %v2340_v57 = vpop.f32.mrf.mxu3  ;;  %v2352_v50 = vpop.f32.mrf.mxu0  ;;  %v6032_v31 = vperm.slane %v4983_v63, 7 }
 0x3d7   : > { %v3135_v45 = vadd.f32 %v3134_v29, %v3133_v33  ;;  %v3717_v27 = vrot.slane %v3716_v35, 4  ;;  %v2353_v23 = vadd.f32 %v2352_v50, %v6025_v26 }
 0x3d8   : > { %v2441_v56 = vpop.f32.mrf.mxu1  ;;  %v2341_v58 = vadd.f32 %v2340_v57, %v2252_v37 }
 0x3d9   : > { %v3136_v60 = vrot.slane %v3135_v45, 2  ;;  %v3718_v48 = vadd.f32 %v3717_v27, %v3716_v35  ;;  %2391 = vmatmul.bf16.gmra.mxu0 %v6349_v59  ;;  %v2442_v3 = vadd.f32 %v2441_v56, %v2353_v23 }
 0x3da   : > { %v2825_v8 = vpack.c.bf16 %v2341_v58, %v2163_v21  ;;  %v3170_v6 = vadd.f32 %v3169_v10, %v2341_v58  ;;  %v3535_v61 = vmul.f32 %v2341_v58, %v2341_v58  ;;  %2569 = vmatmul.bf16.gmra.mxu2 %v6349_v59 }
 0x3db   : > { %2480 = vmatmul.bf16.gmra.mxu1 %v6350_v55  ;;  %v3719_v9 = vrot.slane %v3718_v48, 2  ;;  %2658 = vmatmul.bf16.gmra.mxu3 %v6350_v55  ;;  %v3137_v2 = vadd.f32 %v3136_v60, %v3135_v45  ;;  %v3288_v44 = vmul.f32 %v2442_v3, %v2442_v3 }
 0x3dc   : > { %2953 = vst [vmem:[%s5476_s29 + $0x3f0] sm:$0xff] %v2825_v8  ;;  %v3171_v34 = vrot.slane %v3170_v6, 4  ;;  %v3753_v22 = vadd.f32 %v3752_v46, %v3535_v61 }
 0x3dd   : > { %v3720_v19 = vadd.f32 %v3719_v9, %v3718_v48  ;;  %v2530_v40 = vpop.f32.mrf.mxu2  ;;  %v3138_v24 = vrot.slane %v3137_v2, 1 }
 0x3de   : > { %v3172_v52 = vadd.f32 %v3171_v34, %v3170_v6  ;;  %v3754_v16 = vrot.slane %v3753_v22, 4  ;;  %v2531_v43 = vadd.f32 %v2530_v40, %v6032_v31  ;;  %v2619_v53 = vpop.f32.mrf.mxu3  ;;  %v2354_v30 = vpop.f32.mrf.mxu0 }
 0x3df   : > { %v2355_v28 = vadd.f32 %v2354_v30, %v6025_v26  ;;  %v3721_v42 = vrot.slane %v3720_v19, 1  ;;  %v3139_v35 = vadd.f32 %v3138_v24, %v3137_v2 }
 0x3e0   : > { %v2443_v54 = vpop.f32.mrf.mxu1  ;;  %v3173_v47 = vrot.slane %v3172_v52, 2  ;;  %v3755_v25 = vadd.f32 %v3754_v16, %v3753_v22  ;;  %v2620_v5 = vadd.f32 %v2619_v53, %v2531_v43 }
 0x3e1   : > { %v2444_v32 = vadd.f32 %v2443_v54, %v2355_v28  ;;  %v3722_v49 = vadd.f32 %v3721_v42, %v3720_v19  ;;  %v3262_v8 = vrot.slane %v3139_v35, 4 }
 0x3e2   : > { %v3174_v21 = vadd.f32 %v3173_v47, %v3172_v52  ;;  %v3756_v15 = vrot.slane %v3755_v25, 2  ;;  %v2702_v10 = vpack.c.bf16 %v2620_v5, %v2442_v3  ;;  %v3289_v61 = vmul.f32 %v2620_v5, %v2620_v5 }
 0x3e3   : > { %v3177_v33 = vadd.f32 %v2444_v32, %v2442_v3  ;;  %v3296_v41 = vmul.f32 %v2444_v32, %v2444_v32  ;;  %v3845_v6 = vrot.slane %v3722_v49, 4 }
 0x3e4   : > { %v3175_v46 = vrot.slane %v3174_v21, 1  ;;  %v3757_v29 = vadd.f32 %v3756_v15, %v3755_v25  ;;  %2830 = vst [vmem:[%s5476_s29 + $0x18] sm:$0xff] %v2702_v10 }
 0x3e5   : > { %v3760_v63 = vadd.f32 %v3296_v41, %v3288_v44  ;;  %v2532_v37 = vpop.f32.mrf.mxu2 }
 0x3e6   : > { %v3176_v57 = vadd.f32 %v3175_v46, %v3174_v21  ;;  %v3758_v50 = vrot.slane %v3757_v29, 1  ;;  %v2533_v45 = vadd.f32 %v2532_v37, %v6032_v31  ;;  %v2621_v27 = vpop.f32.mrf.mxu3  ;;  %v2357_v56 = vpop.f32.mrf.mxu0 }
 0x3e7   : > { %v2358_v58 = vadd.f32 %v2357_v56, %v6025_v26 }
 0x3e8   : > { %v2446_v60 = vpop.f32.mrf.mxu1  ;;  %v3263_v48 = vrot.slane %v3176_v57, 3  ;;  %v3759_v23 = vadd.f32 %v3758_v50, %v3757_v29  ;;  %v2622_v59 = vadd.f32 %v2621_v27, %v2533_v45 }
 0x3e9   : > { %v2447_v55 = vadd.f32 %v2446_v60, %v2358_v58  ;;  %2396 = vmatmul.bf16.gmra.mxu0 %v5479_v1 }
 0x3ea   : > { %v3846_v9 = vrot.slane %v3759_v23, 3  ;;  %v2706_v34 = vpack.c.bf16 %v2622_v59, %v2444_v32  ;;  %v3214_v22 = vadd.f32 %v2622_v59, %v2620_v5  ;;  %v3297_v2 = vmul.f32 %v2622_v59, %v2622_v59  ;;  %2574 = vmatmul.bf16.gmra.mxu2 %v5479_v1 }
 0x3eb   : > { %2485 = vmatmul.bf16.gmra.mxu1 %v5482_v13  ;;  %v3178_v19 = vadd.f32 %v3177_v33, %v2447_v55  ;;  %v3304_v40 = vmul.f32 %v2447_v55, %v2447_v55  ;;  %2663 = vmatmul.bf16.gmra.mxu3 %v5482_v13  ;;  %v6046_v52 = vsel %vm3272_vm3, %v3262_v8, %v3263_v48 }
 0x3ec   : > { %2834 = vst [vmem:[%s5476_s29 + $0x38] sm:$0xff] %v2706_v34  ;;  %v3797_v16 = vadd.f32 %v3297_v2, %v3289_v61  ;;  %v6050_v3 = vsel %vm3272_vm3, %v3845_v6, %v3846_v9 }
 0x3ed   : > { %v3761_v43 = vadd.f32 %v3760_v63, %v3304_v40  ;;  %v2535_v53 = vpop.f32.mrf.mxu2 }
 0x3ee   : > { %v2536_v30 = vadd.f32 %v2535_v53, %v6032_v31  ;;  %v2624_v28 = vpop.f32.mrf.mxu3  ;;  %v2359_v54 = vpop.f32.mrf.mxu0 }
 0x3ef   : > { %v2360_v1 = vadd.f32 %v2359_v54, %v6025_v26 }
 0x3f0   : > { %v2448_v47 = vpop.f32.mrf.mxu1  ;;  %v2625_v25 = vadd.f32 %v2624_v28, %v2536_v30 }
 0x3f1   : > { %v2449_v13 = vadd.f32 %v2448_v47, %v2360_v1 }
 0x3f2   : > { %v2710_v5 = vpack.c.bf16 %v2625_v25, %v2447_v55  ;;  %v3215_v24 = vadd.f32 %v3214_v22, %v2625_v25  ;;  %v3305_v42 = vmul.f32 %v2625_v25, %v2625_v25 }
 0x3f3   : > { %v3179_v32 = vadd.f32 %v3178_v19, %v2449_v13  ;;  %v3312_v21 = vmul.f32 %v2449_v13, %v2449_v13 }
 0x3f4   : > { %2838 = vst [vmem:[%s5476_s29 + $0x58] sm:$0xff] %v2710_v5  ;;  %v3798_v15 = vadd.f32 %v3797_v16, %v3305_v42 }
 0x3f5   : > { %v3762_v10 = vadd.f32 %v3761_v43, %v3312_v21  ;;  %v2537_v44 = vpop.f32.mrf.mxu2 }
 0x3f6   : > { %v2538_v33 = vadd.f32 %v2537_v44, %v6032_v31  ;;  %v2626_v41 = vpop.f32.mrf.mxu3  ;;  %v2362_v46 = vpop.f32.mrf.mxu0 }
 0x3f7   : > { %v2363_v29 = vadd.f32 %v2362_v46, %v6025_v26 }
 0x3f8   : > { %v2451_v35 = vpop.f32.mrf.mxu1  ;;  %v2627_v49 = vadd.f32 %v2626_v41, %v2538_v33 }
 0x3f9   : > { %v2452_v63 = vadd.f32 %v2451_v35, %v2363_v29  ;;  %2401 = vmatmul.bf16.gmra.mxu0 %v5497_v0 }
 0x3fa   : > { %v2714_v37 = vpack.c.bf16 %v2627_v49, %v2449_v13  ;;  %v3216_v57 = vadd.f32 %v3215_v24, %v2627_v49  ;;  %v3313_v50 = vmul.f32 %v2627_v49, %v2627_v49  ;;  %2579 = vmatmul.bf16.gmra.mxu2 %v5497_v0 }
 0x3fb   : > { %2490 = vmatmul.bf16.gmra.mxu1 %v5500_v7  ;;  %v3180_v45 = vadd.f32 %v3179_v32, %v2452_v63  ;;  %v3320_v27 = vmul.f32 %v2452_v63, %v2452_v63  ;;  %2668 = vmatmul.bf16.gmra.mxu3 %v5500_v7 }
 0x3fc   : > { %2842 = vst [vmem:[%s5476_s29 + $0x78] sm:$0xff] %v2714_v37  ;;  %v3799_v56 = vadd.f32 %v3798_v15, %v3313_v50 }
 0x3fd   : > { %v3763_v58 = vadd.f32 %v3762_v10, %v3320_v27  ;;  %v2540_v60 = vpop.f32.mrf.mxu2 }
 0x3fe   : > { %v2541_v48 = vadd.f32 %v2540_v60, %v6032_v31  ;;  %v2629_v23 = vpop.f32.mrf.mxu3  ;;  %v2364_v59 = vpop.f32.mrf.mxu0 }
 0x3ff   : > { %v2365_v8 = vadd.f32 %v2364_v59, %v6025_v26 }
 0x400   : > { %v2453_v6 = vpop.f32.mrf.mxu1  ;;  %v2630_v61 = vadd.f32 %v2629_v23, %v2541_v48 }
 0x401   : > { %v2454_v55 = vadd.f32 %v2453_v6, %v2365_v8 }
 0x402   : > { %v2718_v9 = vpack.c.bf16 %v2630_v61, %v2452_v63  ;;  %v3217_v0 = vadd.f32 %v3216_v57, %v2630_v61  ;;  %v3321_v34 = vmul.f32 %v2630_v61, %v2630_v61 }
 0x403   : > { %v3181_v22 = vadd.f32 %v3180_v45, %v2454_v55  ;;  %v3328_v2 = vmul.f32 %v2454_v55, %v2454_v55 }
 0x404   : > { %2846 = vst [vmem:[%s5476_s29 + $0x98] sm:$0xff] %v2718_v9  ;;  %v3800_v7 = vadd.f32 %v3799_v56, %v3321_v34 }
 0x405   : > { %v3764_v19 = vadd.f32 %v3763_v58, %v3328_v2  ;;  %v2542_v40 = vpop.f32.mrf.mxu2 }
 0x406   : > { %v2543_v16 = vadd.f32 %v2542_v40, %v6032_v31  ;;  %v2631_v43 = vpop.f32.mrf.mxu3  ;;  %v2367_v53 = vpop.f32.mrf.mxu0 }
 0x407   : > { %v2368_v30 = vadd.f32 %v2367_v53, %v6025_v26 }
 0x408   : > { %v2456_v28 = vpop.f32.mrf.mxu1  ;;  %v2632_v54 = vadd.f32 %v2631_v43, %v2543_v16 }
 0x409   : > { %v2457_v1 = vadd.f32 %v2456_v28, %v2368_v30  ;;  %2406 = vmatmul.bf16.gmra.mxu0 %v5515_v4 }
 0x40a   : > { %v2722_v47 = vpack.c.bf16 %v2632_v54, %v2454_v55  ;;  %v3218_v25 = vadd.f32 %v3217_v0, %v2632_v54  ;;  %v3329_v13 = vmul.f32 %v2632_v54, %v2632_v54  ;;  %2584 = vmatmul.bf16.gmra.mxu2 %v5515_v4 }
 0x40b   : > { %2495 = vmatmul.bf16.gmra.mxu1 %v5518_v17  ;;  %v3182_v5 = vadd.f32 %v3181_v22, %v2457_v1  ;;  %v3336_v24 = vmul.f32 %v2457_v1, %v2457_v1  ;;  %2673 = vmatmul.bf16.gmra.mxu3 %v5518_v17 }
 0x40c   : > { %2850 = vst [vmem:[%s5476_s29 + $0xb8] sm:$0xff] %v2722_v47  ;;  %v3801_v42 = vadd.f32 %v3800_v7, %v3329_v13 }
 0x40d   : > { %v3765_v32 = vadd.f32 %v3764_v19, %v3336_v24  ;;  %v2545_v21 = vpop.f32.mrf.mxu2 }
 0x40e   : > { %v2546_v15 = vadd.f32 %v2545_v21, %v6032_v31  ;;  %v2634_v10 = vpop.f32.mrf.mxu3  ;;  %v2369_v44 = vpop.f32.mrf.mxu0 }
 0x40f   : > { %v2370_v33 = vadd.f32 %v2369_v44, %v6025_v26 }
 0x410   : > { %v2458_v41 = vpop.f32.mrf.mxu1  ;;  %v2635_v46 = vadd.f32 %v2634_v10, %v2546_v15 }
 0x411   : > { %v2459_v29 = vadd.f32 %v2458_v41, %v2370_v33 }
 0x412   : > { %v2726_v35 = vpack.c.bf16 %v2635_v46, %v2457_v1  ;;  %v3219_v4 = vadd.f32 %v3218_v25, %v2635_v46  ;;  %v3337_v49 = vmul.f32 %v2635_v46, %v2635_v46 }
 0x413   : > { %v3183_v63 = vadd.f32 %v3182_v5, %v2459_v29  ;;  %v3344_v37 = vmul.f32 %v2459_v29, %v2459_v29 }
 0x414   : > { %2854 = vst [vmem:[%s5476_s29 + $0xd8] sm:$0xff] %v2726_v35  ;;  %v3802_v17 = vadd.f32 %v3801_v42, %v3337_v49 }
 0x415   : > { %v3766_v57 = vadd.f32 %v3765_v32, %v3344_v37  ;;  %v2547_v50 = vpop.f32.mrf.mxu2 }
 0x416   : > { %v2548_v45 = vadd.f32 %v2547_v50, %v6032_v31  ;;  %v2636_v27 = vpop.f32.mrf.mxu3  ;;  %v2372_v56 = vpop.f32.mrf.mxu0 }
 0x417   : > { %v2373_v58 = vadd.f32 %v2372_v56, %v6025_v26 }
 0x418   : > { %v2461_v60 = vpop.f32.mrf.mxu1  ;;  %v2637_v48 = vadd.f32 %v2636_v27, %v2548_v45 }
 0x419   : > { %v2462_v23 = vadd.f32 %v2461_v60, %v2373_v58  ;;  %2411 = vmatmul.bf16.gmra.mxu0 %v5533_v11 }
 0x41a   : > { %v2730_v59 = vpack.c.bf16 %v2637_v48, %v2459_v29  ;;  %v3220_v8 = vadd.f32 %v3219_v4, %v2637_v48  ;;  %v3345_v6 = vmul.f32 %v2637_v48, %v2637_v48  ;;  %2589 = vmatmul.bf16.gmra.mxu2 %v5533_v11 }
 0x41b   : > { %2500 = vmatmul.bf16.gmra.mxu1 %v5536_v18  ;;  %v3184_v61 = vadd.f32 %v3183_v63, %v2462_v23  ;;  %v3352_v55 = vmul.f32 %v2462_v23, %v2462_v23  ;;  %2678 = vmatmul.bf16.gmra.mxu3 %v5536_v18 }
 0x41c   : > { %2858 = vst [vmem:[%s5476_s29 + $0xf8] sm:$0xff] %v2730_v59  ;;  %v3803_v9 = vadd.f32 %v3802_v17, %v3345_v6 }
 0x41d   : > { %v3767_v0 = vadd.f32 %v3766_v57, %v3352_v55  ;;  %v2550_v34 = vpop.f32.mrf.mxu2 }
 0x41e   : > { %v2551_v22 = vadd.f32 %v2550_v34, %v6032_v31  ;;  %v2639_v2 = vpop.f32.mrf.mxu3  ;;  %v2374_v7 = vpop.f32.mrf.mxu0 }
 0x41f   : > { %v2375_v19 = vadd.f32 %v2374_v7, %v6025_v26 }
 0x420   : > { %v2463_v40 = vpop.f32.mrf.mxu1  ;;  %v2640_v16 = vadd.f32 %v2639_v2, %v2551_v22 }
 0x421   : > { %v2464_v43 = vadd.f32 %v2463_v40, %v2375_v19 }
 0x422   : > { %v2734_v53 = vpack.c.bf16 %v2640_v16, %v2462_v23  ;;  %v3221_v11 = vadd.f32 %v3220_v8, %v2640_v16  ;;  %v3353_v30 = vmul.f32 %v2640_v16, %v2640_v16 }
 0x423   : > { %v3185_v28 = vadd.f32 %v3184_v61, %v2464_v43  ;;  %v3360_v54 = vmul.f32 %v2464_v43, %v2464_v43 }
 0x424   : > { %2862 = vst [vmem:[%s5476_s29 + $0x118] sm:$0xff] %v2734_v53  ;;  %v3804_v18 = vadd.f32 %v3803_v9, %v3353_v30 }
 0x425   : > { %v3768_v1 = vadd.f32 %v3767_v0, %v3360_v54  ;;  %v2552_v47 = vpop.f32.mrf.mxu2 }
 0x426   : > { %v2553_v25 = vadd.f32 %v2552_v47, %v6032_v31  ;;  %v2641_v13 = vpop.f32.mrf.mxu3  ;;  %v2377_v5 = vpop.f32.mrf.mxu0 }
 0x427   : > { %v2378_v24 = vadd.f32 %v2377_v5, %v6025_v26 }
 0x428   : > { %v2466_v42 = vpop.f32.mrf.mxu1  ;;  %v2642_v32 = vadd.f32 %v2641_v13, %v2553_v25 }
 0x429   : > { %v2467_v21 = vadd.f32 %v2466_v42, %v2378_v24  ;;  %2416 = vmatmul.bf16.gmra.mxu0 %v5551_v20 }
 0x42a   : > { %v2738_v15 = vpack.c.bf16 %v2642_v32, %v2464_v43  ;;  %v3222_v10 = vadd.f32 %v3221_v11, %v2642_v32  ;;  %v3361_v44 = vmul.f32 %v2642_v32, %v2642_v32  ;;  %2594 = vmatmul.bf16.gmra.mxu2 %v5551_v20 }
 0x42b   : > { %2505 = vmatmul.bf16.gmra.mxu1 %v5554_v38  ;;  %v3186_v33 = vadd.f32 %v3185_v28, %v2467_v21  ;;  %v3368_v41 = vmul.f32 %v2467_v21, %v2467_v21  ;;  %2683 = vmatmul.bf16.gmra.mxu3 %v5554_v38 }
 0x42c   : > { %2866 = vst [vmem:[%s5476_s29 + $0x138] sm:$0xff] %v2738_v15  ;;  %v3805_v46 = vadd.f32 %v3804_v18, %v3361_v44 }
 0x42d   : > { %v3769_v29 = vadd.f32 %v3768_v1, %v3368_v41  ;;  %v2555_v35 = vpop.f32.mrf.mxu2 }
 0x42e   : > { %v2556_v4 = vadd.f32 %v2555_v35, %v6032_v31  ;;  %v2644_v49 = vpop.f32.mrf.mxu3  ;;  %v2379_v63 = vpop.f32.mrf.mxu0 }
 0x42f   : > { %v2380_v37 = vadd.f32 %v2379_v63, %v6025_v26 }
 0x430   : > { %v2468_v17 = vpop.f32.mrf.mxu1  ;;  %v2645_v57 = vadd.f32 %v2644_v49, %v2556_v4 }
 0x431   : > { %v2469_v50 = vadd.f32 %v2468_v17, %v2380_v37 }
 0x432   : > { %v2742_v45 = vpack.c.bf16 %v2645_v57, %v2467_v21  ;;  %v3223_v20 = vadd.f32 %v3222_v10, %v2645_v57  ;;  %v3369_v27 = vmul.f32 %v2645_v57, %v2645_v57 }
 0x433   : > { %v3187_v56 = vadd.f32 %v3186_v33, %v2469_v50  ;;  %v3376_v58 = vmul.f32 %v2469_v50, %v2469_v50 }
 0x434   : > { %2870 = vst [vmem:[%s5476_s29 + $0x158] sm:$0xff] %v2742_v45  ;;  %v3806_v38 = vadd.f32 %v3805_v46, %v3369_v27 }
 0x435   : > { %v3770_v60 = vadd.f32 %v3769_v29, %v3376_v58  ;;  %v2557_v48 = vpop.f32.mrf.mxu2 }
 0x436   : > { %v2558_v23 = vadd.f32 %v2557_v48, %v6032_v31  ;;  %v2646_v59 = vpop.f32.mrf.mxu3  ;;  %v2382_v8 = vpop.f32.mrf.mxu0 }
 0x437   : > { %v2383_v6 = vadd.f32 %v2382_v8, %v6025_v26 }
 0x438   : > { %v2471_v61 = vpop.f32.mrf.mxu1  ;;  %v2647_v55 = vadd.f32 %v2646_v59, %v2558_v23 }
 0x439   : > { %v2472_v9 = vadd.f32 %v2471_v61, %v2383_v6  ;;  %2421 = vmatmul.bf16.gmra.mxu0 %v5569_v39 }
 0x43a   : > { %v2746_v0 = vpack.c.bf16 %v2647_v55, %v2469_v50  ;;  %v3224_v34 = vadd.f32 %v3223_v20, %v2647_v55  ;;  %v3377_v22 = vmul.f32 %v2647_v55, %v2647_v55  ;;  %2599 = vmatmul.bf16.gmra.mxu2 %v5569_v39 }
 0x43b   : > { %2510 = vmatmul.bf16.gmra.mxu1 %v5572_v36  ;;  %v3188_v2 = vadd.f32 %v3187_v56, %v2472_v9  ;;  %v3384_v7 = vmul.f32 %v2472_v9, %v2472_v9  ;;  %2688 = vmatmul.bf16.gmra.mxu3 %v5572_v36 }
 0x43c   : > { %2874 = vst [vmem:[%s5476_s29 + $0x178] sm:$0xff] %v2746_v0  ;;  %v3807_v19 = vadd.f32 %v3806_v38, %v3377_v22 }
 0x43d   : > { %v3771_v40 = vadd.f32 %v3770_v60, %v3384_v7  ;;  %v2560_v16 = vpop.f32.mrf.mxu2 }
 0x43e   : > { %v2561_v43 = vadd.f32 %v2560_v16, %v6032_v31  ;;  %v2649_v53 = vpop.f32.mrf.mxu3  ;;  %v2384_v11 = vpop.f32.mrf.mxu0 }
 0x43f   : > { %v2385_v30 = vadd.f32 %v2384_v11, %v6025_v26 }
 0x440   : > { %v2473_v28 = vpop.f32.mrf.mxu1  ;;  %v2650_v54 = vadd.f32 %v2649_v53, %v2561_v43 }
 0x441   : > { %v2474_v18 = vadd.f32 %v2473_v28, %v2385_v30 }
 0x442   : > { %v2750_v1 = vpack.c.bf16 %v2650_v54, %v2472_v9  ;;  %v3225_v39 = vadd.f32 %v3224_v34, %v2650_v54  ;;  %v3385_v47 = vmul.f32 %v2650_v54, %v2650_v54 }
 0x443   : > { %v3189_v25 = vadd.f32 %v3188_v2, %v2474_v18  ;;  %v3392_v13 = vmul.f32 %v2474_v18, %v2474_v18 }
 0x444   : > { %2878 = vst [vmem:[%s5476_s29 + $0x198] sm:$0xff] %v2750_v1  ;;  %v3808_v36 = vadd.f32 %v3807_v19, %v3385_v47 }
 0x445   : > { %v3772_v5 = vadd.f32 %v3771_v40, %v3392_v13  ;;  %v2562_v24 = vpop.f32.mrf.mxu2 }
 0x446   : > { %v2563_v42 = vadd.f32 %v2562_v24, %v6032_v31  ;;  %v2651_v32 = vpop.f32.mrf.mxu3  ;;  %v2387_v21 = vpop.f32.mrf.mxu0 }
 0x447   : > { %v2388_v15 = vadd.f32 %v2387_v21, %v6025_v26 }
 0x448   : > { %v2476_v10 = vpop.f32.mrf.mxu1  ;;  %v2652_v44 = vadd.f32 %v2651_v32, %v2563_v42 }
 0x449   : > { %v2477_v33 = vadd.f32 %v2476_v10, %v2388_v15  ;;  %2426 = vmatmul.bf16.gmra.mxu0 %v5587_v51 }
 0x44a   : > { %v2754_v41 = vpack.c.bf16 %v2652_v44, %v2474_v18  ;;  %v3226_v46 = vadd.f32 %v3225_v39, %v2652_v44  ;;  %v3393_v29 = vmul.f32 %v2652_v44, %v2652_v44  ;;  %2604 = vmatmul.bf16.gmra.mxu2 %v5587_v51 }
 0x44b   : > { %2515 = vmatmul.bf16.gmra.mxu1 %v5590_v62  ;;  %v3190_v35 = vadd.f32 %v3189_v25, %v2477_v33  ;;  %v3400_v4 = vmul.f32 %v2477_v33, %v2477_v33  ;;  %2693 = vmatmul.bf16.gmra.mxu3 %v5590_v62 }
 0x44c   : > { %2882 = vst [vmem:[%s5476_s29 + $0x1b8] sm:$0xff] %v2754_v41  ;;  %v3809_v49 = vadd.f32 %v3808_v36, %v3393_v29 }
 0x44d   : > { %v3773_v63 = vadd.f32 %v3772_v5, %v3400_v4  ;;  %v2565_v37 = vpop.f32.mrf.mxu2 }
 0x44e   : > { %v2566_v17 = vadd.f32 %v2565_v37, %v6032_v31  ;;  %v2654_v57 = vpop.f32.mrf.mxu3  ;;  %v2389_v50 = vpop.f32.mrf.mxu0 }
 0x44f   : > { %v2390_v45 = vadd.f32 %v2389_v50, %v6025_v26 }
 0x450   : > { %v2478_v20 = vpop.f32.mrf.mxu1  ;;  %v2655_v27 = vadd.f32 %v2654_v57, %v2566_v17 }
 0x451   : > { %v2479_v56 = vadd.f32 %v2478_v20, %v2390_v45 }
 0x452   : > { %v2758_v58 = vpack.c.bf16 %v2655_v27, %v2477_v33  ;;  %v3227_v51 = vadd.f32 %v3226_v46, %v2655_v27  ;;  %v3401_v38 = vmul.f32 %v2655_v27, %v2655_v27 }
 0x453   : > { %v3191_v60 = vadd.f32 %v3190_v35, %v2479_v56  ;;  %v3408_v48 = vmul.f32 %v2479_v56, %v2479_v56 }
 0x454   : > { %2886 = vst [vmem:[%s5476_s29 + $0x1d8] sm:$0xff] %v2758_v58  ;;  %v3810_v62 = vadd.f32 %v3809_v49, %v3401_v38 }
 0x455   : > { %v3774_v23 = vadd.f32 %v3773_v63, %v3408_v48  ;;  %v2567_v59 = vpop.f32.mrf.mxu2 }
 0x456   : > { %v2568_v8 = vadd.f32 %v2567_v59, %v6032_v31  ;;  %v2656_v6 = vpop.f32.mrf.mxu3  ;;  %v2392_v61 = vpop.f32.mrf.mxu0 }
 0x457   : > { %v2393_v55 = vadd.f32 %v2392_v61, %v6025_v26 }
 0x458   : > { %v2481_v9 = vpop.f32.mrf.mxu1  ;;  %v2657_v0 = vadd.f32 %v2656_v6, %v2568_v8 }
 0x459   : > { %v2482_v34 = vadd.f32 %v2481_v9, %v2393_v55 }
 0x45a   : > { %v2762_v22 = vpack.c.bf16 %v2657_v0, %v2479_v56  ;;  %v3228_v2 = vadd.f32 %v3227_v51, %v2657_v0  ;;  %v3409_v7 = vmul.f32 %v2657_v0, %v2657_v0 }
 0x45b   : > { %v3192_v19 = vadd.f32 %v3191_v60, %v2482_v34  ;;  %v3416_v40 = vmul.f32 %v2482_v34, %v2482_v34 }
 0x45c   : > { %2890 = vst [vmem:[%s5476_s29 + $0x1f8] sm:$0xff] %v2762_v22  ;;  %v3811_v16 = vadd.f32 %v3810_v62, %v3409_v7 }
 0x45d   : > { %v3775_v43 = vadd.f32 %v3774_v23, %v3416_v40  ;;  %v2570_v53 = vpop.f32.mrf.mxu2 }
 0x45e   : > { %v2571_v11 = vadd.f32 %v2570_v53, %v6032_v31  ;;  %v2659_v30 = vpop.f32.mrf.mxu3  ;;  %v2394_v28 = vpop.f32.mrf.mxu0 }
 0x45f   : > { %v2395_v54 = vadd.f32 %v2394_v28, %v6025_v26 }
 0x460   : > { %v2483_v18 = vpop.f32.mrf.mxu1  ;;  %v2660_v1 = vadd.f32 %v2659_v30, %v2571_v11 }
 0x461   : > { %v2484_v39 = vadd.f32 %v2483_v18, %v2395_v54 }
 0x462   : > { %v2766_v47 = vpack.c.bf16 %v2660_v1, %v2482_v34  ;;  %v3229_v25 = vadd.f32 %v3228_v2, %v2660_v1  ;;  %v3417_v13 = vmul.f32 %v2660_v1, %v2660_v1 }
 0x463   : > { %v3193_v36 = vadd.f32 %v3192_v19, %v2484_v39  ;;  %v3424_v5 = vmul.f32 %v2484_v39, %v2484_v39 }
 0x464   : > { %2894 = vst [vmem:[%s5476_s29 + $0x218] sm:$0xff] %v2766_v47  ;;  %v3812_v24 = vadd.f32 %v3811_v16, %v3417_v13 }
 0x465   : > { %v3776_v42 = vadd.f32 %v3775_v43, %v3424_v5  ;;  %v2572_v32 = vpop.f32.mrf.mxu2 }
 0x466   : > { %v2573_v21 = vadd.f32 %v2572_v32, %v6032_v31  ;;  %v2661_v15 = vpop.f32.mrf.mxu3  ;;  %v2397_v10 = vpop.f32.mrf.mxu0 }
 0x467   : > { %v2398_v44 = vadd.f32 %v2397_v10, %v6025_v26 }
 0x468   : > { %v2486_v33 = vpop.f32.mrf.mxu1  ;;  %v2662_v41 = vadd.f32 %v2661_v15, %v2573_v21 }
 0x469   : > { %v2487_v46 = vadd.f32 %v2486_v33, %v2398_v44 }
 0x46a   : > { %v2770_v29 = vpack.c.bf16 %v2662_v41, %v2484_v39  ;;  %v3230_v35 = vadd.f32 %v3229_v25, %v2662_v41  ;;  %v3425_v4 = vmul.f32 %v2662_v41, %v2662_v41 }
 0x46b   : > { %v3194_v49 = vadd.f32 %v3193_v36, %v2487_v46  ;;  %v3432_v63 = vmul.f32 %v2487_v46, %v2487_v46 }
 0x46c   : > { %2898 = vst [vmem:[%s5476_s29 + $0x238] sm:$0xff] %v2770_v29  ;;  %v3813_v37 = vadd.f32 %v3812_v24, %v3425_v4 }
 0x46d   : > { %v3777_v17 = vadd.f32 %v3776_v42, %v3432_v63  ;;  %v2575_v57 = vpop.f32.mrf.mxu2 }
 0x46e   : > { %v2576_v50 = vadd.f32 %v2575_v57, %v6032_v31  ;;  %v2664_v45 = vpop.f32.mrf.mxu3  ;;  %v2399_v20 = vpop.f32.mrf.mxu0 }
 0x46f   : > { %v2400_v27 = vadd.f32 %v2399_v20, %v6025_v26 }
 0x470   : > { %v2488_v56 = vpop.f32.mrf.mxu1  ;;  %v2665_v58 = vadd.f32 %v2664_v45, %v2576_v50 }
 0x471   : > { %v2489_v51 = vadd.f32 %v2488_v56, %v2400_v27 }
 0x472   : > { %v2774_v38 = vpack.c.bf16 %v2665_v58, %v2487_v46  ;;  %v3231_v60 = vadd.f32 %v3230_v35, %v2665_v58  ;;  %v3433_v48 = vmul.f32 %v2665_v58, %v2665_v58 }
 0x473   : > { %v3195_v62 = vadd.f32 %v3194_v49, %v2489_v51  ;;  %v3440_v23 = vmul.f32 %v2489_v51, %v2489_v51 }
 0x474   : > { %2902 = vst [vmem:[%s5476_s29 + $0x258] sm:$0xff] %v2774_v38  ;;  %v3814_v59 = vadd.f32 %v3813_v37, %v3433_v48 }
 0x475   : > { %v3778_v8 = vadd.f32 %v3777_v17, %v3440_v23  ;;  %v2577_v6 = vpop.f32.mrf.mxu2 }
 0x476   : > { %v2578_v61 = vadd.f32 %v2577_v6, %v6032_v31  ;;  %v2666_v55 = vpop.f32.mrf.mxu3  ;;  %v2402_v9 = vpop.f32.mrf.mxu0 }
 0x477   : > { %v2403_v0 = vadd.f32 %v2402_v9, %v6025_v26 }
 0x478   : > { %v2491_v34 = vpop.f32.mrf.mxu1  ;;  %v2667_v22 = vadd.f32 %v2666_v55, %v2578_v61 }
 0x479   : > { %v2492_v2 = vadd.f32 %v2491_v34, %v2403_v0 }
 0x47a   : > { %v2778_v7 = vpack.c.bf16 %v2667_v22, %v2489_v51  ;;  %v3232_v19 = vadd.f32 %v3231_v60, %v2667_v22  ;;  %v3441_v40 = vmul.f32 %v2667_v22, %v2667_v22 }
 0x47b   : > { %v6129_v16 = vadd.f32 %v3195_v62, %v2492_v2  ;;  %v3448_v43 = vmul.f32 %v2492_v2, %v2492_v2 }
 0x47c   : > { %2906 = vst [vmem:[%s5476_s29 + $0x278] sm:$0xff] %v2778_v7  ;;  %v3815_v53 = vadd.f32 %v3814_v59, %v3441_v40 }
 0x47d   : > { %v6132_v11 = vadd.f32 %v3778_v8, %v3448_v43  ;;  %v2580_v30 = vpop.f32.mrf.mxu2 }
 0x47e   : > { %v2581_v28 = vadd.f32 %v2580_v30, %v6032_v31  ;;  %v2669_v54 = vpop.f32.mrf.mxu3  ;;  %v2404_v18 = vpop.f32.mrf.mxu0 }
 0x47f   : > { %v2405_v5 = vadd.f32 %v2404_v18, %v6025_v26 }
 0x480   : > { %v2493_v1 = vpop.f32.mrf.mxu1  ;;  %v2670_v39 = vadd.f32 %v2669_v54, %v2581_v28 }
 0x481   : > { %v6142_v10 = vadd.f32 %v2493_v1, %v2405_v5 }
 0x482   : > { %v2782_v47 = vpack.c.bf16 %v2670_v39, %v2492_v2  ;;  %v6135_v25 = vadd.f32 %v3232_v19, %v2670_v39  ;;  %v3449_v13 = vmul.f32 %v2670_v39, %v2670_v39 }
 0x484   : > { %2910 = vst [vmem:[%s5476_s29 + $0x298] sm:$0xff] %v2782_v47  ;;  %v6138_v36 = vadd.f32 %v3815_v53, %v3449_v13 }
 0x485   : > { %v2582_v24 = vpop.f32.mrf.mxu2 }
 0x486   : > { %v2583_v42 = vadd.f32 %v2582_v24, %v6032_v31  ;;  %v2671_v32 = vpop.f32.mrf.mxu3  ;;  %v2407_v21 = vpop.f32.mrf.mxu0 }
 0x487   : > { %v2408_v41 = vadd.f32 %v2407_v21, %v6025_v26 }
 0x488   : > { %v2496_v15 = vpop.f32.mrf.mxu1  ;;  %v6144_v44 = vadd.f32 %v2671_v32, %v2583_v42 }
 0x489   : > { %v6151_v63 = vadd.f32 %v2496_v15, %v2408_v41 }
 0x48a   : > { %v2786_v33 = vpack.c.bf16 %v6144_v44, %v6142_v10 }
 0x48c   : > { %2914 = vst [vmem:[%s5476_s29 + $0x2b8] sm:$0xff] %v2786_v33 }
 0x48d   : > { %v2585_v46 = vpop.f32.mrf.mxu2 }
 0x48e   : > { %v2586_v29 = vadd.f32 %v2585_v46, %v6032_v31  ;;  %v2674_v35 = vpop.f32.mrf.mxu3  ;;  %v2409_v4 = vpop.f32.mrf.mxu0 }
 0x48f   : > { %v2410_v57 = vadd.f32 %v2409_v4, %v6025_v26 }
 0x490   : > { %v2498_v49 = vpop.f32.mrf.mxu1  ;;  %v6153_v37 = vadd.f32 %v2674_v35, %v2586_v29  ;;  %v3456_v35 = vmul.f32 %v6142_v10, %v6142_v10 }
 0x491   : > { %v2499_v58 = vadd.f32 %v2498_v49, %v2410_v57 }
 0x492   : > { %v2790_v17 = vpack.c.bf16 %v6153_v37, %v6151_v63 }
 0x494   : > { %2918 = vst [vmem:[%s5476_s29 + $0x2d8] sm:$0xff] %v2790_v17 }
 0x495   : > { %v2587_v50 = vpop.f32.mrf.mxu2 }
 0x496   : > { %v2588_v45 = vadd.f32 %v2587_v50, %v6032_v31  ;;  %v2676_v20 = vpop.f32.mrf.mxu3  ;;  %v2412_v27 = vpop.f32.mrf.mxu0  ;;  %v3197_v50 = vadd.f32 %v6129_v16, %v6142_v10 }
 0x497   : > { %v2413_v60 = vadd.f32 %v2412_v27, %v6025_v26 }
 0x498   : > { %v2501_v56 = vpop.f32.mrf.mxu1  ;;  %v6160_v51 = vadd.f32 %v2676_v20, %v2588_v45  ;;  %v3464_v45 = vmul.f32 %v6151_v63, %v6151_v63 }
 0x499   : > { %v2502_v6 = vadd.f32 %v2501_v56, %v2413_v60  ;;  %v3198_v60 = vadd.f32 %v3197_v50, %v6151_v63 }
 0x49a   : > { %v2794_v38 = vpack.c.bf16 %v6160_v51, %v2499_v58 }
 0x49b   : > { %v3480_v16 = vmul.f32 %v2502_v6, %v2502_v6 }
 0x49c   : > { %2922 = vst [vmem:[%s5476_s29 + $0x2f8] sm:$0xff] %v2794_v38  ;;  %v3780_v38 = vadd.f32 %v6132_v11, %v3456_v35  ;;  %v3234_v11 = vadd.f32 %v6135_v25, %v6144_v44  ;;  %v3473_v25 = vmul.f32 %v6160_v51, %v6160_v51 }
 0x49d   : > { %v2590_v48 = vpop.f32.mrf.mxu2 }
 0x49e   : > { %v2591_v62 = vadd.f32 %v2590_v48, %v6032_v31  ;;  %v2679_v23 = vpop.f32.mrf.mxu3  ;;  %v2414_v59 = vpop.f32.mrf.mxu0  ;;  %v3472_v48 = vmul.f32 %v2499_v58, %v2499_v58 }
 0x49f   : > { %v2415_v9 = vadd.f32 %v2414_v59, %v6025_v26  ;;  %v3781_v59 = vadd.f32 %v3780_v38, %v3464_v45 }
 0x4a0   : > { %v2503_v8 = vpop.f32.mrf.mxu1  ;;  %v6166_v61 = vadd.f32 %v2679_v23, %v2591_v62  ;;  %v3457_v62 = vmul.f32 %v6144_v44, %v6144_v44 }
 0x4a1   : > { %v2504_v19 = vadd.f32 %v2503_v8, %v2415_v9  ;;  %v3199_v8 = vadd.f32 %v3198_v60, %v2499_v58 }
 0x4a2   : > { %v2798_v55 = vpack.c.bf16 %v6166_v61, %v2502_v6  ;;  %v3817_v63 = vadd.f32 %v6138_v36, %v3457_v62 }
 0x4a3   : > { %v3200_v9 = vadd.f32 %v3199_v8, %v2502_v6 }
 0x4a4   : > { %2926 = vst [vmem:[%s5476_s29 + $0x318] sm:$0xff] %v2798_v55  ;;  %v3782_v55 = vadd.f32 %v3781_v59, %v3472_v48 }
 0x4a5   : > { %v2592_v0 = vpop.f32.mrf.mxu2 }
 0x4a6   : > { %v2593_v34 = vadd.f32 %v2592_v0, %v6032_v31  ;;  %v2681_v22 = vpop.f32.mrf.mxu3  ;;  %v2417_v2 = vpop.f32.mrf.mxu0  ;;  %v3488_v0 = vmul.f32 %v2504_v19, %v2504_v19 }
 0x4a7   : > { %v2418_v53 = vadd.f32 %v2417_v2, %v6025_v26 }
 0x4a8   : > { %v2506_v7 = vpop.f32.mrf.mxu1  ;;  %v6172_v40 = vadd.f32 %v2681_v22, %v2593_v34  ;;  %v3465_v22 = vmul.f32 %v6153_v37, %v6153_v37 }
 0x4a9   : > { %v2507_v39 = vadd.f32 %v2506_v7, %v2418_v53  ;;  %v3201_v53 = vadd.f32 %v3200_v9, %v2504_v19 }
 0x4aa   : > { %v2802_v43 = vpack.c.bf16 %v6172_v40, %v2504_v19  ;;  %v3481_v19 = vmul.f32 %v6166_v61, %v6166_v61  ;;  %v3489_v35 = vmul.f32 %v6172_v40, %v6172_v40 }
 0x4ac   : > { %2930 = vst [vmem:[%s5476_s29 + $0x338] sm:$0xff] %v2802_v43  ;;  %v3783_v43 = vadd.f32 %v3782_v55, %v3480_v16 }
 0x4ad   : > { %v2595_v30 = vpop.f32.mrf.mxu2 }
 0x4ae   : > { %v2596_v28 = vadd.f32 %v2595_v30, %v6032_v31  ;;  %v2684_v54 = vpop.f32.mrf.mxu3  ;;  %v2419_v18 = vpop.f32.mrf.mxu0  ;;  %v3496_v30 = vmul.f32 %v2507_v39, %v2507_v39 }
 0x4af   : > { %v2420_v5 = vadd.f32 %v2419_v18, %v6025_v26  ;;  %v3784_v18 = vadd.f32 %v3783_v43, %v3488_v0 }
 0x4b0   : > { %v2508_v1 = vpop.f32.mrf.mxu1  ;;  %v6178_v47 = vadd.f32 %v2684_v54, %v2596_v28  ;;  %v3235_v54 = vadd.f32 %v3234_v11, %v6153_v37 }
 0x4b1   : > { %v2509_v33 = vadd.f32 %v2508_v1, %v2420_v5  ;;  %v3202_v1 = vadd.f32 %v3201_v53, %v2507_v39  ;;  %v3818_v5 = vadd.f32 %v3817_v63, %v3465_v22 }
 0x4b2   : > { %v2806_v13 = vpack.c.bf16 %v6178_v47, %v2507_v39  ;;  %v3497_v50 = vmul.f32 %v6178_v47, %v6178_v47 }
 0x4b4   : > { %2934 = vst [vmem:[%s5476_s29 + $0x358] sm:$0xff] %v2806_v13  ;;  %v3504_v13 = vmul.f32 %v2509_v33, %v2509_v33 }
 0x4b5   : > { %v2597_v24 = vpop.f32.mrf.mxu2 }
 0x4b6   : > { %v2598_v42 = vadd.f32 %v2597_v24, %v6032_v31  ;;  %v2686_v32 = vpop.f32.mrf.mxu3  ;;  %v2422_v21 = vpop.f32.mrf.mxu0  ;;  %v3236_v24 = vadd.f32 %v3235_v54, %v6160_v51 }
 0x4b7   : > { %v2423_v29 = vadd.f32 %v2422_v21, %v6025_v26  ;;  %v3203_v21 = vadd.f32 %v3202_v1, %v2509_v33 }
 0x4b8   : > { %v2511_v15 = vpop.f32.mrf.mxu1  ;;  %v6184_v41 = vadd.f32 %v2686_v32, %v2598_v42  ;;  %v3785_v32 = vadd.f32 %v3784_v18, %v3496_v30 }
 0x4b9   : > { %v2512_v27 = vadd.f32 %v2511_v15, %v2423_v29  ;;  %v3237_v29 = vadd.f32 %v3236_v24, %v6166_v61 }
 0x4ba   : > { %v2810_v46 = vpack.c.bf16 %v6184_v41, %v2509_v33  ;;  %v3786_v39 = vadd.f32 %v3785_v32, %v3504_v13 }
 0x4bb   : > { %v3512_v15 = vmul.f32 %v2512_v27, %v2512_v27 }
 0x4bc   : > { %2938 = vst [vmem:[%s5476_s29 + $0x378] sm:$0xff] %v2810_v46  ;;  %v3819_v46 = vadd.f32 %v3818_v5, %v3473_v25 }
 0x4bd   : > { %v2600_v4 = vpop.f32.mrf.mxu2  ;;  %v3787_v61 = vadd.f32 %v3786_v39, %v3512_v15 }
 0x4be   : > { %v2601_v49 = vadd.f32 %v2600_v4, %v6032_v31  ;;  %v2689_v17 = vpop.f32.mrf.mxu3  ;;  %v2424_v57 = vpop.f32.mrf.mxu0  ;;  %v3204_v4 = vadd.f32 %v3203_v21, %v2512_v27  ;;  %v3820_v51 = vadd.f32 %v3819_v46, %v3481_v19 }
 0x4bf   : > { %v2425_v10 = vadd.f32 %v2424_v57, %v6025_v26  ;;  %v3238_v57 = vadd.f32 %v3237_v29, %v6172_v40 }
 0x4c0   : > { %v2513_v20 = vpop.f32.mrf.mxu1  ;;  %v6196_v56 = vadd.f32 %v2689_v17, %v2601_v49  ;;  %v3821_v62 = vadd.f32 %v3820_v51, %v3489_v35 }
 0x4c1   : > { %v2514_v44 = vadd.f32 %v2513_v20, %v2425_v10 }
 0x4c2   : > { %v2814_v23 = vpack.c.bf16 %v6196_v56, %v2512_v27  ;;  %v3239_v27 = vadd.f32 %v3238_v57, %v6178_v47  ;;  %v3822_v55 = vadd.f32 %v3821_v62, %v3497_v50  ;;  %v3513_v0 = vmul.f32 %v6196_v56, %v6196_v56 }
 0x4c3   : > { %v3520_v49 = vmul.f32 %v2514_v44, %v2514_v44  ;;  %v3205_v38 = vadd.f32 %v3204_v4, %v2514_v44 }
 0x4c4   : > { %2942 = vst [vmem:[%s5476_s29 + $0x398] sm:$0xff] %v2814_v23  ;;  %v3505_v23 = vmul.f32 %v6184_v41, %v6184_v41  ;;  %v3240_v9 = vadd.f32 %v3239_v27, %v6184_v41 }
 0x4c5   : > { %v2602_v34 = vpop.f32.mrf.mxu2  ;;  %v3788_v8 = vadd.f32 %v3787_v61, %v3520_v49 }
 0x4c6   : > { %v2603_v2 = vadd.f32 %v2602_v34, %v6032_v31  ;;  %v2691_v7 = vpop.f32.mrf.mxu3  ;;  %v2427_v58 = vpop.f32.mrf.mxu0  ;;  %v3823_v63 = vadd.f32 %v3822_v55, %v3505_v23  ;;  %v3241_v22 = vadd.f32 %v3240_v9, %v6196_v56 }
 0x4c7   : > { %v2428_v28 = vadd.f32 %v2427_v58, %v6025_v26 }
 0x4c8   : > { %v2516_v6 = vpop.f32.mrf.mxu1  ;;  %v2692_v36 = vadd.f32 %v2691_v7, %v2603_v2  ;;  %v3824_v43 = vadd.f32 %v3823_v63, %v3513_v0 }
 0x4c9   : > { %v2517_v37 = vadd.f32 %v2516_v6, %v2428_v28 }
 0x4ca   : > { %v2818_v42 = vpack.c.bf16 %v2692_v36, %v2514_v44  ;;  %v3521_v2 = vmul.f32 %v2692_v36, %v2692_v36  ;;  %v3242_v53 = vadd.f32 %v3241_v22, %v2692_v36 }
 0x4cb   : > { %v3528_v60 = vmul.f32 %v2517_v37, %v2517_v37  ;;  %v3206_v16 = vadd.f32 %v3205_v38, %v2517_v37 }
 0x4cc   : > { %2946 = vst [vmem:[%s5476_s29 + $0x3b8] sm:$0xff] %v2818_v42  ;;  %v3825_v56 = vadd.f32 %v3824_v43, %v3521_v2 }
 0x4cd   : > { %v2605_v17 = vpop.f32.mrf.mxu2  ;;  %v3789_v34 = vadd.f32 %v3788_v8, %v3528_v60 }
 0x4ce   : > { %v2606_v33 = vadd.f32 %v2605_v17, %v6032_v31  ;;  %v2694_v45 = vpop.f32.mrf.mxu3  ;;  %v2429_v20 = vpop.f32.mrf.mxu0 }
 0x4cf   : > { %v2430_v48 = vadd.f32 %v2429_v20, %v6025_v26 }
 0x4d0   : > { %v2695_v40 = vadd.f32 %v2694_v45, %v2606_v33  ;;  %v2518_v59 = vpop.f32.mrf.mxu1 }
 0x4d1   : > { %v2519_v10 = vadd.f32 %v2518_v59, %v2430_v48 }
 0x4d2   : > { %v2822_v26 = vpack.c.bf16 %v2695_v40, %v2517_v37  ;;  %v3529_v30 = vmul.f32 %v2695_v40, %v2695_v40  ;;  %v3243_v44 = vadd.f32 %v3242_v53, %v2695_v40 }
 0x4d3   : > { %v3207_v47 = vadd.f32 %v3206_v16, %v2519_v10  ;;  %v3536_v11 = vmul.f32 %v2519_v10, %v2519_v10 }
 0x4d4   : > { %2950 = vst [vmem:[%s5476_s29 + $0x3d8] sm:$0xff] %v2822_v26  ;;  %v3826_v5 = vadd.f32 %v3825_v56, %v3529_v30 }
 0x4d5   : > { %v3208_v7 = vrot.slane %v3207_v47, 4  ;;  %v3790_v58 = vadd.f32 %v3789_v34, %v3536_v11  ;;  %v2607_v41 = vpop.f32.mrf.mxu2 }
 0x4d6   : > { %v2608_v28 = vadd.f32 %v2607_v41, %v6032_v31  ;;  %v2696_v25 = vpop.f32.mrf.mxu3 }
 0x4d7   : > { %v3209_v6 = vadd.f32 %v3208_v7, %v3207_v47  ;;  %v3791_v54 = vrot.slane %v3790_v58, 4 }
 0x4d8   : > { %v2697_v18 = vadd.f32 %v2696_v25, %v2608_v28 }
 0x4d9   : > { %v3210_v1 = vrot.slane %v3209_v6, 2  ;;  %v3792_v13 = vadd.f32 %v3791_v54, %v3790_v58 }
 0x4da   : > { %v2826_v36 = vpack.c.bf16 %v2697_v18, %v2519_v10  ;;  %v3244_v24 = vadd.f32 %v3243_v44, %v2697_v18  ;;  %v3537_v19 = vmul.f32 %v2697_v18, %v2697_v18 }
 0x4db   : > { %v3793_v31 = vrot.slane %v3792_v13, 2  ;;  %v3211_v42 = vadd.f32 %v3210_v1, %v3209_v6 }
 0x4dc   : > { %2954 = vst [vmem:[%s5476_s29 + $0x3f8] sm:$0xff] %v2826_v36  ;;  %v3245_v32 = vrot.slane %v3244_v24, 4  ;;  %v3827_v21 = vadd.f32 %v3826_v5, %v3537_v19 }
 0x4dd   : > { %5101 = shalt.err (!%p5098_p10)
}
 0x4de   : > { %s5212_s29 = smov 512   ;;  %s5213_s11 = smov 32   ;;  %v3794_v15 = vadd.f32 %v3793_v31, %v3792_v13  ;;  %v3246_v37 = vadd.f32 %v3245_v32, %v3244_v24  ;;  %v3828_v46 = vrot.slane %v3827_v21, 4  ;;  %v3212_v29 = vrot.slane %v3211_v42, 1 }
 0x4df   : > { %4908 = dma.vmem_to_hbm [thread:$0]  (%p5312_p3), %s6241_s6, 16384, %s3885_s7, %s3859_s8, %s5212_s29, %s5212_s29, %s5213_s11   ;;  %vm3274_vm4 = vcmask 1046534   ;;  %vm3276_vm5 = vcmask 1045508   ;;  %vm3278_vm6 = vcmask 1043456  }
 0x4e0   : > { %v3247_v35 = vrot.slane %v3246_v37, 2  ;;  %v3829_v39 = vadd.f32 %v3828_v46, %v3827_v21  ;;  %v3795_v4 = vrot.slane %v3794_v15, 1  ;;  %s4082_s12 = sshll.u32 %s5342_s30, 3  ;;  %s4730_s13 = sshll.u32 %s5265_s22, 3  ;;  %v3213_v51 = vadd.f32 %v3212_v29, %v3211_v42 }
 0x4e1   : > { %s3897_s28 = scalar_lea.hbm %s6330_s4, %s4730_s13  ;;  %s3863_s6 = sand.u32 1, %s5265_s22  }
 0x4e2   : > { %v3248_v49 = vadd.f32 %v3247_v35, %v3246_v37  ;;  %v3830_v17 = vrot.slane %v3829_v39, 2  ;;  %v3796_v33 = vadd.f32 %v3795_v4, %v3794_v15  ;;  %s3911_s15 = scalar_lea.hbm %s6331_s5, %s4730_s13  ;;  %v3264_v61 = vrot.slane %v3213_v51, 2  ;;  %s287_s30 = scalar_lea.vmem [#allocation9], %s4082_s12 }
 0x4e3   : > { %s3899_s16 = sshll.u32 %s287_s30, 4  ;;  %s3901_s24 = sshll.u32 %s3897_s28, 4  ;;  %s3900_s16 = int_to_ptr.vmem [resolvable:$true] %s3899_s16  ;;  %s3902_s24 = int_to_ptr.hbm [resolvable:$true] %s3901_s24 }
 0x4e4   : > { %v3249_v57 = vrot.slane %v3248_v49, 1  ;;  %v3831_v50 = vadd.f32 %v3830_v17, %v3829_v39  ;;  %v3847_v48 = vrot.slane %v3796_v33, 2  ;;  %s3915_s10 = sshll.u32 %s3911_s15, 4  ;;  %s294_s29 = scalar_lea.vmem [#allocation11], %s4082_s12  ;;  %s6275_s10 = int_to_ptr.hbm [resolvable:$true] %s3915_s10 }
 0x4e5   : > { %s3913_s22 = sshll.u32 %s294_s29, 4  ;;  %s6277_s11 = scalar_lea.sflag [#allocation10], %s3863_s6  ;;  %s6273_s22 = int_to_ptr.vmem [resolvable:$true] %s3913_s22 }
 0x4e6   : > { %v3250_v45 = vadd.f32 %v3249_v57, %v3248_v49  ;;  %v3832_v20 = vrot.slane %v3831_v50, 1  ;;  %s5116_s12 = sshra.s32 %s3902_s24, 4  ;;  %s5122_s28 = scalar_lea.hbm %s6330_s4, 16  ;;  %s5117_s12 = int_to_ptr.hbm [resolvable:$true] %s5116_s12 }
 0x4e7   : > { %s5118_s13 = scalar_lea.hbm %s5117_s12, 8  ;;  %p5123_p5 = scmp.lt.s32.totalorder %s5117_s12, %s6330_s4 }
 0x4e8   : > { %v3265_v38 = vrot.slane %v3250_v45, 1  ;;  %v3833_v60 = vadd.f32 %v3832_v20, %v3831_v50  ;;  %p5119_p12 = scmp.ne.s32.totalorder %s5117_s12, %s5118_s13  ;;  %p5124_p7 = scmp.lt.s32.totalorder %s5122_s28, %s5118_s13 }
 0x4ea   : > { %v3848_v62 = vrot.slane %v3833_v60, 1  ;;  %v3275_v27 = vsel %vm3274_vm4, %v3264_v61, %v3265_v38  ;;  %p5120_p13 = pnand %p5119_p12, %p5312_p3  ;;  %p5125_p1 = por %p5124_p7, %p5123_p5 }
 0x4eb   : > { %v3277_v23 = vsel %vm3276_vm5, %v6046_v52, %v3275_v27 }
 0x4ec   : > { %v3279_v40 = vsel %vm3278_vm6, %v5875_v14, %v3277_v23  ;;  %v3853_v59 = vsel %vm3274_vm4, %v3847_v48, %v3848_v62  ;;  %p5121_p0 = pneg %p5120_p13 }
 0x4ed   : > { %3281 = vst [vmem:[%s287_s30] sm:$0xff] %v3279_v40  ;;  %v3854_v8 = vsel %vm3276_vm5, %v6050_v3, %v3853_v59 }
 0x4ee   : > { %p5126_p4 = pnand %p5125_p1, %p5121_p0 }
 0x4f0   : > { %5129 = shalt.err (!%p5126_p4)
}
 0x4f1   : > { %4909 = dma.vmem_to_hbm [thread:$0]  (%p5312_p3), %s3900_s16, 128, %s3902_s24, %s6277_s11   ;;  %v3855_v14 = vsel %vm3278_vm6, %v5880_v12, %v3854_v8 }
 0x4f2   : > { %3857 = vst [vmem:[%s294_s29] sm:$0xff] %v3855_v14  ;;  %s5144_s6 = sshra.s32 %s6275_s10, 4  ;;  %s5150_s13 = scalar_lea.hbm %s6331_s5, 16  ;;  %s5145_s6 = int_to_ptr.hbm [resolvable:$true] %s5144_s6 }
 0x4f3   : > { %s5146_s15 = scalar_lea.hbm %s5145_s6, 8  ;;  %p5151_p9 = scmp.lt.s32.totalorder %s5145_s6, %s6331_s5 }
 0x4f4   : > { %p5147_p8 = scmp.ne.s32.totalorder %s5145_s6, %s5146_s15  ;;  %p5152_p10 = scmp.lt.s32.totalorder %s5150_s13, %s5146_s15 }
 0x4f6   : > { %p5148_p11 = pnand %p5147_p8, %p5312_p3  ;;  %p5153_p12 = por %p5152_p10, %p5151_p9 }
 0x4f8   : > { %p5149_p2 = pneg %p5148_p11 }
 0x4fa   : > { %p5154_p13 = pnand %p5153_p12, %p5149_p2 }
 0x4fc   : > { %5157 = shalt.err (!%p5154_p13)
}
 0x4fd   : > { %4910 = dma.vmem_to_hbm [thread:$0]  (%p5312_p3), %s6273_s22, 128, %s6275_s10, %s6277_s11  }
 0x4fe PF: > { %s3927_s16 = sand.u32 1, %s5192_s18   ;;  %p6351_p0 = scmp.ge.s32.totalorder %s5204_s21, 2 }
 0x4ff   : > { %s3928_s24 = scalar_lea.sflag [#allocation4], %s3927_s16 }
 0x500   : > { %p4926_p5 = pnand %p6351_p0, %p5281_p6 }
 0x502   : > { %p4927_p7 = pneg %p4926_p5 }
 0x504   : > { %5183 = dma.done.wait (%p4927_p7), %s3928_s24, 16384  }
 0x505   : > { %5185 = vsyncadd (%p4927_p7), %s3928_s24, 4294950912  ;;  %s3937_s29 = sand.u32 1, %s4068_s23  }
 0x506   : > { %s3938_s17 = scalar_lea.sflag [#allocation10], %s3937_s29 }
 0x507   : > { %5187 = dma.done.wait (%p4927_p7), %s3938_s17, 256  }
 0x508   : > { %5189 = vsyncadd (%p4927_p7), %s3938_s17, 4294967040  ;;  %p23_p3 = scmp.ge.s32.totalorder %s5302_s14, 4   ;;  %s6352_s18 = smov %s5196_s19 }
 0x509   : > { %s6353_s19 = smov %s5200_s20  ;;  %s6354_s20 = smov %s5318_s26 }
 0x50a   : > { %s6355_s21 = smov %s5302_s14  ;;  %25 = sbr.rel (!%p23_p3) target bundleno = 8 (0x8), region = 117 }
 0x50f   :  { %3954 = vsyncpa [#allocation3], 1 }
 0x510   :  { %3956 = vsyncpa [#allocation3 + $0x1], 1 }
 0x511   :  { %3957 = vsyncpa [#allocation6], 1 }
 0x512   :  { %3958 = vsyncpa [#allocation4], 1 }
 0x513   :  { %3960 = vsyncpa [#allocation4 + $0x1], 1 }
 0x514   :  { %3961 = vsyncpa [#allocation10], 1 }
 0x515   :  { %3963 = vsyncpa [#allocation10 + $0x1], 1 }

</bundles_post_ra>
